<compile_context>
chip_gen: v7x
topology: tpu7x:2x2x1
jax: 0.10.0
libtpu: 0.0.40
codegen_flags: <defaults>
</compile_context>

<pallas_src>
import functools
import math

import jax
import jax.numpy as jnp
from jax.experimental import pallas as pl
from jax.experimental.pallas import tpu as pltpu


# ---------------------------------------------------------------------------
# Fused forward kernel (one grid step == one tile of `bb` batch elements)
# ---------------------------------------------------------------------------
def _dqtn_kernel(
    x_ref, pe_ref,
    wq_ref, bq_ref, wk_ref, bk_ref, wv_ref, bv_ref,
    wo_ref, bo_ref, ln1g_ref, ln1b_ref,
    w1_ref, b1_ref, w2_ref, b2_ref, ln2g_ref, ln2b_ref,
    fc1w_ref, fc1b_ref, fc2w_ref, fc2b_ref, fc3w_ref, fc3b_ref,
    fc4w_ref, fc4b_ref,
    o_ref,
    *, layers, heads, head_dim, eps,
):
    f32 = jnp.float32
    scale = 1.0 / math.sqrt(head_dim)

    # (BB, S, E) activations for this batch tile, PE added in-kernel
    # ((S, E) broadcast over the tile).
    xb = x_ref[...].astype(f32) + pe_ref[...].astype(f32)

    def layernorm(v, g, b):
        mean = jnp.mean(v, axis=-1, keepdims=True)
        var = jnp.mean(jnp.square(v - mean), axis=-1, keepdims=True)
        return (v - mean) * jax.lax.rsqrt(var + eps) * g + b

    def proj(a, w):
        # (BB, S, K) @ (K, N) -> (BB, S, N); the MXU sees M = BB*S rows.
        return jax.lax.dot_general(a, w, (((2,), (0,)), ((), ())),
                                   preferred_element_type=f32)

    # ------------------------- encoder layers ------------------------------
    for l in range(layers):
        attn = jnp.zeros(xb.shape, f32)
        for h in range(heads):
            # Per-head projections: head split is pure Ref indexing.
            q = proj(xb, wq_ref[l, h].astype(f32)) + bq_ref[l, h].astype(f32)
            k = proj(xb, wk_ref[l, h].astype(f32)) + bk_ref[l, h].astype(f32)
            v = proj(xb, wv_ref[l, h].astype(f32)) + bv_ref[l, h].astype(f32)

            # Batched scores over the tile, contracting Dh (no k.T).
            s = jax.lax.dot_general(
                q, k, (((2,), (2,)), ((0,), (0,))),
                preferred_element_type=f32) * scale          # (BB, S, S)

            m = jnp.max(s, axis=-1, keepdims=True)
            p = jnp.exp(s - m)
            denom = jnp.sum(p, axis=-1, keepdims=True)
            p = p * pl.reciprocal(denom, approx=True)        # EUP, ~free

            o_h = jax.lax.dot_general(
                p, v, (((2,), (1,)), ((0,), (0,))),
                preferred_element_type=f32)                  # (BB, S, Dh)

            # Head-concat + output projection fused as a sum of per-head
            # (Dh, E) matmuls.
            attn = attn + proj(o_h, wo_ref[l, h].astype(f32))
        attn = attn + bo_ref[l].astype(f32)

        # Residual + LN1 (post-norm), fused.
        xb = layernorm(xb + attn, ln1g_ref[l].astype(f32),
                       ln1b_ref[l].astype(f32))

        # Feed-forward + residual + LN2, fused.
        hid = proj(xb, w1_ref[l].astype(f32)) + b1_ref[l].astype(f32)
        hid = jnp.maximum(hid, 0.0)
        ff = proj(hid, w2_ref[l].astype(f32)) + b2_ref[l].astype(f32)
        xb = layernorm(xb + ff, ln2g_ref[l].astype(f32),
                       ln2b_ref[l].astype(f32))

    # ------------------------- Q-head MLP -----------------------------------
    # nn.Flatten(): y = flat(xb) @ fc1_w  ==  sum_s  xb[:, s, :] @ fc1_w[s]
    # (fc1 weight is passed pre-reshaped to (S, E, N/4); no in-kernel reshape).
    bb, seq = xb.shape[0], xb.shape[1]
    n4 = fc1b_ref.shape[-1]
    y = jnp.zeros((bb, 1, n4), f32) + fc1b_ref[...].astype(f32)
    for s_i in range(seq):
        y = y + jax.lax.dot_general(
            xb[:, s_i:s_i + 1, :], fc1w_ref[s_i].astype(f32),
            (((2,), (0,)), ((), ())), preferred_element_type=f32)
    y = jnp.maximum(y, 0.0)                                   # relu(fc1)
    y = jnp.maximum(proj(y, fc2w_ref[...].astype(f32))
                    + fc2b_ref[...].astype(f32), 0.0)         # relu(fc2)
    y = jnp.maximum(proj(y, fc3w_ref[...].astype(f32))
                    + fc3b_ref[...].astype(f32), 0.0)         # relu(fc3)
    logits = proj(y, fc4w_ref[...].astype(f32)) + fc4b_ref[...].astype(f32)

    # Final softmax over the 2 Q-values (exact divide for fidelity).
    logits = logits - jnp.max(logits, axis=-1, keepdims=True)
    p = jnp.exp(logits)
    out = p / jnp.sum(p, axis=-1, keepdims=True)              # (BB, 1, 2)
    o_ref[...] = out.astype(o_ref.dtype)


# ---------------------------------------------------------------------------
# Wrapper: one pallas_call for the whole forward
# ---------------------------------------------------------------------------
_PARAM_ORDER = (
    "wq", "bq", "wk", "bk", "wv", "bv", "wo", "bo",
    "ln1g", "ln1b", "w1", "b1", "w2", "b2", "ln2g", "ln2b",
    "fc1w", "fc1b", "fc2w", "fc2b", "fc3w", "fc3b", "fc4w", "fc4b",
)


def dqtn_forward(packed, x, *, layers, heads, batch_tile=None):
    """x: (B, S, E) float32 -> (B, 2) softmax Q-values."""
    b, s, e = x.shape
    dh = e // heads
    pe = packed["pe"][:s]                                     # (S, E)
    param_arrays = [packed[name] for name in _PARAM_ORDER]

    # Batch tile: whole batch if small, otherwise sublane-aligned tiles of 8.
    if batch_tile is None:
        batch_tile = b if b <= 8 else 8
    bb = batch_tile
    assert b % bb == 0, "batch must be divisible by the batch tile"
    assert bb == b or bb % 8 == 0, "partial batch tiles must be 8-aligned"

    def const_spec(a):
        nd = a.ndim
        return pl.BlockSpec(a.shape, lambda i, _nd=nd: (0,) * _nd)

    kernel = functools.partial(
        _dqtn_kernel, layers=layers, heads=heads, head_dim=dh, eps=1e-5)

    out = pl.pallas_call(
        kernel,
        out_shape=jax.ShapeDtypeStruct((b, 1, 2), jnp.float32),
        grid=(b // bb,),
        in_specs=[pl.BlockSpec((bb, s, e), lambda i: (i, 0, 0)),  # x: batch tile
                  pl.BlockSpec((s, e), lambda i: (0, 0))]         # positional encoding
                 + [const_spec(a) for a in param_arrays],         # weights: VMEM-resident
        out_specs=pl.BlockSpec((bb, 1, 2), lambda i: (i, 0, 0)),
        compiler_params=pltpu.CompilerParams(
            dimension_semantics=("parallel",),       # megacore-shard batch on v7x
            vmem_limit_bytes=32 * 1024 * 1024,
        ),
    )(x, pe, *param_arrays)
    return out.reshape(b, 2)


# ---------------------------------------------------------------------------
# Parameter init (torch-like layout) + packing into kernel-friendly layout
# ---------------------------------------------------------------------------
def sinusoidal_pe(max_len, d_model):
    pos = jnp.arange(max_len, dtype=jnp.float32)[:, None]
    div = jnp.exp(
        jnp.arange(0, d_model, 2, dtype=jnp.float32) * (-math.log(10000.0) / d_model)
    )
    pe = jnp.zeros((max_len, d_model), dtype=jnp.float32)
    pe = pe.at[:, 0::2].set(jnp.sin(pos * div))
    pe = pe.at[:, 1::2].set(jnp.cos(pos * div))
    return pe


def init_params(key, emb, layers, heads, fwex, neurons):
    params = {"layers": []}
    scale = 0.02

    def dense(k, fan_in, fan_out):
        kw, _ = jax.random.split(k)
        return (
            jax.random.normal(kw, (fan_in, fan_out), jnp.float32) * scale,
            jnp.zeros((1, fan_out), jnp.float32),
        )

    for _ in range(layers):
        key, k1, k2, k3, k4 = jax.random.split(key, 5)
        layer = {
            "qkv": dense(k1, emb, 3 * emb),
            "out": dense(k2, emb, emb),
            "ln1": (jnp.ones((1, emb), jnp.float32), jnp.zeros((1, emb), jnp.float32)),
            "ff1": dense(k3, emb, fwex),
            "ff2": dense(k4, fwex, emb),
            "ln2": (jnp.ones((1, emb), jnp.float32), jnp.zeros((1, emb), jnp.float32)),
        }
        params["layers"].append(layer)

    key, k1, k2, k3, k4 = jax.random.split(key, 5)
    params["fc1"] = dense(k1, neurons, neurons // 4)
    params["fc2"] = dense(k2, neurons // 4, neurons // 4)
    params["fc3"] = dense(k3, neurons // 4, neurons // 8)
    params["fc4"] = dense(k4, neurons // 8, 2)
    return params


def pack_params(params, heads, seq, emb, max_len=364):
    """One-time repack (plain JAX) into per-head / stacked-per-layer arrays so the
    fused kernel needs no in-kernel reshapes or transposes."""
    layer_list = params["layers"]
    dh = emb // heads

    def per_head_w(w_full, which):            # (E, 3E) -> (H, E, Dh)
        w = w_full[:, which * emb:(which + 1) * emb]
        return w.reshape(emb, heads, dh).transpose(1, 0, 2)

    def per_head_b(b_full, which):            # (1, 3E) -> (H, 1, Dh)
        b = b_full[0, which * emb:(which + 1) * emb]
        return b.reshape(heads, dh)[:, None, :]

    packed = {
        "pe": sinusoidal_pe(max_len, emb),
        "wq": jnp.stack([per_head_w(l["qkv"][0], 0) for l in layer_list]),
        "bq": jnp.stack([per_head_b(l["qkv"][1], 0) for l in layer_list]),
        "wk": jnp.stack([per_head_w(l["qkv"][0], 1) for l in layer_list]),
        "bk": jnp.stack([per_head_b(l["qkv"][1], 1) for l in layer_list]),
        "wv": jnp.stack([per_head_w(l["qkv"][0], 2) for l in layer_list]),
        "bv": jnp.stack([per_head_b(l["qkv"][1], 2) for l in layer_list]),
        "wo": jnp.stack([l["out"][0].reshape(heads, dh, emb) for l in layer_list]),
        "bo": jnp.stack([l["out"][1] for l in layer_list]),
        "ln1g": jnp.stack([l["ln1"][0] for l in layer_list]),
        "ln1b": jnp.stack([l["ln1"][1] for l in layer_list]),
        "w1": jnp.stack([l["ff1"][0] for l in layer_list]),
        "b1": jnp.stack([l["ff1"][1] for l in layer_list]),
        "w2": jnp.stack([l["ff2"][0] for l in layer_list]),
        "b2": jnp.stack([l["ff2"][1] for l in layer_list]),
        "ln2g": jnp.stack([l["ln2"][0] for l in layer_list]),
        "ln2b": jnp.stack([l["ln2"][1] for l in layer_list]),
        "fc1w": params["fc1"][0].reshape(seq, emb, -1),   # flatten-aware layout
        "fc1b": params["fc1"][1],
        "fc2w": params["fc2"][0], "fc2b": params["fc2"][1],
        "fc3w": params["fc3"][0], "fc3b": params["fc3"][1],
        "fc4w": params["fc4"][0], "fc4b": params["fc4"][1],
    }
    return packed


# ---------------------------------------------------------------------------
if __name__ == "__main__":
    # Small shapes consistent with the module's forward:
    batch = 2
    seq = 8
    embeddings = 32             # model dim
    heads = 4
    layers = 2
    fwex = 64                   # feed-forward expansion dim
    neurons = seq * embeddings  # 256 -> matches nn.Flatten() output

    key = jax.random.PRNGKey(0)
    k_params, k_x = jax.random.split(key)

    params = init_params(k_params, embeddings, layers, heads, fwex, neurons)
    packed = pack_params(params, heads, seq, embeddings)
    x = jax.random.normal(k_x, (batch, seq, embeddings), jnp.float32)

    fwd = jax.jit(functools.partial(dqtn_forward, layers=layers, heads=heads))
    out = jax.block_until_ready(fwd(packed, x))

    assert out.shape == (batch, 2)
    assert jnp.allclose(jnp.sum(out, axis=1), 1.0, atol=1e-5)  # softmax rows
    print("KERNEL_OK")
</pallas_src>

<mosaic_0001>
module attributes {stable_mosaic.version = 11 : i64} {
  func.func @_dqtn_kernel(%arg0: i32, %arg1: memref<2x8x32xf32, #tpu.memory_space<vmem>>, %arg2: memref<8x32xf32, #tpu.memory_space<vmem>>, %arg3: memref<2x4x32x8xf32, #tpu.memory_space<vmem>>, %arg4: memref<2x4x1x8xf32, #tpu.memory_space<vmem>>, %arg5: memref<2x4x32x8xf32, #tpu.memory_space<vmem>>, %arg6: memref<2x4x1x8xf32, #tpu.memory_space<vmem>>, %arg7: memref<2x4x32x8xf32, #tpu.memory_space<vmem>>, %arg8: memref<2x4x1x8xf32, #tpu.memory_space<vmem>>, %arg9: memref<2x4x8x32xf32, #tpu.memory_space<vmem>>, %arg10: memref<2x1x32xf32, #tpu.memory_space<vmem>>, %arg11: memref<2x1x32xf32, #tpu.memory_space<vmem>>, %arg12: memref<2x1x32xf32, #tpu.memory_space<vmem>>, %arg13: memref<2x32x64xf32, #tpu.memory_space<vmem>>, %arg14: memref<2x1x64xf32, #tpu.memory_space<vmem>>, %arg15: memref<2x64x32xf32, #tpu.memory_space<vmem>>, %arg16: memref<2x1x32xf32, #tpu.memory_space<vmem>>, %arg17: memref<2x1x32xf32, #tpu.memory_space<vmem>>, %arg18: memref<2x1x32xf32, #tpu.memory_space<vmem>>, %arg19: memref<8x32x64xf32, #tpu.memory_space<vmem>>, %arg20: memref<1x64xf32, #tpu.memory_space<vmem>>, %arg21: memref<64x64xf32, #tpu.memory_space<vmem>>, %arg22: memref<1x64xf32, #tpu.memory_space<vmem>>, %arg23: memref<64x32xf32, #tpu.memory_space<vmem>>, %arg24: memref<1x32xf32, #tpu.memory_space<vmem>>, %arg25: memref<32x2xf32, #tpu.memory_space<vmem>>, %arg26: memref<1x2xf32, #tpu.memory_space<vmem>>, %arg27: memref<2x1x2xf32, #tpu.memory_space<vmem>>) attributes {dimension_semantics = [#tpu.dimension_semantics<parallel>], iteration_bounds = array<i64: 1>, scalar_prefetch = 0 : i64, scratch_operands = 0 : i64, tpu.core_type = #tpu.core_type<tc>, window_params = [{transform_indices = @transform_0, window_bounds = array<i64: 2, 8, 32>}, {pipeline_mode = #tpu.pipeline_mode<synchronous>, transform_indices = @transform_1, window_bounds = array<i64: 8, 32>}, {pipeline_mode = #tpu.pipeline_mode<synchronous>, transform_indices = @transform_2, window_bounds = array<i64: 2, 4, 32, 8>}, {pipeline_mode = #tpu.pipeline_mode<synchronous>, transform_indices = @transform_3, window_bounds = array<i64: 2, 4, 1, 8>}, {pipeline_mode = #tpu.pipeline_mode<synchronous>, transform_indices = @transform_4, window_bounds = array<i64: 2, 4, 32, 8>}, {pipeline_mode = #tpu.pipeline_mode<synchronous>, transform_indices = @transform_5, window_bounds = array<i64: 2, 4, 1, 8>}, {pipeline_mode = #tpu.pipeline_mode<synchronous>, transform_indices = @transform_6, window_bounds = array<i64: 2, 4, 32, 8>}, {pipeline_mode = #tpu.pipeline_mode<synchronous>, transform_indices = @transform_7, window_bounds = array<i64: 2, 4, 1, 8>}, {pipeline_mode = #tpu.pipeline_mode<synchronous>, transform_indices = @transform_8, window_bounds = array<i64: 2, 4, 8, 32>}, {pipeline_mode = #tpu.pipeline_mode<synchronous>, transform_indices = @transform_9, window_bounds = array<i64: 2, 1, 32>}, {pipeline_mode = #tpu.pipeline_mode<synchronous>, transform_indices = @transform_10, window_bounds = array<i64: 2, 1, 32>}, {pipeline_mode = #tpu.pipeline_mode<synchronous>, transform_indices = @transform_11, window_bounds = array<i64: 2, 1, 32>}, {pipeline_mode = #tpu.pipeline_mode<synchronous>, transform_indices = @transform_12, window_bounds = array<i64: 2, 32, 64>}, {pipeline_mode = #tpu.pipeline_mode<synchronous>, transform_indices = @transform_13, window_bounds = array<i64: 2, 1, 64>}, {pipeline_mode = #tpu.pipeline_mode<synchronous>, transform_indices = @transform_14, window_bounds = array<i64: 2, 64, 32>}, {pipeline_mode = #tpu.pipeline_mode<synchronous>, transform_indices = @transform_15, window_bounds = array<i64: 2, 1, 32>}, {pipeline_mode = #tpu.pipeline_mode<synchronous>, transform_indices = @transform_16, window_bounds = array<i64: 2, 1, 32>}, {pipeline_mode = #tpu.pipeline_mode<synchronous>, transform_indices = @transform_17, window_bounds = array<i64: 2, 1, 32>}, {pipeline_mode = #tpu.pipeline_mode<synchronous>, transform_indices = @transform_18, window_bounds = array<i64: 8, 32, 64>}, {pipeline_mode = #tpu.pipeline_mode<synchronous>, transform_indices = @transform_19, window_bounds = array<i64: 1, 64>}, {pipeline_mode = #tpu.pipeline_mode<synchronous>, transform_indices = @transform_20, window_bounds = array<i64: 64, 64>}, {pipeline_mode = #tpu.pipeline_mode<synchronous>, transform_indices = @transform_21, window_bounds = array<i64: 1, 64>}, {pipeline_mode = #tpu.pipeline_mode<synchronous>, transform_indices = @transform_22, window_bounds = array<i64: 64, 32>}, {pipeline_mode = #tpu.pipeline_mode<synchronous>, transform_indices = @transform_23, window_bounds = array<i64: 1, 32>}, {pipeline_mode = #tpu.pipeline_mode<synchronous>, transform_indices = @transform_24, window_bounds = array<i64: 32, 2>}, {pipeline_mode = #tpu.pipeline_mode<synchronous>, transform_indices = @transform_25, window_bounds = array<i64: 1, 2>}, {transform_indices = @transform_26, window_bounds = array<i64: 2, 1, 2>}]} {
    %c0 = arith.constant 0 : index
    %c0_0 = arith.constant 0 : index
    %c0_1 = arith.constant 0 : index
    %0 = vector.load %arg1[%c0, %c0_0, %c0_1] : memref<2x8x32xf32, #tpu.memory_space<vmem>>, vector<2x8x32xf32>
    %c0_2 = arith.constant 0 : index
    %c0_3 = arith.constant 0 : index
    %1 = vector.load %arg2[%c0_2, %c0_3] : memref<8x32xf32, #tpu.memory_space<vmem>>, vector<8x32xf32>
    %2 = vector.shape_cast %1 : vector<8x32xf32> to vector<1x8x32xf32>
    %3 = vector.broadcast %2 : vector<1x8x32xf32> to vector<2x8x32xf32>
    %4 = arith.addf %0, %3 : vector<2x8x32xf32>
    %cst = arith.constant 0.000000e+00 : f32
    %5 = vector.broadcast %cst : f32 to vector<2x8x32xf32>
    %c0_4 = arith.constant 0 : index
    %c0_5 = arith.constant 0 : index
    %c0_6 = arith.constant 0 : index
    %c0_7 = arith.constant 0 : index
    %6 = vector.load %arg3[%c0_4, %c0_5, %c0_6, %c0_7] : memref<2x4x32x8xf32, #tpu.memory_space<vmem>>, vector<1x1x32x8xf32>
    %7 = vector.shape_cast %6 : vector<1x1x32x8xf32> to vector<32x8xf32>
    %cst_8 = arith.constant dense<0.000000e+00> : vector<2x8x8xf32>
    %8 = tpu.matmul %4, %7, %cst_8 {dimension_numbers = #tpu.dot_dimension_numbers<[2], [0], [0, 1], [1], [0, 0, 0, 1, 1, 1], [], []>} : vector<2x8x32xf32>, vector<32x8xf32>, vector<2x8x8xf32> -> vector<2x8x8xf32>
    %c0_9 = arith.constant 0 : index
    %c0_10 = arith.constant 0 : index
    %c0_11 = arith.constant 0 : index
    %c0_12 = arith.constant 0 : index
    %9 = vector.load %arg4[%c0_9, %c0_10, %c0_11, %c0_12] : memref<2x4x1x8xf32, #tpu.memory_space<vmem>>, vector<1x1x1x8xf32>
    %10 = vector.shape_cast %9 : vector<1x1x1x8xf32> to vector<1x8xf32>
    %11 = vector.shape_cast %10 : vector<1x8xf32> to vector<1x1x8xf32>
    %12 = vector.broadcast %11 : vector<1x1x8xf32> to vector<2x8x8xf32>
    %13 = arith.addf %8, %12 : vector<2x8x8xf32>
    %c0_13 = arith.constant 0 : index
    %c0_14 = arith.constant 0 : index
    %c0_15 = arith.constant 0 : index
    %c0_16 = arith.constant 0 : index
    %14 = vector.load %arg5[%c0_13, %c0_14, %c0_15, %c0_16] : memref<2x4x32x8xf32, #tpu.memory_space<vmem>>, vector<1x1x32x8xf32>
    %15 = vector.shape_cast %14 : vector<1x1x32x8xf32> to vector<32x8xf32>
    %cst_17 = arith.constant dense<0.000000e+00> : vector<2x8x8xf32>
    %16 = tpu.matmul %4, %15, %cst_17 {dimension_numbers = #tpu.dot_dimension_numbers<[2], [0], [0, 1], [1], [0, 0, 0, 1, 1, 1], [], []>} : vector<2x8x32xf32>, vector<32x8xf32>, vector<2x8x8xf32> -> vector<2x8x8xf32>
    %c0_18 = arith.constant 0 : index
    %c0_19 = arith.constant 0 : index
    %c0_20 = arith.constant 0 : index
    %c0_21 = arith.constant 0 : index
    %17 = vector.load %arg6[%c0_18, %c0_19, %c0_20, %c0_21] : memref<2x4x1x8xf32, #tpu.memory_space<vmem>>, vector<1x1x1x8xf32>
    %18 = vector.shape_cast %17 : vector<1x1x1x8xf32> to vector<1x8xf32>
    %19 = vector.shape_cast %18 : vector<1x8xf32> to vector<1x1x8xf32>
    %20 = vector.broadcast %19 : vector<1x1x8xf32> to vector<2x8x8xf32>
    %21 = arith.addf %16, %20 : vector<2x8x8xf32>
    %c0_22 = arith.constant 0 : index
    %c0_23 = arith.constant 0 : index
    %c0_24 = arith.constant 0 : index
    %c0_25 = arith.constant 0 : index
    %22 = vector.load %arg7[%c0_22, %c0_23, %c0_24, %c0_25] : memref<2x4x32x8xf32, #tpu.memory_space<vmem>>, vector<1x1x32x8xf32>
    %23 = vector.shape_cast %22 : vector<1x1x32x8xf32> to vector<32x8xf32>
    %cst_26 = arith.constant dense<0.000000e+00> : vector<2x8x8xf32>
    %24 = tpu.matmul %4, %23, %cst_26 {dimension_numbers = #tpu.dot_dimension_numbers<[2], [0], [0, 1], [1], [0, 0, 0, 1, 1, 1], [], []>} : vector<2x8x32xf32>, vector<32x8xf32>, vector<2x8x8xf32> -> vector<2x8x8xf32>
    %c0_27 = arith.constant 0 : index
    %c0_28 = arith.constant 0 : index
    %c0_29 = arith.constant 0 : index
    %c0_30 = arith.constant 0 : index
    %25 = vector.load %arg8[%c0_27, %c0_28, %c0_29, %c0_30] : memref<2x4x1x8xf32, #tpu.memory_space<vmem>>, vector<1x1x1x8xf32>
    %26 = vector.shape_cast %25 : vector<1x1x1x8xf32> to vector<1x8xf32>
    %27 = vector.shape_cast %26 : vector<1x8xf32> to vector<1x1x8xf32>
    %28 = vector.broadcast %27 : vector<1x1x8xf32> to vector<2x8x8xf32>
    %29 = arith.addf %24, %28 : vector<2x8x8xf32>
    %cst_31 = arith.constant dense<0.000000e+00> : vector<2x8x8xf32>
    %30 = tpu.matmul %13, %21, %cst_31 {dimension_numbers = #tpu.dot_dimension_numbers<[2], [2], [1], [1], [0, 0, 0, 1, 1, 1], [0], [0]>} : vector<2x8x8xf32>, vector<2x8x8xf32>, vector<2x8x8xf32> -> vector<2x8x8xf32>
    %cst_32 = arith.constant 0.353553385 : f32
    %31 = vector.broadcast %cst_32 : f32 to vector<2x8x8xf32>
    %32 = arith.mulf %30, %31 : vector<2x8x8xf32>
    %cst_33 = arith.constant dense<0xFF800000> : vector<2x8xf32>
    %33 = vector.multi_reduction <maximumf>, %32, %cst_33 [2] : vector<2x8x8xf32> to vector<2x8xf32>
    %34 = vector.shape_cast %33 : vector<2x8xf32> to vector<2x8x1xf32>
    %35 = vector.broadcast %34 : vector<2x8x1xf32> to vector<2x8x8xf32>
    %36 = arith.subf %32, %35 : vector<2x8x8xf32>
    %37 = math.exp %36 : vector<2x8x8xf32>
    %cst_34 = arith.constant dense<0.000000e+00> : vector<2x8xf32>
    %38 = vector.multi_reduction <add>, %37, %cst_34 [2] : vector<2x8x8xf32> to vector<2x8xf32>
    %39 = vector.shape_cast %38 : vector<2x8xf32> to vector<2x8x1xf32>
    %40 = tpu.reciprocal %39 {approx = true} : vector<2x8x1xf32> -> vector<2x8x1xf32>
    %41 = vector.broadcast %40 : vector<2x8x1xf32> to vector<2x8x8xf32>
    %42 = arith.mulf %37, %41 : vector<2x8x8xf32>
    %cst_35 = arith.constant dense<0.000000e+00> : vector<2x8x8xf32>
    %43 = tpu.matmul %42, %29, %cst_35 {dimension_numbers = #tpu.dot_dimension_numbers<[2], [1], [1], [2], [0, 0, 0, 1, 1, 2], [0], [0]>} : vector<2x8x8xf32>, vector<2x8x8xf32>, vector<2x8x8xf32> -> vector<2x8x8xf32>
    %c0_36 = arith.constant 0 : index
    %c0_37 = arith.constant 0 : index
    %c0_38 = arith.constant 0 : index
    %c0_39 = arith.constant 0 : index
    %44 = vector.load %arg9[%c0_36, %c0_37, %c0_38, %c0_39] : memref<2x4x8x32xf32, #tpu.memory_space<vmem>>, vector<1x1x8x32xf32>
    %45 = vector.shape_cast %44 : vector<1x1x8x32xf32> to vector<8x32xf32>
    %cst_40 = arith.constant dense<0.000000e+00> : vector<2x8x32xf32>
    %46 = tpu.matmul %43, %45, %cst_40 {dimension_numbers = #tpu.dot_dimension_numbers<[2], [0], [0, 1], [1], [0, 0, 0, 1, 1, 1], [], []>} : vector<2x8x8xf32>, vector<8x32xf32>, vector<2x8x32xf32> -> vector<2x8x32xf32>
    %47 = arith.addf %5, %46 : vector<2x8x32xf32>
    %c0_41 = arith.constant 0 : index
    %c1 = arith.constant 1 : index
    %c0_42 = arith.constant 0 : index
    %c0_43 = arith.constant 0 : index
    %48 = vector.load %arg3[%c0_41, %c1, %c0_42, %c0_43] : memref<2x4x32x8xf32, #tpu.memory_space<vmem>>, vector<1x1x32x8xf32>
    %49 = vector.shape_cast %48 : vector<1x1x32x8xf32> to vector<32x8xf32>
    %cst_44 = arith.constant dense<0.000000e+00> : vector<2x8x8xf32>
    %50 = tpu.matmul %4, %49, %cst_44 {dimension_numbers = #tpu.dot_dimension_numbers<[2], [0], [0, 1], [1], [0, 0, 0, 1, 1, 1], [], []>} : vector<2x8x32xf32>, vector<32x8xf32>, vector<2x8x8xf32> -> vector<2x8x8xf32>
    %c0_45 = arith.constant 0 : index
    %c1_46 = arith.constant 1 : index
    %c0_47 = arith.constant 0 : index
    %c0_48 = arith.constant 0 : index
    %51 = vector.load %arg4[%c0_45, %c1_46, %c0_47, %c0_48] : memref<2x4x1x8xf32, #tpu.memory_space<vmem>>, vector<1x1x1x8xf32>
    %52 = vector.shape_cast %51 : vector<1x1x1x8xf32> to vector<1x8xf32>
    %53 = vector.shape_cast %52 : vector<1x8xf32> to vector<1x1x8xf32>
    %54 = vector.broadcast %53 : vector<1x1x8xf32> to vector<2x8x8xf32>
    %55 = arith.addf %50, %54 : vector<2x8x8xf32>
    %c0_49 = arith.constant 0 : index
    %c1_50 = arith.constant 1 : index
    %c0_51 = arith.constant 0 : index
    %c0_52 = arith.constant 0 : index
    %56 = vector.load %arg5[%c0_49, %c1_50, %c0_51, %c0_52] : memref<2x4x32x8xf32, #tpu.memory_space<vmem>>, vector<1x1x32x8xf32>
    %57 = vector.shape_cast %56 : vector<1x1x32x8xf32> to vector<32x8xf32>
    %cst_53 = arith.constant dense<0.000000e+00> : vector<2x8x8xf32>
    %58 = tpu.matmul %4, %57, %cst_53 {dimension_numbers = #tpu.dot_dimension_numbers<[2], [0], [0, 1], [1], [0, 0, 0, 1, 1, 1], [], []>} : vector<2x8x32xf32>, vector<32x8xf32>, vector<2x8x8xf32> -> vector<2x8x8xf32>
    %c0_54 = arith.constant 0 : index
    %c1_55 = arith.constant 1 : index
    %c0_56 = arith.constant 0 : index
    %c0_57 = arith.constant 0 : index
    %59 = vector.load %arg6[%c0_54, %c1_55, %c0_56, %c0_57] : memref<2x4x1x8xf32, #tpu.memory_space<vmem>>, vector<1x1x1x8xf32>
    %60 = vector.shape_cast %59 : vector<1x1x1x8xf32> to vector<1x8xf32>
    %61 = vector.shape_cast %60 : vector<1x8xf32> to vector<1x1x8xf32>
    %62 = vector.broadcast %61 : vector<1x1x8xf32> to vector<2x8x8xf32>
    %63 = arith.addf %58, %62 : vector<2x8x8xf32>
    %c0_58 = arith.constant 0 : index
    %c1_59 = arith.constant 1 : index
    %c0_60 = arith.constant 0 : index
    %c0_61 = arith.constant 0 : index
    %64 = vector.load %arg7[%c0_58, %c1_59, %c0_60, %c0_61] : memref<2x4x32x8xf32, #tpu.memory_space<vmem>>, vector<1x1x32x8xf32>
    %65 = vector.shape_cast %64 : vector<1x1x32x8xf32> to vector<32x8xf32>
    %cst_62 = arith.constant dense<0.000000e+00> : vector<2x8x8xf32>
    %66 = tpu.matmul %4, %65, %cst_62 {dimension_numbers = #tpu.dot_dimension_numbers<[2], [0], [0, 1], [1], [0, 0, 0, 1, 1, 1], [], []>} : vector<2x8x32xf32>, vector<32x8xf32>, vector<2x8x8xf32> -> vector<2x8x8xf32>
    %c0_63 = arith.constant 0 : index
    %c1_64 = arith.constant 1 : index
    %c0_65 = arith.constant 0 : index
    %c0_66 = arith.constant 0 : index
    %67 = vector.load %arg8[%c0_63, %c1_64, %c0_65, %c0_66] : memref<2x4x1x8xf32, #tpu.memory_space<vmem>>, vector<1x1x1x8xf32>
    %68 = vector.shape_cast %67 : vector<1x1x1x8xf32> to vector<1x8xf32>
    %69 = vector.shape_cast %68 : vector<1x8xf32> to vector<1x1x8xf32>
    %70 = vector.broadcast %69 : vector<1x1x8xf32> to vector<2x8x8xf32>
    %71 = arith.addf %66, %70 : vector<2x8x8xf32>
    %cst_67 = arith.constant dense<0.000000e+00> : vector<2x8x8xf32>
    %72 = tpu.matmul %55, %63, %cst_67 {dimension_numbers = #tpu.dot_dimension_numbers<[2], [2], [1], [1], [0, 0, 0, 1, 1, 1], [0], [0]>} : vector<2x8x8xf32>, vector<2x8x8xf32>, vector<2x8x8xf32> -> vector<2x8x8xf32>
    %cst_68 = arith.constant 0.353553385 : f32
    %73 = vector.broadcast %cst_68 : f32 to vector<2x8x8xf32>
    %74 = arith.mulf %72, %73 : vector<2x8x8xf32>
    %cst_69 = arith.constant dense<0xFF800000> : vector<2x8xf32>
    %75 = vector.multi_reduction <maximumf>, %74, %cst_69 [2] : vector<2x8x8xf32> to vector<2x8xf32>
    %76 = vector.shape_cast %75 : vector<2x8xf32> to vector<2x8x1xf32>
    %77 = vector.broadcast %76 : vector<2x8x1xf32> to vector<2x8x8xf32>
    %78 = arith.subf %74, %77 : vector<2x8x8xf32>
    %79 = math.exp %78 : vector<2x8x8xf32>
    %cst_70 = arith.constant dense<0.000000e+00> : vector<2x8xf32>
    %80 = vector.multi_reduction <add>, %79, %cst_70 [2] : vector<2x8x8xf32> to vector<2x8xf32>
    %81 = vector.shape_cast %80 : vector<2x8xf32> to vector<2x8x1xf32>
    %82 = tpu.reciprocal %81 {approx = true} : vector<2x8x1xf32> -> vector<2x8x1xf32>
    %83 = vector.broadcast %82 : vector<2x8x1xf32> to vector<2x8x8xf32>
    %84 = arith.mulf %79, %83 : vector<2x8x8xf32>
    %cst_71 = arith.constant dense<0.000000e+00> : vector<2x8x8xf32>
    %85 = tpu.matmul %84, %71, %cst_71 {dimension_numbers = #tpu.dot_dimension_numbers<[2], [1], [1], [2], [0, 0, 0, 1, 1, 2], [0], [0]>} : vector<2x8x8xf32>, vector<2x8x8xf32>, vector<2x8x8xf32> -> vector<2x8x8xf32>
    %c0_72 = arith.constant 0 : index
    %c1_73 = arith.constant 1 : index
    %c0_74 = arith.constant 0 : index
    %c0_75 = arith.constant 0 : index
    %86 = vector.load %arg9[%c0_72, %c1_73, %c0_74, %c0_75] : memref<2x4x8x32xf32, #tpu.memory_space<vmem>>, vector<1x1x8x32xf32>
    %87 = vector.shape_cast %86 : vector<1x1x8x32xf32> to vector<8x32xf32>
    %cst_76 = arith.constant dense<0.000000e+00> : vector<2x8x32xf32>
    %88 = tpu.matmul %85, %87, %cst_76 {dimension_numbers = #tpu.dot_dimension_numbers<[2], [0], [0, 1], [1], [0, 0, 0, 1, 1, 1], [], []>} : vector<2x8x8xf32>, vector<8x32xf32>, vector<2x8x32xf32> -> vector<2x8x32xf32>
    %89 = arith.addf %47, %88 : vector<2x8x32xf32>
    %c0_77 = arith.constant 0 : index
    %c2 = arith.constant 2 : index
    %c0_78 = arith.constant 0 : index
    %c0_79 = arith.constant 0 : index
    %90 = vector.load %arg3[%c0_77, %c2, %c0_78, %c0_79] : memref<2x4x32x8xf32, #tpu.memory_space<vmem>>, vector<1x1x32x8xf32>
    %91 = vector.shape_cast %90 : vector<1x1x32x8xf32> to vector<32x8xf32>
    %cst_80 = arith.constant dense<0.000000e+00> : vector<2x8x8xf32>
    %92 = tpu.matmul %4, %91, %cst_80 {dimension_numbers = #tpu.dot_dimension_numbers<[2], [0], [0, 1], [1], [0, 0, 0, 1, 1, 1], [], []>} : vector<2x8x32xf32>, vector<32x8xf32>, vector<2x8x8xf32> -> vector<2x8x8xf32>
    %c0_81 = arith.constant 0 : index
    %c2_82 = arith.constant 2 : index
    %c0_83 = arith.constant 0 : index
    %c0_84 = arith.constant 0 : index
    %93 = vector.load %arg4[%c0_81, %c2_82, %c0_83, %c0_84] : memref<2x4x1x8xf32, #tpu.memory_space<vmem>>, vector<1x1x1x8xf32>
    %94 = vector.shape_cast %93 : vector<1x1x1x8xf32> to vector<1x8xf32>
    %95 = vector.shape_cast %94 : vector<1x8xf32> to vector<1x1x8xf32>
    %96 = vector.broadcast %95 : vector<1x1x8xf32> to vector<2x8x8xf32>
    %97 = arith.addf %92, %96 : vector<2x8x8xf32>
    %c0_85 = arith.constant 0 : index
    %c2_86 = arith.constant 2 : index
    %c0_87 = arith.constant 0 : index
    %c0_88 = arith.constant 0 : index
    %98 = vector.load %arg5[%c0_85, %c2_86, %c0_87, %c0_88] : memref<2x4x32x8xf32, #tpu.memory_space<vmem>>, vector<1x1x32x8xf32>
    %99 = vector.shape_cast %98 : vector<1x1x32x8xf32> to vector<32x8xf32>
    %cst_89 = arith.constant dense<0.000000e+00> : vector<2x8x8xf32>
    %100 = tpu.matmul %4, %99, %cst_89 {dimension_numbers = #tpu.dot_dimension_numbers<[2], [0], [0, 1], [1], [0, 0, 0, 1, 1, 1], [], []>} : vector<2x8x32xf32>, vector<32x8xf32>, vector<2x8x8xf32> -> vector<2x8x8xf32>
    %c0_90 = arith.constant 0 : index
    %c2_91 = arith.constant 2 : index
    %c0_92 = arith.constant 0 : index
    %c0_93 = arith.constant 0 : index
    %101 = vector.load %arg6[%c0_90, %c2_91, %c0_92, %c0_93] : memref<2x4x1x8xf32, #tpu.memory_space<vmem>>, vector<1x1x1x8xf32>
    %102 = vector.shape_cast %101 : vector<1x1x1x8xf32> to vector<1x8xf32>
    %103 = vector.shape_cast %102 : vector<1x8xf32> to vector<1x1x8xf32>
    %104 = vector.broadcast %103 : vector<1x1x8xf32> to vector<2x8x8xf32>
    %105 = arith.addf %100, %104 : vector<2x8x8xf32>
    %c0_94 = arith.constant 0 : index
    %c2_95 = arith.constant 2 : index
    %c0_96 = arith.constant 0 : index
    %c0_97 = arith.constant 0 : index
    %106 = vector.load %arg7[%c0_94, %c2_95, %c0_96, %c0_97] : memref<2x4x32x8xf32, #tpu.memory_space<vmem>>, vector<1x1x32x8xf32>
    %107 = vector.shape_cast %106 : vector<1x1x32x8xf32> to vector<32x8xf32>
    %cst_98 = arith.constant dense<0.000000e+00> : vector<2x8x8xf32>
    %108 = tpu.matmul %4, %107, %cst_98 {dimension_numbers = #tpu.dot_dimension_numbers<[2], [0], [0, 1], [1], [0, 0, 0, 1, 1, 1], [], []>} : vector<2x8x32xf32>, vector<32x8xf32>, vector<2x8x8xf32> -> vector<2x8x8xf32>
    %c0_99 = arith.constant 0 : index
    %c2_100 = arith.constant 2 : index
    %c0_101 = arith.constant 0 : index
    %c0_102 = arith.constant 0 : index
    %109 = vector.load %arg8[%c0_99, %c2_100, %c0_101, %c0_102] : memref<2x4x1x8xf32, #tpu.memory_space<vmem>>, vector<1x1x1x8xf32>
    %110 = vector.shape_cast %109 : vector<1x1x1x8xf32> to vector<1x8xf32>
    %111 = vector.shape_cast %110 : vector<1x8xf32> to vector<1x1x8xf32>
    %112 = vector.broadcast %111 : vector<1x1x8xf32> to vector<2x8x8xf32>
    %113 = arith.addf %108, %112 : vector<2x8x8xf32>
    %cst_103 = arith.constant dense<0.000000e+00> : vector<2x8x8xf32>
    %114 = tpu.matmul %97, %105, %cst_103 {dimension_numbers = #tpu.dot_dimension_numbers<[2], [2], [1], [1], [0, 0, 0, 1, 1, 1], [0], [0]>} : vector<2x8x8xf32>, vector<2x8x8xf32>, vector<2x8x8xf32> -> vector<2x8x8xf32>
    %cst_104 = arith.constant 0.353553385 : f32
    %115 = vector.broadcast %cst_104 : f32 to vector<2x8x8xf32>
    %116 = arith.mulf %114, %115 : vector<2x8x8xf32>
    %cst_105 = arith.constant dense<0xFF800000> : vector<2x8xf32>
    %117 = vector.multi_reduction <maximumf>, %116, %cst_105 [2] : vector<2x8x8xf32> to vector<2x8xf32>
    %118 = vector.shape_cast %117 : vector<2x8xf32> to vector<2x8x1xf32>
    %119 = vector.broadcast %118 : vector<2x8x1xf32> to vector<2x8x8xf32>
    %120 = arith.subf %116, %119 : vector<2x8x8xf32>
    %121 = math.exp %120 : vector<2x8x8xf32>
    %cst_106 = arith.constant dense<0.000000e+00> : vector<2x8xf32>
    %122 = vector.multi_reduction <add>, %121, %cst_106 [2] : vector<2x8x8xf32> to vector<2x8xf32>
    %123 = vector.shape_cast %122 : vector<2x8xf32> to vector<2x8x1xf32>
    %124 = tpu.reciprocal %123 {approx = true} : vector<2x8x1xf32> -> vector<2x8x1xf32>
    %125 = vector.broadcast %124 : vector<2x8x1xf32> to vector<2x8x8xf32>
    %126 = arith.mulf %121, %125 : vector<2x8x8xf32>
    %cst_107 = arith.constant dense<0.000000e+00> : vector<2x8x8xf32>
    %127 = tpu.matmul %126, %113, %cst_107 {dimension_numbers = #tpu.dot_dimension_numbers<[2], [1], [1], [2], [0, 0, 0, 1, 1, 2], [0], [0]>} : vector<2x8x8xf32>, vector<2x8x8xf32>, vector<2x8x8xf32> -> vector<2x8x8xf32>
    %c0_108 = arith.constant 0 : index
    %c2_109 = arith.constant 2 : index
    %c0_110 = arith.constant 0 : index
    %c0_111 = arith.constant 0 : index
    %128 = vector.load %arg9[%c0_108, %c2_109, %c0_110, %c0_111] : memref<2x4x8x32xf32, #tpu.memory_space<vmem>>, vector<1x1x8x32xf32>
    %129 = vector.shape_cast %128 : vector<1x1x8x32xf32> to vector<8x32xf32>
    %cst_112 = arith.constant dense<0.000000e+00> : vector<2x8x32xf32>
    %130 = tpu.matmul %127, %129, %cst_112 {dimension_numbers = #tpu.dot_dimension_numbers<[2], [0], [0, 1], [1], [0, 0, 0, 1, 1, 1], [], []>} : vector<2x8x8xf32>, vector<8x32xf32>, vector<2x8x32xf32> -> vector<2x8x32xf32>
    %131 = arith.addf %89, %130 : vector<2x8x32xf32>
    %c0_113 = arith.constant 0 : index
    %c3 = arith.constant 3 : index
    %c0_114 = arith.constant 0 : index
    %c0_115 = arith.constant 0 : index
    %132 = vector.load %arg3[%c0_113, %c3, %c0_114, %c0_115] : memref<2x4x32x8xf32, #tpu.memory_space<vmem>>, vector<1x1x32x8xf32>
    %133 = vector.shape_cast %132 : vector<1x1x32x8xf32> to vector<32x8xf32>
    %cst_116 = arith.constant dense<0.000000e+00> : vector<2x8x8xf32>
    %134 = tpu.matmul %4, %133, %cst_116 {dimension_numbers = #tpu.dot_dimension_numbers<[2], [0], [0, 1], [1], [0, 0, 0, 1, 1, 1], [], []>} : vector<2x8x32xf32>, vector<32x8xf32>, vector<2x8x8xf32> -> vector<2x8x8xf32>
    %c0_117 = arith.constant 0 : index
    %c3_118 = arith.constant 3 : index
    %c0_119 = arith.constant 0 : index
    %c0_120 = arith.constant 0 : index
    %135 = vector.load %arg4[%c0_117, %c3_118, %c0_119, %c0_120] : memref<2x4x1x8xf32, #tpu.memory_space<vmem>>, vector<1x1x1x8xf32>
    %136 = vector.shape_cast %135 : vector<1x1x1x8xf32> to vector<1x8xf32>
    %137 = vector.shape_cast %136 : vector<1x8xf32> to vector<1x1x8xf32>
    %138 = vector.broadcast %137 : vector<1x1x8xf32> to vector<2x8x8xf32>
    %139 = arith.addf %134, %138 : vector<2x8x8xf32>
    %c0_121 = arith.constant 0 : index
    %c3_122 = arith.constant 3 : index
    %c0_123 = arith.constant 0 : index
    %c0_124 = arith.constant 0 : index
    %140 = vector.load %arg5[%c0_121, %c3_122, %c0_123, %c0_124] : memref<2x4x32x8xf32, #tpu.memory_space<vmem>>, vector<1x1x32x8xf32>
    %141 = vector.shape_cast %140 : vector<1x1x32x8xf32> to vector<32x8xf32>
    %cst_125 = arith.constant dense<0.000000e+00> : vector<2x8x8xf32>
    %142 = tpu.matmul %4, %141, %cst_125 {dimension_numbers = #tpu.dot_dimension_numbers<[2], [0], [0, 1], [1], [0, 0, 0, 1, 1, 1], [], []>} : vector<2x8x32xf32>, vector<32x8xf32>, vector<2x8x8xf32> -> vector<2x8x8xf32>
    %c0_126 = arith.constant 0 : index
    %c3_127 = arith.constant 3 : index
    %c0_128 = arith.constant 0 : index
    %c0_129 = arith.constant 0 : index
    %143 = vector.load %arg6[%c0_126, %c3_127, %c0_128, %c0_129] : memref<2x4x1x8xf32, #tpu.memory_space<vmem>>, vector<1x1x1x8xf32>
    %144 = vector.shape_cast %143 : vector<1x1x1x8xf32> to vector<1x8xf32>
    %145 = vector.shape_cast %144 : vector<1x8xf32> to vector<1x1x8xf32>
    %146 = vector.broadcast %145 : vector<1x1x8xf32> to vector<2x8x8xf32>
    %147 = arith.addf %142, %146 : vector<2x8x8xf32>
    %c0_130 = arith.constant 0 : index
    %c3_131 = arith.constant 3 : index
    %c0_132 = arith.constant 0 : index
    %c0_133 = arith.constant 0 : index
    %148 = vector.load %arg7[%c0_130, %c3_131, %c0_132, %c0_133] : memref<2x4x32x8xf32, #tpu.memory_space<vmem>>, vector<1x1x32x8xf32>
    %149 = vector.shape_cast %148 : vector<1x1x32x8xf32> to vector<32x8xf32>
    %cst_134 = arith.constant dense<0.000000e+00> : vector<2x8x8xf32>
    %150 = tpu.matmul %4, %149, %cst_134 {dimension_numbers = #tpu.dot_dimension_numbers<[2], [0], [0, 1], [1], [0, 0, 0, 1, 1, 1], [], []>} : vector<2x8x32xf32>, vector<32x8xf32>, vector<2x8x8xf32> -> vector<2x8x8xf32>
    %c0_135 = arith.constant 0 : index
    %c3_136 = arith.constant 3 : index
    %c0_137 = arith.constant 0 : index
    %c0_138 = arith.constant 0 : index
    %151 = vector.load %arg8[%c0_135, %c3_136, %c0_137, %c0_138] : memref<2x4x1x8xf32, #tpu.memory_space<vmem>>, vector<1x1x1x8xf32>
    %152 = vector.shape_cast %151 : vector<1x1x1x8xf32> to vector<1x8xf32>
    %153 = vector.shape_cast %152 : vector<1x8xf32> to vector<1x1x8xf32>
    %154 = vector.broadcast %153 : vector<1x1x8xf32> to vector<2x8x8xf32>
    %155 = arith.addf %150, %154 : vector<2x8x8xf32>
    %cst_139 = arith.constant dense<0.000000e+00> : vector<2x8x8xf32>
    %156 = tpu.matmul %139, %147, %cst_139 {dimension_numbers = #tpu.dot_dimension_numbers<[2], [2], [1], [1], [0, 0, 0, 1, 1, 1], [0], [0]>} : vector<2x8x8xf32>, vector<2x8x8xf32>, vector<2x8x8xf32> -> vector<2x8x8xf32>
    %cst_140 = arith.constant 0.353553385 : f32
    %157 = vector.broadcast %cst_140 : f32 to vector<2x8x8xf32>
    %158 = arith.mulf %156, %157 : vector<2x8x8xf32>
    %cst_141 = arith.constant dense<0xFF800000> : vector<2x8xf32>
    %159 = vector.multi_reduction <maximumf>, %158, %cst_141 [2] : vector<2x8x8xf32> to vector<2x8xf32>
    %160 = vector.shape_cast %159 : vector<2x8xf32> to vector<2x8x1xf32>
    %161 = vector.broadcast %160 : vector<2x8x1xf32> to vector<2x8x8xf32>
    %162 = arith.subf %158, %161 : vector<2x8x8xf32>
    %163 = math.exp %162 : vector<2x8x8xf32>
    %cst_142 = arith.constant dense<0.000000e+00> : vector<2x8xf32>
    %164 = vector.multi_reduction <add>, %163, %cst_142 [2] : vector<2x8x8xf32> to vector<2x8xf32>
    %165 = vector.shape_cast %164 : vector<2x8xf32> to vector<2x8x1xf32>
    %166 = tpu.reciprocal %165 {approx = true} : vector<2x8x1xf32> -> vector<2x8x1xf32>
    %167 = vector.broadcast %166 : vector<2x8x1xf32> to vector<2x8x8xf32>
    %168 = arith.mulf %163, %167 : vector<2x8x8xf32>
    %cst_143 = arith.constant dense<0.000000e+00> : vector<2x8x8xf32>
    %169 = tpu.matmul %168, %155, %cst_143 {dimension_numbers = #tpu.dot_dimension_numbers<[2], [1], [1], [2], [0, 0, 0, 1, 1, 2], [0], [0]>} : vector<2x8x8xf32>, vector<2x8x8xf32>, vector<2x8x8xf32> -> vector<2x8x8xf32>
    %c0_144 = arith.constant 0 : index
    %c3_145 = arith.constant 3 : index
    %c0_146 = arith.constant 0 : index
    %c0_147 = arith.constant 0 : index
    %170 = vector.load %arg9[%c0_144, %c3_145, %c0_146, %c0_147] : memref<2x4x8x32xf32, #tpu.memory_space<vmem>>, vector<1x1x8x32xf32>
    %171 = vector.shape_cast %170 : vector<1x1x8x32xf32> to vector<8x32xf32>
    %cst_148 = arith.constant dense<0.000000e+00> : vector<2x8x32xf32>
    %172 = tpu.matmul %169, %171, %cst_148 {dimension_numbers = #tpu.dot_dimension_numbers<[2], [0], [0, 1], [1], [0, 0, 0, 1, 1, 1], [], []>} : vector<2x8x8xf32>, vector<8x32xf32>, vector<2x8x32xf32> -> vector<2x8x32xf32>
    %173 = arith.addf %131, %172 : vector<2x8x32xf32>
    %c0_149 = arith.constant 0 : index
    %c0_150 = arith.constant 0 : index
    %c0_151 = arith.constant 0 : index
    %174 = vector.load %arg10[%c0_149, %c0_150, %c0_151] : memref<2x1x32xf32, #tpu.memory_space<vmem>>, vector<1x1x32xf32>
    %175 = vector.shape_cast %174 : vector<1x1x32xf32> to vector<1x32xf32>
    %176 = vector.shape_cast %175 : vector<1x32xf32> to vector<1x1x32xf32>
    %177 = vector.broadcast %176 : vector<1x1x32xf32> to vector<2x8x32xf32>
    %178 = arith.addf %173, %177 : vector<2x8x32xf32>
    %179 = arith.addf %4, %178 : vector<2x8x32xf32>
    %c0_152 = arith.constant 0 : index
    %c0_153 = arith.constant 0 : index
    %c0_154 = arith.constant 0 : index
    %180 = vector.load %arg11[%c0_152, %c0_153, %c0_154] : memref<2x1x32xf32, #tpu.memory_space<vmem>>, vector<1x1x32xf32>
    %181 = vector.shape_cast %180 : vector<1x1x32xf32> to vector<1x32xf32>
    %c0_155 = arith.constant 0 : index
    %c0_156 = arith.constant 0 : index
    %c0_157 = arith.constant 0 : index
    %182 = vector.load %arg12[%c0_155, %c0_156, %c0_157] : memref<2x1x32xf32, #tpu.memory_space<vmem>>, vector<1x1x32xf32>
    %183 = vector.shape_cast %182 : vector<1x1x32xf32> to vector<1x32xf32>
    %cst_158 = arith.constant dense<0.000000e+00> : vector<2x8xf32>
    %184 = vector.multi_reduction <add>, %179, %cst_158 [2] : vector<2x8x32xf32> to vector<2x8xf32>
    %185 = vector.shape_cast %184 : vector<2x8xf32> to vector<2x8x1xf32>
    %cst_159 = arith.constant 3.200000e+01 : f32
    %186 = vector.broadcast %cst_159 : f32 to vector<2x8x1xf32>
    %187 = arith.divf %185, %186 : vector<2x8x1xf32>
    %188 = vector.broadcast %187 : vector<2x8x1xf32> to vector<2x8x32xf32>
    %189 = arith.subf %179, %188 : vector<2x8x32xf32>
    %190 = arith.mulf %189, %189 : vector<2x8x32xf32>
    %cst_160 = arith.constant dense<0.000000e+00> : vector<2x8xf32>
    %191 = vector.multi_reduction <add>, %190, %cst_160 [2] : vector<2x8x32xf32> to vector<2x8xf32>
    %192 = vector.shape_cast %191 : vector<2x8xf32> to vector<2x8x1xf32>
    %cst_161 = arith.constant 3.200000e+01 : f32
    %193 = vector.broadcast %cst_161 : f32 to vector<2x8x1xf32>
    %194 = arith.divf %192, %193 : vector<2x8x1xf32>
    %195 = vector.broadcast %187 : vector<2x8x1xf32> to vector<2x8x32xf32>
    %196 = arith.subf %179, %195 : vector<2x8x32xf32>
    %cst_162 = arith.constant 9.99999974E-6 : f32
    %197 = vector.broadcast %cst_162 : f32 to vector<2x8x1xf32>
    %198 = arith.addf %194, %197 : vector<2x8x1xf32>
    %199 = math.rsqrt %198 : vector<2x8x1xf32>
    %200 = vector.broadcast %199 : vector<2x8x1xf32> to vector<2x8x32xf32>
    %201 = arith.mulf %196, %200 : vector<2x8x32xf32>
    %202 = vector.shape_cast %181 : vector<1x32xf32> to vector<1x1x32xf32>
    %203 = vector.broadcast %202 : vector<1x1x32xf32> to vector<2x8x32xf32>
    %204 = arith.mulf %201, %203 : vector<2x8x32xf32>
    %205 = vector.shape_cast %183 : vector<1x32xf32> to vector<1x1x32xf32>
    %206 = vector.broadcast %205 : vector<1x1x32xf32> to vector<2x8x32xf32>
    %207 = arith.addf %204, %206 : vector<2x8x32xf32>
    %c0_163 = arith.constant 0 : index
    %c0_164 = arith.constant 0 : index
    %c0_165 = arith.constant 0 : index
    %208 = vector.load %arg13[%c0_163, %c0_164, %c0_165] : memref<2x32x64xf32, #tpu.memory_space<vmem>>, vector<1x32x64xf32>
    %209 = vector.shape_cast %208 : vector<1x32x64xf32> to vector<32x64xf32>
    %cst_166 = arith.constant dense<0.000000e+00> : vector<2x8x64xf32>
    %210 = tpu.matmul %207, %209, %cst_166 {dimension_numbers = #tpu.dot_dimension_numbers<[2], [0], [0, 1], [1], [0, 0, 0, 1, 1, 1], [], []>} : vector<2x8x32xf32>, vector<32x64xf32>, vector<2x8x64xf32> -> vector<2x8x64xf32>
    %c0_167 = arith.constant 0 : index
    %c0_168 = arith.constant 0 : index
    %c0_169 = arith.constant 0 : index
    %211 = vector.load %arg14[%c0_167, %c0_168, %c0_169] : memref<2x1x64xf32, #tpu.memory_space<vmem>>, vector<1x1x64xf32>
    %212 = vector.shape_cast %211 : vector<1x1x64xf32> to vector<1x64xf32>
    %213 = vector.shape_cast %212 : vector<1x64xf32> to vector<1x1x64xf32>
    %214 = vector.broadcast %213 : vector<1x1x64xf32> to vector<2x8x64xf32>
    %215 = arith.addf %210, %214 : vector<2x8x64xf32>
    %cst_170 = arith.constant 0.000000e+00 : f32
    %216 = vector.broadcast %cst_170 : f32 to vector<2x8x64xf32>
    %217 = arith.maximumf %215, %216 : vector<2x8x64xf32>
    %c0_171 = arith.constant 0 : index
    %c0_172 = arith.constant 0 : index
    %c0_173 = arith.constant 0 : index
    %218 = vector.load %arg15[%c0_171, %c0_172, %c0_173] : memref<2x64x32xf32, #tpu.memory_space<vmem>>, vector<1x64x32xf32>
    %219 = vector.shape_cast %218 : vector<1x64x32xf32> to vector<64x32xf32>
    %cst_174 = arith.constant dense<0.000000e+00> : vector<2x8x32xf32>
    %220 = tpu.matmul %217, %219, %cst_174 {dimension_numbers = #tpu.dot_dimension_numbers<[2], [0], [0, 1], [1], [0, 0, 0, 1, 1, 1], [], []>} : vector<2x8x64xf32>, vector<64x32xf32>, vector<2x8x32xf32> -> vector<2x8x32xf32>
    %c0_175 = arith.constant 0 : index
    %c0_176 = arith.constant 0 : index
    %c0_177 = arith.constant 0 : index
    %221 = vector.load %arg16[%c0_175, %c0_176, %c0_177] : memref<2x1x32xf32, #tpu.memory_space<vmem>>, vector<1x1x32xf32>
    %222 = vector.shape_cast %221 : vector<1x1x32xf32> to vector<1x32xf32>
    %223 = vector.shape_cast %222 : vector<1x32xf32> to vector<1x1x32xf32>
    %224 = vector.broadcast %223 : vector<1x1x32xf32> to vector<2x8x32xf32>
    %225 = arith.addf %220, %224 : vector<2x8x32xf32>
    %226 = arith.addf %207, %225 : vector<2x8x32xf32>
    %c0_178 = arith.constant 0 : index
    %c0_179 = arith.constant 0 : index
    %c0_180 = arith.constant 0 : index
    %227 = vector.load %arg17[%c0_178, %c0_179, %c0_180] : memref<2x1x32xf32, #tpu.memory_space<vmem>>, vector<1x1x32xf32>
    %228 = vector.shape_cast %227 : vector<1x1x32xf32> to vector<1x32xf32>
    %c0_181 = arith.constant 0 : index
    %c0_182 = arith.constant 0 : index
    %c0_183 = arith.constant 0 : index
    %229 = vector.load %arg18[%c0_181, %c0_182, %c0_183] : memref<2x1x32xf32, #tpu.memory_space<vmem>>, vector<1x1x32xf32>
    %230 = vector.shape_cast %229 : vector<1x1x32xf32> to vector<1x32xf32>
    %cst_184 = arith.constant dense<0.000000e+00> : vector<2x8xf32>
    %231 = vector.multi_reduction <add>, %226, %cst_184 [2] : vector<2x8x32xf32> to vector<2x8xf32>
    %232 = vector.shape_cast %231 : vector<2x8xf32> to vector<2x8x1xf32>
    %cst_185 = arith.constant 3.200000e+01 : f32
    %233 = vector.broadcast %cst_185 : f32 to vector<2x8x1xf32>
    %234 = arith.divf %232, %233 : vector<2x8x1xf32>
    %235 = vector.broadcast %234 : vector<2x8x1xf32> to vector<2x8x32xf32>
    %236 = arith.subf %226, %235 : vector<2x8x32xf32>
    %237 = arith.mulf %236, %236 : vector<2x8x32xf32>
    %cst_186 = arith.constant dense<0.000000e+00> : vector<2x8xf32>
    %238 = vector.multi_reduction <add>, %237, %cst_186 [2] : vector<2x8x32xf32> to vector<2x8xf32>
    %239 = vector.shape_cast %238 : vector<2x8xf32> to vector<2x8x1xf32>
    %cst_187 = arith.constant 3.200000e+01 : f32
    %240 = vector.broadcast %cst_187 : f32 to vector<2x8x1xf32>
    %241 = arith.divf %239, %240 : vector<2x8x1xf32>
    %242 = vector.broadcast %234 : vector<2x8x1xf32> to vector<2x8x32xf32>
    %243 = arith.subf %226, %242 : vector<2x8x32xf32>
    %cst_188 = arith.constant 9.99999974E-6 : f32
    %244 = vector.broadcast %cst_188 : f32 to vector<2x8x1xf32>
    %245 = arith.addf %241, %244 : vector<2x8x1xf32>
    %246 = math.rsqrt %245 : vector<2x8x1xf32>
    %247 = vector.broadcast %246 : vector<2x8x1xf32> to vector<2x8x32xf32>
    %248 = arith.mulf %243, %247 : vector<2x8x32xf32>
    %249 = vector.shape_cast %228 : vector<1x32xf32> to vector<1x1x32xf32>
    %250 = vector.broadcast %249 : vector<1x1x32xf32> to vector<2x8x32xf32>
    %251 = arith.mulf %248, %250 : vector<2x8x32xf32>
    %252 = vector.shape_cast %230 : vector<1x32xf32> to vector<1x1x32xf32>
    %253 = vector.broadcast %252 : vector<1x1x32xf32> to vector<2x8x32xf32>
    %254 = arith.addf %251, %253 : vector<2x8x32xf32>
    %cst_189 = arith.constant 0.000000e+00 : f32
    %255 = vector.broadcast %cst_189 : f32 to vector<2x8x32xf32>
    %c1_190 = arith.constant 1 : index
    %c0_191 = arith.constant 0 : index
    %c0_192 = arith.constant 0 : index
    %c0_193 = arith.constant 0 : index
    %256 = vector.load %arg3[%c1_190, %c0_191, %c0_192, %c0_193] : memref<2x4x32x8xf32, #tpu.memory_space<vmem>>, vector<1x1x32x8xf32>
    %257 = vector.shape_cast %256 : vector<1x1x32x8xf32> to vector<32x8xf32>
    %cst_194 = arith.constant dense<0.000000e+00> : vector<2x8x8xf32>
    %258 = tpu.matmul %254, %257, %cst_194 {dimension_numbers = #tpu.dot_dimension_numbers<[2], [0], [0, 1], [1], [0, 0, 0, 1, 1, 1], [], []>} : vector<2x8x32xf32>, vector<32x8xf32>, vector<2x8x8xf32> -> vector<2x8x8xf32>
    %c1_195 = arith.constant 1 : index
    %c0_196 = arith.constant 0 : index
    %c0_197 = arith.constant 0 : index
    %c0_198 = arith.constant 0 : index
    %259 = vector.load %arg4[%c1_195, %c0_196, %c0_197, %c0_198] : memref<2x4x1x8xf32, #tpu.memory_space<vmem>>, vector<1x1x1x8xf32>
    %260 = vector.shape_cast %259 : vector<1x1x1x8xf32> to vector<1x8xf32>
    %261 = vector.shape_cast %260 : vector<1x8xf32> to vector<1x1x8xf32>
    %262 = vector.broadcast %261 : vector<1x1x8xf32> to vector<2x8x8xf32>
    %263 = arith.addf %258, %262 : vector<2x8x8xf32>
    %c1_199 = arith.constant 1 : index
    %c0_200 = arith.constant 0 : index
    %c0_201 = arith.constant 0 : index
    %c0_202 = arith.constant 0 : index
    %264 = vector.load %arg5[%c1_199, %c0_200, %c0_201, %c0_202] : memref<2x4x32x8xf32, #tpu.memory_space<vmem>>, vector<1x1x32x8xf32>
    %265 = vector.shape_cast %264 : vector<1x1x32x8xf32> to vector<32x8xf32>
    %cst_203 = arith.constant dense<0.000000e+00> : vector<2x8x8xf32>
    %266 = tpu.matmul %254, %265, %cst_203 {dimension_numbers = #tpu.dot_dimension_numbers<[2], [0], [0, 1], [1], [0, 0, 0, 1, 1, 1], [], []>} : vector<2x8x32xf32>, vector<32x8xf32>, vector<2x8x8xf32> -> vector<2x8x8xf32>
    %c1_204 = arith.constant 1 : index
    %c0_205 = arith.constant 0 : index
    %c0_206 = arith.constant 0 : index
    %c0_207 = arith.constant 0 : index
    %267 = vector.load %arg6[%c1_204, %c0_205, %c0_206, %c0_207] : memref<2x4x1x8xf32, #tpu.memory_space<vmem>>, vector<1x1x1x8xf32>
    %268 = vector.shape_cast %267 : vector<1x1x1x8xf32> to vector<1x8xf32>
    %269 = vector.shape_cast %268 : vector<1x8xf32> to vector<1x1x8xf32>
    %270 = vector.broadcast %269 : vector<1x1x8xf32> to vector<2x8x8xf32>
    %271 = arith.addf %266, %270 : vector<2x8x8xf32>
    %c1_208 = arith.constant 1 : index
    %c0_209 = arith.constant 0 : index
    %c0_210 = arith.constant 0 : index
    %c0_211 = arith.constant 0 : index
    %272 = vector.load %arg7[%c1_208, %c0_209, %c0_210, %c0_211] : memref<2x4x32x8xf32, #tpu.memory_space<vmem>>, vector<1x1x32x8xf32>
    %273 = vector.shape_cast %272 : vector<1x1x32x8xf32> to vector<32x8xf32>
    %cst_212 = arith.constant dense<0.000000e+00> : vector<2x8x8xf32>
    %274 = tpu.matmul %254, %273, %cst_212 {dimension_numbers = #tpu.dot_dimension_numbers<[2], [0], [0, 1], [1], [0, 0, 0, 1, 1, 1], [], []>} : vector<2x8x32xf32>, vector<32x8xf32>, vector<2x8x8xf32> -> vector<2x8x8xf32>
    %c1_213 = arith.constant 1 : index
    %c0_214 = arith.constant 0 : index
    %c0_215 = arith.constant 0 : index
    %c0_216 = arith.constant 0 : index
    %275 = vector.load %arg8[%c1_213, %c0_214, %c0_215, %c0_216] : memref<2x4x1x8xf32, #tpu.memory_space<vmem>>, vector<1x1x1x8xf32>
    %276 = vector.shape_cast %275 : vector<1x1x1x8xf32> to vector<1x8xf32>
    %277 = vector.shape_cast %276 : vector<1x8xf32> to vector<1x1x8xf32>
    %278 = vector.broadcast %277 : vector<1x1x8xf32> to vector<2x8x8xf32>
    %279 = arith.addf %274, %278 : vector<2x8x8xf32>
    %cst_217 = arith.constant dense<0.000000e+00> : vector<2x8x8xf32>
    %280 = tpu.matmul %263, %271, %cst_217 {dimension_numbers = #tpu.dot_dimension_numbers<[2], [2], [1], [1], [0, 0, 0, 1, 1, 1], [0], [0]>} : vector<2x8x8xf32>, vector<2x8x8xf32>, vector<2x8x8xf32> -> vector<2x8x8xf32>
    %cst_218 = arith.constant 0.353553385 : f32
    %281 = vector.broadcast %cst_218 : f32 to vector<2x8x8xf32>
    %282 = arith.mulf %280, %281 : vector<2x8x8xf32>
    %cst_219 = arith.constant dense<0xFF800000> : vector<2x8xf32>
    %283 = vector.multi_reduction <maximumf>, %282, %cst_219 [2] : vector<2x8x8xf32> to vector<2x8xf32>
    %284 = vector.shape_cast %283 : vector<2x8xf32> to vector<2x8x1xf32>
    %285 = vector.broadcast %284 : vector<2x8x1xf32> to vector<2x8x8xf32>
    %286 = arith.subf %282, %285 : vector<2x8x8xf32>
    %287 = math.exp %286 : vector<2x8x8xf32>
    %cst_220 = arith.constant dense<0.000000e+00> : vector<2x8xf32>
    %288 = vector.multi_reduction <add>, %287, %cst_220 [2] : vector<2x8x8xf32> to vector<2x8xf32>
    %289 = vector.shape_cast %288 : vector<2x8xf32> to vector<2x8x1xf32>
    %290 = tpu.reciprocal %289 {approx = true} : vector<2x8x1xf32> -> vector<2x8x1xf32>
    %291 = vector.broadcast %290 : vector<2x8x1xf32> to vector<2x8x8xf32>
    %292 = arith.mulf %287, %291 : vector<2x8x8xf32>
    %cst_221 = arith.constant dense<0.000000e+00> : vector<2x8x8xf32>
    %293 = tpu.matmul %292, %279, %cst_221 {dimension_numbers = #tpu.dot_dimension_numbers<[2], [1], [1], [2], [0, 0, 0, 1, 1, 2], [0], [0]>} : vector<2x8x8xf32>, vector<2x8x8xf32>, vector<2x8x8xf32> -> vector<2x8x8xf32>
    %c1_222 = arith.constant 1 : index
    %c0_223 = arith.constant 0 : index
    %c0_224 = arith.constant 0 : index
    %c0_225 = arith.constant 0 : index
    %294 = vector.load %arg9[%c1_222, %c0_223, %c0_224, %c0_225] : memref<2x4x8x32xf32, #tpu.memory_space<vmem>>, vector<1x1x8x32xf32>
    %295 = vector.shape_cast %294 : vector<1x1x8x32xf32> to vector<8x32xf32>
    %cst_226 = arith.constant dense<0.000000e+00> : vector<2x8x32xf32>
    %296 = tpu.matmul %293, %295, %cst_226 {dimension_numbers = #tpu.dot_dimension_numbers<[2], [0], [0, 1], [1], [0, 0, 0, 1, 1, 1], [], []>} : vector<2x8x8xf32>, vector<8x32xf32>, vector<2x8x32xf32> -> vector<2x8x32xf32>
    %297 = arith.addf %255, %296 : vector<2x8x32xf32>
    %c1_227 = arith.constant 1 : index
    %c1_228 = arith.constant 1 : index
    %c0_229 = arith.constant 0 : index
    %c0_230 = arith.constant 0 : index
    %298 = vector.load %arg3[%c1_227, %c1_228, %c0_229, %c0_230] : memref<2x4x32x8xf32, #tpu.memory_space<vmem>>, vector<1x1x32x8xf32>
    %299 = vector.shape_cast %298 : vector<1x1x32x8xf32> to vector<32x8xf32>
    %cst_231 = arith.constant dense<0.000000e+00> : vector<2x8x8xf32>
    %300 = tpu.matmul %254, %299, %cst_231 {dimension_numbers = #tpu.dot_dimension_numbers<[2], [0], [0, 1], [1], [0, 0, 0, 1, 1, 1], [], []>} : vector<2x8x32xf32>, vector<32x8xf32>, vector<2x8x8xf32> -> vector<2x8x8xf32>
    %c1_232 = arith.constant 1 : index
    %c1_233 = arith.constant 1 : index
    %c0_234 = arith.constant 0 : index
    %c0_235 = arith.constant 0 : index
    %301 = vector.load %arg4[%c1_232, %c1_233, %c0_234, %c0_235] : memref<2x4x1x8xf32, #tpu.memory_space<vmem>>, vector<1x1x1x8xf32>
    %302 = vector.shape_cast %301 : vector<1x1x1x8xf32> to vector<1x8xf32>
    %303 = vector.shape_cast %302 : vector<1x8xf32> to vector<1x1x8xf32>
    %304 = vector.broadcast %303 : vector<1x1x8xf32> to vector<2x8x8xf32>
    %305 = arith.addf %300, %304 : vector<2x8x8xf32>
    %c1_236 = arith.constant 1 : index
    %c1_237 = arith.constant 1 : index
    %c0_238 = arith.constant 0 : index
    %c0_239 = arith.constant 0 : index
    %306 = vector.load %arg5[%c1_236, %c1_237, %c0_238, %c0_239] : memref<2x4x32x8xf32, #tpu.memory_space<vmem>>, vector<1x1x32x8xf32>
    %307 = vector.shape_cast %306 : vector<1x1x32x8xf32> to vector<32x8xf32>
    %cst_240 = arith.constant dense<0.000000e+00> : vector<2x8x8xf32>
    %308 = tpu.matmul %254, %307, %cst_240 {dimension_numbers = #tpu.dot_dimension_numbers<[2], [0], [0, 1], [1], [0, 0, 0, 1, 1, 1], [], []>} : vector<2x8x32xf32>, vector<32x8xf32>, vector<2x8x8xf32> -> vector<2x8x8xf32>
    %c1_241 = arith.constant 1 : index
    %c1_242 = arith.constant 1 : index
    %c0_243 = arith.constant 0 : index
    %c0_244 = arith.constant 0 : index
    %309 = vector.load %arg6[%c1_241, %c1_242, %c0_243, %c0_244] : memref<2x4x1x8xf32, #tpu.memory_space<vmem>>, vector<1x1x1x8xf32>
    %310 = vector.shape_cast %309 : vector<1x1x1x8xf32> to vector<1x8xf32>
    %311 = vector.shape_cast %310 : vector<1x8xf32> to vector<1x1x8xf32>
    %312 = vector.broadcast %311 : vector<1x1x8xf32> to vector<2x8x8xf32>
    %313 = arith.addf %308, %312 : vector<2x8x8xf32>
    %c1_245 = arith.constant 1 : index
    %c1_246 = arith.constant 1 : index
    %c0_247 = arith.constant 0 : index
    %c0_248 = arith.constant 0 : index
    %314 = vector.load %arg7[%c1_245, %c1_246, %c0_247, %c0_248] : memref<2x4x32x8xf32, #tpu.memory_space<vmem>>, vector<1x1x32x8xf32>
    %315 = vector.shape_cast %314 : vector<1x1x32x8xf32> to vector<32x8xf32>
    %cst_249 = arith.constant dense<0.000000e+00> : vector<2x8x8xf32>
    %316 = tpu.matmul %254, %315, %cst_249 {dimension_numbers = #tpu.dot_dimension_numbers<[2], [0], [0, 1], [1], [0, 0, 0, 1, 1, 1], [], []>} : vector<2x8x32xf32>, vector<32x8xf32>, vector<2x8x8xf32> -> vector<2x8x8xf32>
    %c1_250 = arith.constant 1 : index
    %c1_251 = arith.constant 1 : index
    %c0_252 = arith.constant 0 : index
    %c0_253 = arith.constant 0 : index
    %317 = vector.load %arg8[%c1_250, %c1_251, %c0_252, %c0_253] : memref<2x4x1x8xf32, #tpu.memory_space<vmem>>, vector<1x1x1x8xf32>
    %318 = vector.shape_cast %317 : vector<1x1x1x8xf32> to vector<1x8xf32>
    %319 = vector.shape_cast %318 : vector<1x8xf32> to vector<1x1x8xf32>
    %320 = vector.broadcast %319 : vector<1x1x8xf32> to vector<2x8x8xf32>
    %321 = arith.addf %316, %320 : vector<2x8x8xf32>
    %cst_254 = arith.constant dense<0.000000e+00> : vector<2x8x8xf32>
    %322 = tpu.matmul %305, %313, %cst_254 {dimension_numbers = #tpu.dot_dimension_numbers<[2], [2], [1], [1], [0, 0, 0, 1, 1, 1], [0], [0]>} : vector<2x8x8xf32>, vector<2x8x8xf32>, vector<2x8x8xf32> -> vector<2x8x8xf32>
    %cst_255 = arith.constant 0.353553385 : f32
    %323 = vector.broadcast %cst_255 : f32 to vector<2x8x8xf32>
    %324 = arith.mulf %322, %323 : vector<2x8x8xf32>
    %cst_256 = arith.constant dense<0xFF800000> : vector<2x8xf32>
    %325 = vector.multi_reduction <maximumf>, %324, %cst_256 [2] : vector<2x8x8xf32> to vector<2x8xf32>
    %326 = vector.shape_cast %325 : vector<2x8xf32> to vector<2x8x1xf32>
    %327 = vector.broadcast %326 : vector<2x8x1xf32> to vector<2x8x8xf32>
    %328 = arith.subf %324, %327 : vector<2x8x8xf32>
    %329 = math.exp %328 : vector<2x8x8xf32>
    %cst_257 = arith.constant dense<0.000000e+00> : vector<2x8xf32>
    %330 = vector.multi_reduction <add>, %329, %cst_257 [2] : vector<2x8x8xf32> to vector<2x8xf32>
    %331 = vector.shape_cast %330 : vector<2x8xf32> to vector<2x8x1xf32>
    %332 = tpu.reciprocal %331 {approx = true} : vector<2x8x1xf32> -> vector<2x8x1xf32>
    %333 = vector.broadcast %332 : vector<2x8x1xf32> to vector<2x8x8xf32>
    %334 = arith.mulf %329, %333 : vector<2x8x8xf32>
    %cst_258 = arith.constant dense<0.000000e+00> : vector<2x8x8xf32>
    %335 = tpu.matmul %334, %321, %cst_258 {dimension_numbers = #tpu.dot_dimension_numbers<[2], [1], [1], [2], [0, 0, 0, 1, 1, 2], [0], [0]>} : vector<2x8x8xf32>, vector<2x8x8xf32>, vector<2x8x8xf32> -> vector<2x8x8xf32>
    %c1_259 = arith.constant 1 : index
    %c1_260 = arith.constant 1 : index
    %c0_261 = arith.constant 0 : index
    %c0_262 = arith.constant 0 : index
    %336 = vector.load %arg9[%c1_259, %c1_260, %c0_261, %c0_262] : memref<2x4x8x32xf32, #tpu.memory_space<vmem>>, vector<1x1x8x32xf32>
    %337 = vector.shape_cast %336 : vector<1x1x8x32xf32> to vector<8x32xf32>
    %cst_263 = arith.constant dense<0.000000e+00> : vector<2x8x32xf32>
    %338 = tpu.matmul %335, %337, %cst_263 {dimension_numbers = #tpu.dot_dimension_numbers<[2], [0], [0, 1], [1], [0, 0, 0, 1, 1, 1], [], []>} : vector<2x8x8xf32>, vector<8x32xf32>, vector<2x8x32xf32> -> vector<2x8x32xf32>
    %339 = arith.addf %297, %338 : vector<2x8x32xf32>
    %c1_264 = arith.constant 1 : index
    %c2_265 = arith.constant 2 : index
    %c0_266 = arith.constant 0 : index
    %c0_267 = arith.constant 0 : index
    %340 = vector.load %arg3[%c1_264, %c2_265, %c0_266, %c0_267] : memref<2x4x32x8xf32, #tpu.memory_space<vmem>>, vector<1x1x32x8xf32>
    %341 = vector.shape_cast %340 : vector<1x1x32x8xf32> to vector<32x8xf32>
    %cst_268 = arith.constant dense<0.000000e+00> : vector<2x8x8xf32>
    %342 = tpu.matmul %254, %341, %cst_268 {dimension_numbers = #tpu.dot_dimension_numbers<[2], [0], [0, 1], [1], [0, 0, 0, 1, 1, 1], [], []>} : vector<2x8x32xf32>, vector<32x8xf32>, vector<2x8x8xf32> -> vector<2x8x8xf32>
    %c1_269 = arith.constant 1 : index
    %c2_270 = arith.constant 2 : index
    %c0_271 = arith.constant 0 : index
    %c0_272 = arith.constant 0 : index
    %343 = vector.load %arg4[%c1_269, %c2_270, %c0_271, %c0_272] : memref<2x4x1x8xf32, #tpu.memory_space<vmem>>, vector<1x1x1x8xf32>
    %344 = vector.shape_cast %343 : vector<1x1x1x8xf32> to vector<1x8xf32>
    %345 = vector.shape_cast %344 : vector<1x8xf32> to vector<1x1x8xf32>
    %346 = vector.broadcast %345 : vector<1x1x8xf32> to vector<2x8x8xf32>
    %347 = arith.addf %342, %346 : vector<2x8x8xf32>
    %c1_273 = arith.constant 1 : index
    %c2_274 = arith.constant 2 : index
    %c0_275 = arith.constant 0 : index
    %c0_276 = arith.constant 0 : index
    %348 = vector.load %arg5[%c1_273, %c2_274, %c0_275, %c0_276] : memref<2x4x32x8xf32, #tpu.memory_space<vmem>>, vector<1x1x32x8xf32>
    %349 = vector.shape_cast %348 : vector<1x1x32x8xf32> to vector<32x8xf32>
    %cst_277 = arith.constant dense<0.000000e+00> : vector<2x8x8xf32>
    %350 = tpu.matmul %254, %349, %cst_277 {dimension_numbers = #tpu.dot_dimension_numbers<[2], [0], [0, 1], [1], [0, 0, 0, 1, 1, 1], [], []>} : vector<2x8x32xf32>, vector<32x8xf32>, vector<2x8x8xf32> -> vector<2x8x8xf32>
    %c1_278 = arith.constant 1 : index
    %c2_279 = arith.constant 2 : index
    %c0_280 = arith.constant 0 : index
    %c0_281 = arith.constant 0 : index
    %351 = vector.load %arg6[%c1_278, %c2_279, %c0_280, %c0_281] : memref<2x4x1x8xf32, #tpu.memory_space<vmem>>, vector<1x1x1x8xf32>
    %352 = vector.shape_cast %351 : vector<1x1x1x8xf32> to vector<1x8xf32>
    %353 = vector.shape_cast %352 : vector<1x8xf32> to vector<1x1x8xf32>
    %354 = vector.broadcast %353 : vector<1x1x8xf32> to vector<2x8x8xf32>
    %355 = arith.addf %350, %354 : vector<2x8x8xf32>
    %c1_282 = arith.constant 1 : index
    %c2_283 = arith.constant 2 : index
    %c0_284 = arith.constant 0 : index
    %c0_285 = arith.constant 0 : index
    %356 = vector.load %arg7[%c1_282, %c2_283, %c0_284, %c0_285] : memref<2x4x32x8xf32, #tpu.memory_space<vmem>>, vector<1x1x32x8xf32>
    %357 = vector.shape_cast %356 : vector<1x1x32x8xf32> to vector<32x8xf32>
    %cst_286 = arith.constant dense<0.000000e+00> : vector<2x8x8xf32>
    %358 = tpu.matmul %254, %357, %cst_286 {dimension_numbers = #tpu.dot_dimension_numbers<[2], [0], [0, 1], [1], [0, 0, 0, 1, 1, 1], [], []>} : vector<2x8x32xf32>, vector<32x8xf32>, vector<2x8x8xf32> -> vector<2x8x8xf32>
    %c1_287 = arith.constant 1 : index
    %c2_288 = arith.constant 2 : index
    %c0_289 = arith.constant 0 : index
    %c0_290 = arith.constant 0 : index
    %359 = vector.load %arg8[%c1_287, %c2_288, %c0_289, %c0_290] : memref<2x4x1x8xf32, #tpu.memory_space<vmem>>, vector<1x1x1x8xf32>
    %360 = vector.shape_cast %359 : vector<1x1x1x8xf32> to vector<1x8xf32>
    %361 = vector.shape_cast %360 : vector<1x8xf32> to vector<1x1x8xf32>
    %362 = vector.broadcast %361 : vector<1x1x8xf32> to vector<2x8x8xf32>
    %363 = arith.addf %358, %362 : vector<2x8x8xf32>
    %cst_291 = arith.constant dense<0.000000e+00> : vector<2x8x8xf32>
    %364 = tpu.matmul %347, %355, %cst_291 {dimension_numbers = #tpu.dot_dimension_numbers<[2], [2], [1], [1], [0, 0, 0, 1, 1, 1], [0], [0]>} : vector<2x8x8xf32>, vector<2x8x8xf32>, vector<2x8x8xf32> -> vector<2x8x8xf32>
    %cst_292 = arith.constant 0.353553385 : f32
    %365 = vector.broadcast %cst_292 : f32 to vector<2x8x8xf32>
    %366 = arith.mulf %364, %365 : vector<2x8x8xf32>
    %cst_293 = arith.constant dense<0xFF800000> : vector<2x8xf32>
    %367 = vector.multi_reduction <maximumf>, %366, %cst_293 [2] : vector<2x8x8xf32> to vector<2x8xf32>
    %368 = vector.shape_cast %367 : vector<2x8xf32> to vector<2x8x1xf32>
    %369 = vector.broadcast %368 : vector<2x8x1xf32> to vector<2x8x8xf32>
    %370 = arith.subf %366, %369 : vector<2x8x8xf32>
    %371 = math.exp %370 : vector<2x8x8xf32>
    %cst_294 = arith.constant dense<0.000000e+00> : vector<2x8xf32>
    %372 = vector.multi_reduction <add>, %371, %cst_294 [2] : vector<2x8x8xf32> to vector<2x8xf32>
    %373 = vector.shape_cast %372 : vector<2x8xf32> to vector<2x8x1xf32>
    %374 = tpu.reciprocal %373 {approx = true} : vector<2x8x1xf32> -> vector<2x8x1xf32>
    %375 = vector.broadcast %374 : vector<2x8x1xf32> to vector<2x8x8xf32>
    %376 = arith.mulf %371, %375 : vector<2x8x8xf32>
    %cst_295 = arith.constant dense<0.000000e+00> : vector<2x8x8xf32>
    %377 = tpu.matmul %376, %363, %cst_295 {dimension_numbers = #tpu.dot_dimension_numbers<[2], [1], [1], [2], [0, 0, 0, 1, 1, 2], [0], [0]>} : vector<2x8x8xf32>, vector<2x8x8xf32>, vector<2x8x8xf32> -> vector<2x8x8xf32>
    %c1_296 = arith.constant 1 : index
    %c2_297 = arith.constant 2 : index
    %c0_298 = arith.constant 0 : index
    %c0_299 = arith.constant 0 : index
    %378 = vector.load %arg9[%c1_296, %c2_297, %c0_298, %c0_299] : memref<2x4x8x32xf32, #tpu.memory_space<vmem>>, vector<1x1x8x32xf32>
    %379 = vector.shape_cast %378 : vector<1x1x8x32xf32> to vector<8x32xf32>
    %cst_300 = arith.constant dense<0.000000e+00> : vector<2x8x32xf32>
    %380 = tpu.matmul %377, %379, %cst_300 {dimension_numbers = #tpu.dot_dimension_numbers<[2], [0], [0, 1], [1], [0, 0, 0, 1, 1, 1], [], []>} : vector<2x8x8xf32>, vector<8x32xf32>, vector<2x8x32xf32> -> vector<2x8x32xf32>
    %381 = arith.addf %339, %380 : vector<2x8x32xf32>
    %c1_301 = arith.constant 1 : index
    %c3_302 = arith.constant 3 : index
    %c0_303 = arith.constant 0 : index
    %c0_304 = arith.constant 0 : index
    %382 = vector.load %arg3[%c1_301, %c3_302, %c0_303, %c0_304] : memref<2x4x32x8xf32, #tpu.memory_space<vmem>>, vector<1x1x32x8xf32>
    %383 = vector.shape_cast %382 : vector<1x1x32x8xf32> to vector<32x8xf32>
    %cst_305 = arith.constant dense<0.000000e+00> : vector<2x8x8xf32>
    %384 = tpu.matmul %254, %383, %cst_305 {dimension_numbers = #tpu.dot_dimension_numbers<[2], [0], [0, 1], [1], [0, 0, 0, 1, 1, 1], [], []>} : vector<2x8x32xf32>, vector<32x8xf32>, vector<2x8x8xf32> -> vector<2x8x8xf32>
    %c1_306 = arith.constant 1 : index
    %c3_307 = arith.constant 3 : index
    %c0_308 = arith.constant 0 : index
    %c0_309 = arith.constant 0 : index
    %385 = vector.load %arg4[%c1_306, %c3_307, %c0_308, %c0_309] : memref<2x4x1x8xf32, #tpu.memory_space<vmem>>, vector<1x1x1x8xf32>
    %386 = vector.shape_cast %385 : vector<1x1x1x8xf32> to vector<1x8xf32>
    %387 = vector.shape_cast %386 : vector<1x8xf32> to vector<1x1x8xf32>
    %388 = vector.broadcast %387 : vector<1x1x8xf32> to vector<2x8x8xf32>
    %389 = arith.addf %384, %388 : vector<2x8x8xf32>
    %c1_310 = arith.constant 1 : index
    %c3_311 = arith.constant 3 : index
    %c0_312 = arith.constant 0 : index
    %c0_313 = arith.constant 0 : index
    %390 = vector.load %arg5[%c1_310, %c3_311, %c0_312, %c0_313] : memref<2x4x32x8xf32, #tpu.memory_space<vmem>>, vector<1x1x32x8xf32>
    %391 = vector.shape_cast %390 : vector<1x1x32x8xf32> to vector<32x8xf32>
    %cst_314 = arith.constant dense<0.000000e+00> : vector<2x8x8xf32>
    %392 = tpu.matmul %254, %391, %cst_314 {dimension_numbers = #tpu.dot_dimension_numbers<[2], [0], [0, 1], [1], [0, 0, 0, 1, 1, 1], [], []>} : vector<2x8x32xf32>, vector<32x8xf32>, vector<2x8x8xf32> -> vector<2x8x8xf32>
    %c1_315 = arith.constant 1 : index
    %c3_316 = arith.constant 3 : index
    %c0_317 = arith.constant 0 : index
    %c0_318 = arith.constant 0 : index
    %393 = vector.load %arg6[%c1_315, %c3_316, %c0_317, %c0_318] : memref<2x4x1x8xf32, #tpu.memory_space<vmem>>, vector<1x1x1x8xf32>
    %394 = vector.shape_cast %393 : vector<1x1x1x8xf32> to vector<1x8xf32>
    %395 = vector.shape_cast %394 : vector<1x8xf32> to vector<1x1x8xf32>
    %396 = vector.broadcast %395 : vector<1x1x8xf32> to vector<2x8x8xf32>
    %397 = arith.addf %392, %396 : vector<2x8x8xf32>
    %c1_319 = arith.constant 1 : index
    %c3_320 = arith.constant 3 : index
    %c0_321 = arith.constant 0 : index
    %c0_322 = arith.constant 0 : index
    %398 = vector.load %arg7[%c1_319, %c3_320, %c0_321, %c0_322] : memref<2x4x32x8xf32, #tpu.memory_space<vmem>>, vector<1x1x32x8xf32>
    %399 = vector.shape_cast %398 : vector<1x1x32x8xf32> to vector<32x8xf32>
    %cst_323 = arith.constant dense<0.000000e+00> : vector<2x8x8xf32>
    %400 = tpu.matmul %254, %399, %cst_323 {dimension_numbers = #tpu.dot_dimension_numbers<[2], [0], [0, 1], [1], [0, 0, 0, 1, 1, 1], [], []>} : vector<2x8x32xf32>, vector<32x8xf32>, vector<2x8x8xf32> -> vector<2x8x8xf32>
    %c1_324 = arith.constant 1 : index
    %c3_325 = arith.constant 3 : index
    %c0_326 = arith.constant 0 : index
    %c0_327 = arith.constant 0 : index
    %401 = vector.load %arg8[%c1_324, %c3_325, %c0_326, %c0_327] : memref<2x4x1x8xf32, #tpu.memory_space<vmem>>, vector<1x1x1x8xf32>
    %402 = vector.shape_cast %401 : vector<1x1x1x8xf32> to vector<1x8xf32>
    %403 = vector.shape_cast %402 : vector<1x8xf32> to vector<1x1x8xf32>
    %404 = vector.broadcast %403 : vector<1x1x8xf32> to vector<2x8x8xf32>
    %405 = arith.addf %400, %404 : vector<2x8x8xf32>
    %cst_328 = arith.constant dense<0.000000e+00> : vector<2x8x8xf32>
    %406 = tpu.matmul %389, %397, %cst_328 {dimension_numbers = #tpu.dot_dimension_numbers<[2], [2], [1], [1], [0, 0, 0, 1, 1, 1], [0], [0]>} : vector<2x8x8xf32>, vector<2x8x8xf32>, vector<2x8x8xf32> -> vector<2x8x8xf32>
    %cst_329 = arith.constant 0.353553385 : f32
    %407 = vector.broadcast %cst_329 : f32 to vector<2x8x8xf32>
    %408 = arith.mulf %406, %407 : vector<2x8x8xf32>
    %cst_330 = arith.constant dense<0xFF800000> : vector<2x8xf32>
    %409 = vector.multi_reduction <maximumf>, %408, %cst_330 [2] : vector<2x8x8xf32> to vector<2x8xf32>
    %410 = vector.shape_cast %409 : vector<2x8xf32> to vector<2x8x1xf32>
    %411 = vector.broadcast %410 : vector<2x8x1xf32> to vector<2x8x8xf32>
    %412 = arith.subf %408, %411 : vector<2x8x8xf32>
    %413 = math.exp %412 : vector<2x8x8xf32>
    %cst_331 = arith.constant dense<0.000000e+00> : vector<2x8xf32>
    %414 = vector.multi_reduction <add>, %413, %cst_331 [2] : vector<2x8x8xf32> to vector<2x8xf32>
    %415 = vector.shape_cast %414 : vector<2x8xf32> to vector<2x8x1xf32>
    %416 = tpu.reciprocal %415 {approx = true} : vector<2x8x1xf32> -> vector<2x8x1xf32>
    %417 = vector.broadcast %416 : vector<2x8x1xf32> to vector<2x8x8xf32>
    %418 = arith.mulf %413, %417 : vector<2x8x8xf32>
    %cst_332 = arith.constant dense<0.000000e+00> : vector<2x8x8xf32>
    %419 = tpu.matmul %418, %405, %cst_332 {dimension_numbers = #tpu.dot_dimension_numbers<[2], [1], [1], [2], [0, 0, 0, 1, 1, 2], [0], [0]>} : vector<2x8x8xf32>, vector<2x8x8xf32>, vector<2x8x8xf32> -> vector<2x8x8xf32>
    %c1_333 = arith.constant 1 : index
    %c3_334 = arith.constant 3 : index
    %c0_335 = arith.constant 0 : index
    %c0_336 = arith.constant 0 : index
    %420 = vector.load %arg9[%c1_333, %c3_334, %c0_335, %c0_336] : memref<2x4x8x32xf32, #tpu.memory_space<vmem>>, vector<1x1x8x32xf32>
    %421 = vector.shape_cast %420 : vector<1x1x8x32xf32> to vector<8x32xf32>
    %cst_337 = arith.constant dense<0.000000e+00> : vector<2x8x32xf32>
    %422 = tpu.matmul %419, %421, %cst_337 {dimension_numbers = #tpu.dot_dimension_numbers<[2], [0], [0, 1], [1], [0, 0, 0, 1, 1, 1], [], []>} : vector<2x8x8xf32>, vector<8x32xf32>, vector<2x8x32xf32> -> vector<2x8x32xf32>
    %423 = arith.addf %381, %422 : vector<2x8x32xf32>
    %c1_338 = arith.constant 1 : index
    %c0_339 = arith.constant 0 : index
    %c0_340 = arith.constant 0 : index
    %424 = vector.load %arg10[%c1_338, %c0_339, %c0_340] : memref<2x1x32xf32, #tpu.memory_space<vmem>>, vector<1x1x32xf32>
    %425 = vector.shape_cast %424 : vector<1x1x32xf32> to vector<1x32xf32>
    %426 = vector.shape_cast %425 : vector<1x32xf32> to vector<1x1x32xf32>
    %427 = vector.broadcast %426 : vector<1x1x32xf32> to vector<2x8x32xf32>
    %428 = arith.addf %423, %427 : vector<2x8x32xf32>
    %429 = arith.addf %254, %428 : vector<2x8x32xf32>
    %c1_341 = arith.constant 1 : index
    %c0_342 = arith.constant 0 : index
    %c0_343 = arith.constant 0 : index
    %430 = vector.load %arg11[%c1_341, %c0_342, %c0_343] : memref<2x1x32xf32, #tpu.memory_space<vmem>>, vector<1x1x32xf32>
    %431 = vector.shape_cast %430 : vector<1x1x32xf32> to vector<1x32xf32>
    %c1_344 = arith.constant 1 : index
    %c0_345 = arith.constant 0 : index
    %c0_346 = arith.constant 0 : index
    %432 = vector.load %arg12[%c1_344, %c0_345, %c0_346] : memref<2x1x32xf32, #tpu.memory_space<vmem>>, vector<1x1x32xf32>
    %433 = vector.shape_cast %432 : vector<1x1x32xf32> to vector<1x32xf32>
    %cst_347 = arith.constant dense<0.000000e+00> : vector<2x8xf32>
    %434 = vector.multi_reduction <add>, %429, %cst_347 [2] : vector<2x8x32xf32> to vector<2x8xf32>
    %435 = vector.shape_cast %434 : vector<2x8xf32> to vector<2x8x1xf32>
    %cst_348 = arith.constant 3.200000e+01 : f32
    %436 = vector.broadcast %cst_348 : f32 to vector<2x8x1xf32>
    %437 = arith.divf %435, %436 : vector<2x8x1xf32>
    %438 = vector.broadcast %437 : vector<2x8x1xf32> to vector<2x8x32xf32>
    %439 = arith.subf %429, %438 : vector<2x8x32xf32>
    %440 = arith.mulf %439, %439 : vector<2x8x32xf32>
    %cst_349 = arith.constant dense<0.000000e+00> : vector<2x8xf32>
    %441 = vector.multi_reduction <add>, %440, %cst_349 [2] : vector<2x8x32xf32> to vector<2x8xf32>
    %442 = vector.shape_cast %441 : vector<2x8xf32> to vector<2x8x1xf32>
    %cst_350 = arith.constant 3.200000e+01 : f32
    %443 = vector.broadcast %cst_350 : f32 to vector<2x8x1xf32>
    %444 = arith.divf %442, %443 : vector<2x8x1xf32>
    %445 = vector.broadcast %437 : vector<2x8x1xf32> to vector<2x8x32xf32>
    %446 = arith.subf %429, %445 : vector<2x8x32xf32>
    %cst_351 = arith.constant 9.99999974E-6 : f32
    %447 = vector.broadcast %cst_351 : f32 to vector<2x8x1xf32>
    %448 = arith.addf %444, %447 : vector<2x8x1xf32>
    %449 = math.rsqrt %448 : vector<2x8x1xf32>
    %450 = vector.broadcast %449 : vector<2x8x1xf32> to vector<2x8x32xf32>
    %451 = arith.mulf %446, %450 : vector<2x8x32xf32>
    %452 = vector.shape_cast %431 : vector<1x32xf32> to vector<1x1x32xf32>
    %453 = vector.broadcast %452 : vector<1x1x32xf32> to vector<2x8x32xf32>
    %454 = arith.mulf %451, %453 : vector<2x8x32xf32>
    %455 = vector.shape_cast %433 : vector<1x32xf32> to vector<1x1x32xf32>
    %456 = vector.broadcast %455 : vector<1x1x32xf32> to vector<2x8x32xf32>
    %457 = arith.addf %454, %456 : vector<2x8x32xf32>
    %c1_352 = arith.constant 1 : index
    %c0_353 = arith.constant 0 : index
    %c0_354 = arith.constant 0 : index
    %458 = vector.load %arg13[%c1_352, %c0_353, %c0_354] : memref<2x32x64xf32, #tpu.memory_space<vmem>>, vector<1x32x64xf32>
    %459 = vector.shape_cast %458 : vector<1x32x64xf32> to vector<32x64xf32>
    %cst_355 = arith.constant dense<0.000000e+00> : vector<2x8x64xf32>
    %460 = tpu.matmul %457, %459, %cst_355 {dimension_numbers = #tpu.dot_dimension_numbers<[2], [0], [0, 1], [1], [0, 0, 0, 1, 1, 1], [], []>} : vector<2x8x32xf32>, vector<32x64xf32>, vector<2x8x64xf32> -> vector<2x8x64xf32>
    %c1_356 = arith.constant 1 : index
    %c0_357 = arith.constant 0 : index
    %c0_358 = arith.constant 0 : index
    %461 = vector.load %arg14[%c1_356, %c0_357, %c0_358] : memref<2x1x64xf32, #tpu.memory_space<vmem>>, vector<1x1x64xf32>
    %462 = vector.shape_cast %461 : vector<1x1x64xf32> to vector<1x64xf32>
    %463 = vector.shape_cast %462 : vector<1x64xf32> to vector<1x1x64xf32>
    %464 = vector.broadcast %463 : vector<1x1x64xf32> to vector<2x8x64xf32>
    %465 = arith.addf %460, %464 : vector<2x8x64xf32>
    %cst_359 = arith.constant 0.000000e+00 : f32
    %466 = vector.broadcast %cst_359 : f32 to vector<2x8x64xf32>
    %467 = arith.maximumf %465, %466 : vector<2x8x64xf32>
    %c1_360 = arith.constant 1 : index
    %c0_361 = arith.constant 0 : index
    %c0_362 = arith.constant 0 : index
    %468 = vector.load %arg15[%c1_360, %c0_361, %c0_362] : memref<2x64x32xf32, #tpu.memory_space<vmem>>, vector<1x64x32xf32>
    %469 = vector.shape_cast %468 : vector<1x64x32xf32> to vector<64x32xf32>
    %cst_363 = arith.constant dense<0.000000e+00> : vector<2x8x32xf32>
    %470 = tpu.matmul %467, %469, %cst_363 {dimension_numbers = #tpu.dot_dimension_numbers<[2], [0], [0, 1], [1], [0, 0, 0, 1, 1, 1], [], []>} : vector<2x8x64xf32>, vector<64x32xf32>, vector<2x8x32xf32> -> vector<2x8x32xf32>
    %c1_364 = arith.constant 1 : index
    %c0_365 = arith.constant 0 : index
    %c0_366 = arith.constant 0 : index
    %471 = vector.load %arg16[%c1_364, %c0_365, %c0_366] : memref<2x1x32xf32, #tpu.memory_space<vmem>>, vector<1x1x32xf32>
    %472 = vector.shape_cast %471 : vector<1x1x32xf32> to vector<1x32xf32>
    %473 = vector.shape_cast %472 : vector<1x32xf32> to vector<1x1x32xf32>
    %474 = vector.broadcast %473 : vector<1x1x32xf32> to vector<2x8x32xf32>
    %475 = arith.addf %470, %474 : vector<2x8x32xf32>
    %476 = arith.addf %457, %475 : vector<2x8x32xf32>
    %c1_367 = arith.constant 1 : index
    %c0_368 = arith.constant 0 : index
    %c0_369 = arith.constant 0 : index
    %477 = vector.load %arg17[%c1_367, %c0_368, %c0_369] : memref<2x1x32xf32, #tpu.memory_space<vmem>>, vector<1x1x32xf32>
    %478 = vector.shape_cast %477 : vector<1x1x32xf32> to vector<1x32xf32>
    %c1_370 = arith.constant 1 : index
    %c0_371 = arith.constant 0 : index
    %c0_372 = arith.constant 0 : index
    %479 = vector.load %arg18[%c1_370, %c0_371, %c0_372] : memref<2x1x32xf32, #tpu.memory_space<vmem>>, vector<1x1x32xf32>
    %480 = vector.shape_cast %479 : vector<1x1x32xf32> to vector<1x32xf32>
    %cst_373 = arith.constant dense<0.000000e+00> : vector<2x8xf32>
    %481 = vector.multi_reduction <add>, %476, %cst_373 [2] : vector<2x8x32xf32> to vector<2x8xf32>
    %482 = vector.shape_cast %481 : vector<2x8xf32> to vector<2x8x1xf32>
    %cst_374 = arith.constant 3.200000e+01 : f32
    %483 = vector.broadcast %cst_374 : f32 to vector<2x8x1xf32>
    %484 = arith.divf %482, %483 : vector<2x8x1xf32>
    %485 = vector.broadcast %484 : vector<2x8x1xf32> to vector<2x8x32xf32>
    %486 = arith.subf %476, %485 : vector<2x8x32xf32>
    %487 = arith.mulf %486, %486 : vector<2x8x32xf32>
    %cst_375 = arith.constant dense<0.000000e+00> : vector<2x8xf32>
    %488 = vector.multi_reduction <add>, %487, %cst_375 [2] : vector<2x8x32xf32> to vector<2x8xf32>
    %489 = vector.shape_cast %488 : vector<2x8xf32> to vector<2x8x1xf32>
    %cst_376 = arith.constant 3.200000e+01 : f32
    %490 = vector.broadcast %cst_376 : f32 to vector<2x8x1xf32>
    %491 = arith.divf %489, %490 : vector<2x8x1xf32>
    %492 = vector.broadcast %484 : vector<2x8x1xf32> to vector<2x8x32xf32>
    %493 = arith.subf %476, %492 : vector<2x8x32xf32>
    %cst_377 = arith.constant 9.99999974E-6 : f32
    %494 = vector.broadcast %cst_377 : f32 to vector<2x8x1xf32>
    %495 = arith.addf %491, %494 : vector<2x8x1xf32>
    %496 = math.rsqrt %495 : vector<2x8x1xf32>
    %497 = vector.broadcast %496 : vector<2x8x1xf32> to vector<2x8x32xf32>
    %498 = arith.mulf %493, %497 : vector<2x8x32xf32>
    %499 = vector.shape_cast %478 : vector<1x32xf32> to vector<1x1x32xf32>
    %500 = vector.broadcast %499 : vector<1x1x32xf32> to vector<2x8x32xf32>
    %501 = arith.mulf %498, %500 : vector<2x8x32xf32>
    %502 = vector.shape_cast %480 : vector<1x32xf32> to vector<1x1x32xf32>
    %503 = vector.broadcast %502 : vector<1x1x32xf32> to vector<2x8x32xf32>
    %504 = arith.addf %501, %503 : vector<2x8x32xf32>
    %cst_378 = arith.constant 0.000000e+00 : f32
    %505 = vector.broadcast %cst_378 : f32 to vector<2x1x64xf32>
    %c0_379 = arith.constant 0 : index
    %c0_380 = arith.constant 0 : index
    %506 = vector.load %arg20[%c0_379, %c0_380] : memref<1x64xf32, #tpu.memory_space<vmem>>, vector<1x64xf32>
    %507 = vector.shape_cast %506 : vector<1x64xf32> to vector<1x1x64xf32>
    %508 = vector.broadcast %507 : vector<1x1x64xf32> to vector<2x1x64xf32>
    %509 = arith.addf %505, %508 : vector<2x1x64xf32>
    %510 = vector.extract_strided_slice %504 {offsets = [0, 0, 0], sizes = [2, 1, 32], strides = [1, 1, 1]} : vector<2x8x32xf32> to vector<2x1x32xf32>
    %c0_381 = arith.constant 0 : index
    %c0_382 = arith.constant 0 : index
    %c0_383 = arith.constant 0 : index
    %511 = vector.load %arg19[%c0_381, %c0_382, %c0_383] : memref<8x32x64xf32, #tpu.memory_space<vmem>>, vector<1x32x64xf32>
    %512 = vector.shape_cast %511 : vector<1x32x64xf32> to vector<32x64xf32>
    %cst_384 = arith.constant dense<0.000000e+00> : vector<2x1x64xf32>
    %513 = tpu.matmul %510, %512, %cst_384 {dimension_numbers = #tpu.dot_dimension_numbers<[2], [0], [0, 1], [1], [0, 0, 0, 1, 1, 1], [], []>} : vector<2x1x32xf32>, vector<32x64xf32>, vector<2x1x64xf32> -> vector<2x1x64xf32>
    %514 = arith.addf %509, %513 : vector<2x1x64xf32>
    %515 = vector.extract_strided_slice %504 {offsets = [0, 1, 0], sizes = [2, 1, 32], strides = [1, 1, 1]} : vector<2x8x32xf32> to vector<2x1x32xf32>
    %c1_385 = arith.constant 1 : index
    %c0_386 = arith.constant 0 : index
    %c0_387 = arith.constant 0 : index
    %516 = vector.load %arg19[%c1_385, %c0_386, %c0_387] : memref<8x32x64xf32, #tpu.memory_space<vmem>>, vector<1x32x64xf32>
    %517 = vector.shape_cast %516 : vector<1x32x64xf32> to vector<32x64xf32>
    %cst_388 = arith.constant dense<0.000000e+00> : vector<2x1x64xf32>
    %518 = tpu.matmul %515, %517, %cst_388 {dimension_numbers = #tpu.dot_dimension_numbers<[2], [0], [0, 1], [1], [0, 0, 0, 1, 1, 1], [], []>} : vector<2x1x32xf32>, vector<32x64xf32>, vector<2x1x64xf32> -> vector<2x1x64xf32>
    %519 = arith.addf %514, %518 : vector<2x1x64xf32>
    %520 = vector.extract_strided_slice %504 {offsets = [0, 2, 0], sizes = [2, 1, 32], strides = [1, 1, 1]} : vector<2x8x32xf32> to vector<2x1x32xf32>
    %c2_389 = arith.constant 2 : index
    %c0_390 = arith.constant 0 : index
    %c0_391 = arith.constant 0 : index
    %521 = vector.load %arg19[%c2_389, %c0_390, %c0_391] : memref<8x32x64xf32, #tpu.memory_space<vmem>>, vector<1x32x64xf32>
    %522 = vector.shape_cast %521 : vector<1x32x64xf32> to vector<32x64xf32>
    %cst_392 = arith.constant dense<0.000000e+00> : vector<2x1x64xf32>
    %523 = tpu.matmul %520, %522, %cst_392 {dimension_numbers = #tpu.dot_dimension_numbers<[2], [0], [0, 1], [1], [0, 0, 0, 1, 1, 1], [], []>} : vector<2x1x32xf32>, vector<32x64xf32>, vector<2x1x64xf32> -> vector<2x1x64xf32>
    %524 = arith.addf %519, %523 : vector<2x1x64xf32>
    %525 = vector.extract_strided_slice %504 {offsets = [0, 3, 0], sizes = [2, 1, 32], strides = [1, 1, 1]} : vector<2x8x32xf32> to vector<2x1x32xf32>
    %c3_393 = arith.constant 3 : index
    %c0_394 = arith.constant 0 : index
    %c0_395 = arith.constant 0 : index
    %526 = vector.load %arg19[%c3_393, %c0_394, %c0_395] : memref<8x32x64xf32, #tpu.memory_space<vmem>>, vector<1x32x64xf32>
    %527 = vector.shape_cast %526 : vector<1x32x64xf32> to vector<32x64xf32>
    %cst_396 = arith.constant dense<0.000000e+00> : vector<2x1x64xf32>
    %528 = tpu.matmul %525, %527, %cst_396 {dimension_numbers = #tpu.dot_dimension_numbers<[2], [0], [0, 1], [1], [0, 0, 0, 1, 1, 1], [], []>} : vector<2x1x32xf32>, vector<32x64xf32>, vector<2x1x64xf32> -> vector<2x1x64xf32>
    %529 = arith.addf %524, %528 : vector<2x1x64xf32>
    %530 = vector.extract_strided_slice %504 {offsets = [0, 4, 0], sizes = [2, 1, 32], strides = [1, 1, 1]} : vector<2x8x32xf32> to vector<2x1x32xf32>
    %c4 = arith.constant 4 : index
    %c0_397 = arith.constant 0 : index
    %c0_398 = arith.constant 0 : index
    %531 = vector.load %arg19[%c4, %c0_397, %c0_398] : memref<8x32x64xf32, #tpu.memory_space<vmem>>, vector<1x32x64xf32>
    %532 = vector.shape_cast %531 : vector<1x32x64xf32> to vector<32x64xf32>
    %cst_399 = arith.constant dense<0.000000e+00> : vector<2x1x64xf32>
    %533 = tpu.matmul %530, %532, %cst_399 {dimension_numbers = #tpu.dot_dimension_numbers<[2], [0], [0, 1], [1], [0, 0, 0, 1, 1, 1], [], []>} : vector<2x1x32xf32>, vector<32x64xf32>, vector<2x1x64xf32> -> vector<2x1x64xf32>
    %534 = arith.addf %529, %533 : vector<2x1x64xf32>
    %535 = vector.extract_strided_slice %504 {offsets = [0, 5, 0], sizes = [2, 1, 32], strides = [1, 1, 1]} : vector<2x8x32xf32> to vector<2x1x32xf32>
    %c5 = arith.constant 5 : index
    %c0_400 = arith.constant 0 : index
    %c0_401 = arith.constant 0 : index
    %536 = vector.load %arg19[%c5, %c0_400, %c0_401] : memref<8x32x64xf32, #tpu.memory_space<vmem>>, vector<1x32x64xf32>
    %537 = vector.shape_cast %536 : vector<1x32x64xf32> to vector<32x64xf32>
    %cst_402 = arith.constant dense<0.000000e+00> : vector<2x1x64xf32>
    %538 = tpu.matmul %535, %537, %cst_402 {dimension_numbers = #tpu.dot_dimension_numbers<[2], [0], [0, 1], [1], [0, 0, 0, 1, 1, 1], [], []>} : vector<2x1x32xf32>, vector<32x64xf32>, vector<2x1x64xf32> -> vector<2x1x64xf32>
    %539 = arith.addf %534, %538 : vector<2x1x64xf32>
    %540 = vector.extract_strided_slice %504 {offsets = [0, 6, 0], sizes = [2, 1, 32], strides = [1, 1, 1]} : vector<2x8x32xf32> to vector<2x1x32xf32>
    %c6 = arith.constant 6 : index
    %c0_403 = arith.constant 0 : index
    %c0_404 = arith.constant 0 : index
    %541 = vector.load %arg19[%c6, %c0_403, %c0_404] : memref<8x32x64xf32, #tpu.memory_space<vmem>>, vector<1x32x64xf32>
    %542 = vector.shape_cast %541 : vector<1x32x64xf32> to vector<32x64xf32>
    %cst_405 = arith.constant dense<0.000000e+00> : vector<2x1x64xf32>
    %543 = tpu.matmul %540, %542, %cst_405 {dimension_numbers = #tpu.dot_dimension_numbers<[2], [0], [0, 1], [1], [0, 0, 0, 1, 1, 1], [], []>} : vector<2x1x32xf32>, vector<32x64xf32>, vector<2x1x64xf32> -> vector<2x1x64xf32>
    %544 = arith.addf %539, %543 : vector<2x1x64xf32>
    %545 = vector.extract_strided_slice %504 {offsets = [0, 7, 0], sizes = [2, 1, 32], strides = [1, 1, 1]} : vector<2x8x32xf32> to vector<2x1x32xf32>
    %c7 = arith.constant 7 : index
    %c0_406 = arith.constant 0 : index
    %c0_407 = arith.constant 0 : index
    %546 = vector.load %arg19[%c7, %c0_406, %c0_407] : memref<8x32x64xf32, #tpu.memory_space<vmem>>, vector<1x32x64xf32>
    %547 = vector.shape_cast %546 : vector<1x32x64xf32> to vector<32x64xf32>
    %cst_408 = arith.constant dense<0.000000e+00> : vector<2x1x64xf32>
    %548 = tpu.matmul %545, %547, %cst_408 {dimension_numbers = #tpu.dot_dimension_numbers<[2], [0], [0, 1], [1], [0, 0, 0, 1, 1, 1], [], []>} : vector<2x1x32xf32>, vector<32x64xf32>, vector<2x1x64xf32> -> vector<2x1x64xf32>
    %549 = arith.addf %544, %548 : vector<2x1x64xf32>
    %cst_409 = arith.constant 0.000000e+00 : f32
    %550 = vector.broadcast %cst_409 : f32 to vector<2x1x64xf32>
    %551 = arith.maximumf %549, %550 : vector<2x1x64xf32>
    %c0_410 = arith.constant 0 : index
    %c0_411 = arith.constant 0 : index
    %552 = vector.load %arg21[%c0_410, %c0_411] : memref<64x64xf32, #tpu.memory_space<vmem>>, vector<64x64xf32>
    %cst_412 = arith.constant dense<0.000000e+00> : vector<2x1x64xf32>
    %553 = tpu.matmul %551, %552, %cst_412 {dimension_numbers = #tpu.dot_dimension_numbers<[2], [0], [0, 1], [1], [0, 0, 0, 1, 1, 1], [], []>} : vector<2x1x64xf32>, vector<64x64xf32>, vector<2x1x64xf32> -> vector<2x1x64xf32>
    %c0_413 = arith.constant 0 : index
    %c0_414 = arith.constant 0 : index
    %554 = vector.load %arg22[%c0_413, %c0_414] : memref<1x64xf32, #tpu.memory_space<vmem>>, vector<1x64xf32>
    %555 = vector.shape_cast %554 : vector<1x64xf32> to vector<1x1x64xf32>
    %556 = vector.broadcast %555 : vector<1x1x64xf32> to vector<2x1x64xf32>
    %557 = arith.addf %553, %556 : vector<2x1x64xf32>
    %cst_415 = arith.constant 0.000000e+00 : f32
    %558 = vector.broadcast %cst_415 : f32 to vector<2x1x64xf32>
    %559 = arith.maximumf %557, %558 : vector<2x1x64xf32>
    %c0_416 = arith.constant 0 : index
    %c0_417 = arith.constant 0 : index
    %560 = vector.load %arg23[%c0_416, %c0_417] : memref<64x32xf32, #tpu.memory_space<vmem>>, vector<64x32xf32>
    %cst_418 = arith.constant dense<0.000000e+00> : vector<2x1x32xf32>
    %561 = tpu.matmul %559, %560, %cst_418 {dimension_numbers = #tpu.dot_dimension_numbers<[2], [0], [0, 1], [1], [0, 0, 0, 1, 1, 1], [], []>} : vector<2x1x64xf32>, vector<64x32xf32>, vector<2x1x32xf32> -> vector<2x1x32xf32>
    %c0_419 = arith.constant 0 : index
    %c0_420 = arith.constant 0 : index
    %562 = vector.load %arg24[%c0_419, %c0_420] : memref<1x32xf32, #tpu.memory_space<vmem>>, vector<1x32xf32>
    %563 = vector.shape_cast %562 : vector<1x32xf32> to vector<1x1x32xf32>
    %564 = vector.broadcast %563 : vector<1x1x32xf32> to vector<2x1x32xf32>
    %565 = arith.addf %561, %564 : vector<2x1x32xf32>
    %cst_421 = arith.constant 0.000000e+00 : f32
    %566 = vector.broadcast %cst_421 : f32 to vector<2x1x32xf32>
    %567 = arith.maximumf %565, %566 : vector<2x1x32xf32>
    %c0_422 = arith.constant 0 : index
    %c0_423 = arith.constant 0 : index
    %568 = vector.load %arg25[%c0_422, %c0_423] : memref<32x2xf32, #tpu.memory_space<vmem>>, vector<32x2xf32>
    %cst_424 = arith.constant dense<0.000000e+00> : vector<2x1x2xf32>
    %569 = tpu.matmul %567, %568, %cst_424 {dimension_numbers = #tpu.dot_dimension_numbers<[2], [0], [0, 1], [1], [0, 0, 0, 1, 1, 1], [], []>} : vector<2x1x32xf32>, vector<32x2xf32>, vector<2x1x2xf32> -> vector<2x1x2xf32>
    %c0_425 = arith.constant 0 : index
    %c0_426 = arith.constant 0 : index
    %570 = vector.load %arg26[%c0_425, %c0_426] : memref<1x2xf32, #tpu.memory_space<vmem>>, vector<1x2xf32>
    %571 = vector.shape_cast %570 : vector<1x2xf32> to vector<1x1x2xf32>
    %572 = vector.broadcast %571 : vector<1x1x2xf32> to vector<2x1x2xf32>
    %573 = arith.addf %569, %572 : vector<2x1x2xf32>
    %cst_427 = arith.constant dense<0xFF800000> : vector<2x1xf32>
    %574 = vector.multi_reduction <maximumf>, %573, %cst_427 [2] : vector<2x1x2xf32> to vector<2x1xf32>
    %575 = vector.shape_cast %574 : vector<2x1xf32> to vector<2x1x1xf32>
    %576 = vector.broadcast %575 : vector<2x1x1xf32> to vector<2x1x2xf32>
    %577 = arith.subf %573, %576 : vector<2x1x2xf32>
    %578 = math.exp %577 : vector<2x1x2xf32>
    %cst_428 = arith.constant dense<0.000000e+00> : vector<2x1xf32>
    %579 = vector.multi_reduction <add>, %578, %cst_428 [2] : vector<2x1x2xf32> to vector<2x1xf32>
    %580 = vector.shape_cast %579 : vector<2x1xf32> to vector<2x1x1xf32>
    %581 = vector.broadcast %580 : vector<2x1x1xf32> to vector<2x1x2xf32>
    %582 = arith.divf %578, %581 : vector<2x1x2xf32>
    %c0_429 = arith.constant 0 : index
    %c0_430 = arith.constant 0 : index
    %c0_431 = arith.constant 0 : index
    %583 = vector.load %arg27[%c0_429, %c0_430, %c0_431] : memref<2x1x2xf32, #tpu.memory_space<vmem>>, vector<2x1x2xf32>
    tpu.vector_store %arg27[%c0_429, %c0_430, %c0_431], %582 {strides = array<i32>} : memref<2x1x2xf32, #tpu.memory_space<vmem>>, vector<2x1x2xf32>,
    return
  }
  func.func @transform_0(%arg0: i32) -> (i32, i32, i32) {
    %c0_i32 = arith.constant 0 : i32
    %c0_i32_0 = arith.constant 0 : i32
    %c0_i32_1 = arith.constant 0 : i32
    return %arg0, %c0_i32, %c0_i32_0 : i32, i32, i32
  }
  func.func @transform_1(%arg0: i32) -> (i32, i32) {
    %c0_i32 = arith.constant 0 : i32
    %c0_i32_0 = arith.constant 0 : i32
    %c0_i32_1 = arith.constant 0 : i32
    return %c0_i32, %c0_i32_0 : i32, i32
  }
  func.func @transform_2(%arg0: i32) -> (i32, i32, i32, i32) {
    %c0_i32 = arith.constant 0 : i32
    %c0_i32_0 = arith.constant 0 : i32
    %c0_i32_1 = arith.constant 0 : i32
    %c0_i32_2 = arith.constant 0 : i32
    %c0_i32_3 = arith.constant 0 : i32
    return %c0_i32, %c0_i32_0, %c0_i32_1, %c0_i32_2 : i32, i32, i32, i32
  }
  func.func @transform_3(%arg0: i32) -> (i32, i32, i32, i32) {
    %c0_i32 = arith.constant 0 : i32
    %c0_i32_0 = arith.constant 0 : i32
    %c0_i32_1 = arith.constant 0 : i32
    %c0_i32_2 = arith.constant 0 : i32
    %c0_i32_3 = arith.constant 0 : i32
    return %c0_i32, %c0_i32_0, %c0_i32_1, %c0_i32_2 : i32, i32, i32, i32
  }
  func.func @transform_4(%arg0: i32) -> (i32, i32, i32, i32) {
    %c0_i32 = arith.constant 0 : i32
    %c0_i32_0 = arith.constant 0 : i32
    %c0_i32_1 = arith.constant 0 : i32
    %c0_i32_2 = arith.constant 0 : i32
    %c0_i32_3 = arith.constant 0 : i32
    return %c0_i32, %c0_i32_0, %c0_i32_1, %c0_i32_2 : i32, i32, i32, i32
  }
  func.func @transform_5(%arg0: i32) -> (i32, i32, i32, i32) {
    %c0_i32 = arith.constant 0 : i32
    %c0_i32_0 = arith.constant 0 : i32
    %c0_i32_1 = arith.constant 0 : i32
    %c0_i32_2 = arith.constant 0 : i32
    %c0_i32_3 = arith.constant 0 : i32
    return %c0_i32, %c0_i32_0, %c0_i32_1, %c0_i32_2 : i32, i32, i32, i32
  }
  func.func @transform_6(%arg0: i32) -> (i32, i32, i32, i32) {
    %c0_i32 = arith.constant 0 : i32
    %c0_i32_0 = arith.constant 0 : i32
    %c0_i32_1 = arith.constant 0 : i32
    %c0_i32_2 = arith.constant 0 : i32
    %c0_i32_3 = arith.constant 0 : i32
    return %c0_i32, %c0_i32_0, %c0_i32_1, %c0_i32_2 : i32, i32, i32, i32
  }
  func.func @transform_7(%arg0: i32) -> (i32, i32, i32, i32) {
    %c0_i32 = arith.constant 0 : i32
    %c0_i32_0 = arith.constant 0 : i32
    %c0_i32_1 = arith.constant 0 : i32
    %c0_i32_2 = arith.constant 0 : i32
    %c0_i32_3 = arith.constant 0 : i32
    return %c0_i32, %c0_i32_0, %c0_i32_1, %c0_i32_2 : i32, i32, i32, i32
  }
  func.func @transform_8(%arg0: i32) -> (i32, i32, i32, i32) {
    %c0_i32 = arith.constant 0 : i32
    %c0_i32_0 = arith.constant 0 : i32
    %c0_i32_1 = arith.constant 0 : i32
    %c0_i32_2 = arith.constant 0 : i32
    %c0_i32_3 = arith.constant 0 : i32
    return %c0_i32, %c0_i32_0, %c0_i32_1, %c0_i32_2 : i32, i32, i32, i32
  }
  func.func @transform_9(%arg0: i32) -> (i32, i32, i32) {
    %c0_i32 = arith.constant 0 : i32
    %c0_i32_0 = arith.constant 0 : i32
    %c0_i32_1 = arith.constant 0 : i32
    %c0_i32_2 = arith.constant 0 : i32
    return %c0_i32, %c0_i32_0, %c0_i32_1 : i32, i32, i32
  }
  func.func @transform_10(%arg0: i32) -> (i32, i32, i32) {
    %c0_i32 = arith.constant 0 : i32
    %c0_i32_0 = arith.constant 0 : i32
    %c0_i32_1 = arith.constant 0 : i32
    %c0_i32_2 = arith.constant 0 : i32
    return %c0_i32, %c0_i32_0, %c0_i32_1 : i32, i32, i32
  }
  func.func @transform_11(%arg0: i32) -> (i32, i32, i32) {
    %c0_i32 = arith.constant 0 : i32
    %c0_i32_0 = arith.constant 0 : i32
    %c0_i32_1 = arith.constant 0 : i32
    %c0_i32_2 = arith.constant 0 : i32
    return %c0_i32, %c0_i32_0, %c0_i32_1 : i32, i32, i32
  }
  func.func @transform_12(%arg0: i32) -> (i32, i32, i32) {
    %c0_i32 = arith.constant 0 : i32
    %c0_i32_0 = arith.constant 0 : i32
    %c0_i32_1 = arith.constant 0 : i32
    %c0_i32_2 = arith.constant 0 : i32
    return %c0_i32, %c0_i32_0, %c0_i32_1 : i32, i32, i32
  }
  func.func @transform_13(%arg0: i32) -> (i32, i32, i32) {
    %c0_i32 = arith.constant 0 : i32
    %c0_i32_0 = arith.constant 0 : i32
    %c0_i32_1 = arith.constant 0 : i32
    %c0_i32_2 = arith.constant 0 : i32
    return %c0_i32, %c0_i32_0, %c0_i32_1 : i32, i32, i32
  }
  func.func @transform_14(%arg0: i32) -> (i32, i32, i32) {
    %c0_i32 = arith.constant 0 : i32
    %c0_i32_0 = arith.constant 0 : i32
    %c0_i32_1 = arith.constant 0 : i32
    %c0_i32_2 = arith.constant 0 : i32
    return %c0_i32, %c0_i32_0, %c0_i32_1 : i32, i32, i32
  }
  func.func @transform_15(%arg0: i32) -> (i32, i32, i32) {
    %c0_i32 = arith.constant 0 : i32
    %c0_i32_0 = arith.constant 0 : i32
    %c0_i32_1 = arith.constant 0 : i32
    %c0_i32_2 = arith.constant 0 : i32
    return %c0_i32, %c0_i32_0, %c0_i32_1 : i32, i32, i32
  }
  func.func @transform_16(%arg0: i32) -> (i32, i32, i32) {
    %c0_i32 = arith.constant 0 : i32
    %c0_i32_0 = arith.constant 0 : i32
    %c0_i32_1 = arith.constant 0 : i32
    %c0_i32_2 = arith.constant 0 : i32
    return %c0_i32, %c0_i32_0, %c0_i32_1 : i32, i32, i32
  }
  func.func @transform_17(%arg0: i32) -> (i32, i32, i32) {
    %c0_i32 = arith.constant 0 : i32
    %c0_i32_0 = arith.constant 0 : i32
    %c0_i32_1 = arith.constant 0 : i32
    %c0_i32_2 = arith.constant 0 : i32
    return %c0_i32, %c0_i32_0, %c0_i32_1 : i32, i32, i32
  }
  func.func @transform_18(%arg0: i32) -> (i32, i32, i32) {
    %c0_i32 = arith.constant 0 : i32
    %c0_i32_0 = arith.constant 0 : i32
    %c0_i32_1 = arith.constant 0 : i32
    %c0_i32_2 = arith.constant 0 : i32
    return %c0_i32, %c0_i32_0, %c0_i32_1 : i32, i32, i32
  }
  func.func @transform_19(%arg0: i32) -> (i32, i32) {
    %c0_i32 = arith.constant 0 : i32
    %c0_i32_0 = arith.constant 0 : i32
    %c0_i32_1 = arith.constant 0 : i32
    return %c0_i32, %c0_i32_0 : i32, i32
  }
  func.func @transform_20(%arg0: i32) -> (i32, i32) {
    %c0_i32 = arith.constant 0 : i32
    %c0_i32_0 = arith.constant 0 : i32
    %c0_i32_1 = arith.constant 0 : i32
    return %c0_i32, %c0_i32_0 : i32, i32
  }
  func.func @transform_21(%arg0: i32) -> (i32, i32) {
    %c0_i32 = arith.constant 0 : i32
    %c0_i32_0 = arith.constant 0 : i32
    %c0_i32_1 = arith.constant 0 : i32
    return %c0_i32, %c0_i32_0 : i32, i32
  }
  func.func @transform_22(%arg0: i32) -> (i32, i32) {
    %c0_i32 = arith.constant 0 : i32
    %c0_i32_0 = arith.constant 0 : i32
    %c0_i32_1 = arith.constant 0 : i32
    return %c0_i32, %c0_i32_0 : i32, i32
  }
  func.func @transform_23(%arg0: i32) -> (i32, i32) {
    %c0_i32 = arith.constant 0 : i32
    %c0_i32_0 = arith.constant 0 : i32
    %c0_i32_1 = arith.constant 0 : i32
    return %c0_i32, %c0_i32_0 : i32, i32
  }
  func.func @transform_24(%arg0: i32) -> (i32, i32) {
    %c0_i32 = arith.constant 0 : i32
    %c0_i32_0 = arith.constant 0 : i32
    %c0_i32_1 = arith.constant 0 : i32
    return %c0_i32, %c0_i32_0 : i32, i32
  }
  func.func @transform_25(%arg0: i32) -> (i32, i32) {
    %c0_i32 = arith.constant 0 : i32
    %c0_i32_0 = arith.constant 0 : i32
    %c0_i32_1 = arith.constant 0 : i32
    return %c0_i32, %c0_i32_0 : i32, i32
  }
  func.func @transform_26(%arg0: i32) -> (i32, i32, i32) {
    %c0_i32 = arith.constant 0 : i32
    %c0_i32_0 = arith.constant 0 : i32
    %c0_i32_1 = arith.constant 0 : i32
    return %arg0, %c0_i32, %c0_i32_0 : i32, i32, i32
  }
}

</mosaic_0001>

<bundles_post_ra>
// kernel: dqtn_forward.1
= control target key start
LH: loop header
LB: loop body
LE: loop exit
PB: predicated region body
PF: predicated region fallthrough
CT: control target
= control target key end

     0   :  { %s10443_s0 = inlined_call_operand.vmem [shape: f32[2,8,32], index: 0, kind: input, shape index: {}]   ;;  %s10444_s1 = inlined_call_operand.vmem [shape: f32[8,32], index: 1, kind: input, shape index: {}]   ;;  %s10445_s2 = inlined_call_operand.vmem [shape: f32[2,4,32,8], index: 2, kind: input, shape index: {}]   ;;  %s10446_s3 = inlined_call_operand.vmem [shape: f32[2,4,1,8], index: 3, kind: input, shape index: {}]   ;;  %s10447_s4 = inlined_call_operand.vmem [shape: f32[2,4,32,8], index: 4, kind: input, shape index: {}]   ;;  %s10448_s5 = inlined_call_operand.vmem [shape: f32[2,4,1,8], index: 5, kind: input, shape index: {}]   ;;  %s10449_s6 = inlined_call_operand.vmem [shape: f32[2,4,32,8], index: 6, kind: input, shape index: {}]   ;;  %s10450_s7 = inlined_call_operand.vmem [shape: f32[2,4,1,8], index: 7, kind: input, shape index: {}]   ;;  %s10451_s8 = inlined_call_operand.vmem [shape: f32[2,4,8,32], index: 8, kind: input, shape index: {}]   ;;  %s10452_s9 = inlined_call_operand.vmem [shape: f32[2,1,32], index: 9, kind: input, shape index: {}]   ;;  %s10453_s10 = inlined_call_operand.vmem [shape: f32[2,1,32], index: 10, kind: input, shape index: {}]   ;;  %s10454_s11 = inlined_call_operand.vmem [shape: f32[2,1,32], index: 11, kind: input, shape index: {}]   ;;  %s10455_s12 = inlined_call_operand.vmem [shape: f32[2,32,64], index: 12, kind: input, shape index: {}]   ;;  %s10456_s13 = inlined_call_operand.vmem [shape: f32[2,1,64], index: 13, kind: input, shape index: {}]   ;;  %s10457_s14 = inlined_call_operand.vmem [shape: f32[2,64,32], index: 14, kind: input, shape index: {}]   ;;  %s10458_s15 = inlined_call_operand.vmem [shape: f32[2,1,32], index: 15, kind: input, shape index: {}]   ;;  %s10459_s16 = inlined_call_operand.vmem [shape: f32[2,1,32], index: 16, kind: input, shape index: {}]   ;;  %s10460_s17 = inlined_call_operand.vmem [shape: f32[2,1,32], index: 17, kind: input, shape index: {}]   ;;  %s10461_s18 = inlined_call_operand.vmem [shape: f32[8,32,64], index: 18, kind: input, shape index: {}]   ;;  %s10462_s19 = inlined_call_operand.vmem [shape: f32[1,64], index: 19, kind: input, shape index: {}]   ;;  %s10463_s20 = inlined_call_operand.vmem [shape: f32[64,64], index: 20, kind: input, shape index: {}]   ;;  %s10464_s21 = inlined_call_operand.vmem [shape: f32[1,64], index: 21, kind: input, shape index: {}]   ;;  %s10465_s22 = inlined_call_operand.vmem [shape: f32[64,32], index: 22, kind: input, shape index: {}]   ;;  %s10466_s23 = inlined_call_operand.vmem [shape: f32[1,32], index: 23, kind: input, shape index: {}]   ;;  %s10467_s24 = inlined_call_operand.vmem [shape: f32[32,2], index: 24, kind: input, shape index: {}]   ;;  %s10468_s25 = inlined_call_operand.vmem [shape: f32[1,2], index: 25, kind: input, shape index: {}]   ;;  %s10469_s26 = inlined_call_operand.hbm [shape: f32[2,1,2], index: 26, kind: output, shape index: {}]  }
   0x1   :  { %10481 = sst [smem:[#allocation5_spill]] %s10443_s0 }
   0x2   :  { %10482 = sst [smem:[#allocation6_spill]] %s10444_s1 }
   0x3   :  { %10483 = sst [smem:[#allocation7_spill]] %s10445_s2 }
   0x4   :  { %10484 = sst [smem:[#allocation8_spill]] %s10446_s3 }
   0x5   :  { %10485 = sst [smem:[#allocation9_spill]] %s10447_s4 }
   0x6   :  { %10486 = sst [smem:[#allocation10_spill]] %s10448_s5 }
   0x7   :  { %10487 = sst [smem:[#allocation11_spill]] %s10449_s6 }
   0x8   :  { %10488 = sst [smem:[#allocation12_spill]] %s10450_s7 }
   0x9   :  { %10489 = sst [smem:[#allocation13_spill]] %s10451_s8 }
   0xa   :  { %10490 = sst [smem:[#allocation14_spill]] %s10452_s9 }
   0xb   :  { %10491 = sst [smem:[#allocation15_spill]] %s10453_s10 }
   0xc   :  { %10492 = sst [smem:[#allocation16_spill]] %s10466_s23 }
   0xd   :  { %10493 = sst [smem:[#allocation17_spill]] %s10468_s25 }
   0xe   :  { %10494 = sst [smem:[#allocation18_spill]] %s10469_s26 }
   0xf   :  { %s10495_s7 = sld [smem:[#allocation9_spill]]  ;;  %s10496_s0 = sld [smem:[#allocation7_spill]]  ;;  %vm100_vm0 = vcmask 261120  }
  0x10   :  { %s10497_s29 = sld [smem:[#allocation5_spill]]  ;;  %s10498_s2 = sld [smem:[#allocation6_spill]] }
  0x15   :  { %v182_v0 = vld [vmem:[%s10495_s7] sm:$0xff]  ;;  %v183_v1 = vld [vmem:[%s10495_s7 + $0x8] sm:$0xff]  ;;  %v184_v5 = vld [vmem:[%s10495_s7 + $0x10] sm:$0xff] }
  0x16   :  { %v89_v2 = vld [vmem:[%s10496_s0] sm:$0xff]  ;;  %v8694_v3 = vpack.c.bf16 %v183_v1, %v182_v0  ;;  %v90_v4 = vld [vmem:[%s10496_s0 + $0x8] sm:$0xff]  ;;  %v185_v6 = vld [vmem:[%s10495_s7 + $0x18] sm:$0xff] }
  0x17   :  { %v8686_v7 = vpack.c.bf16 %v90_v4, %v89_v2  ;;  %v8698_v8 = vpack.c.bf16 %v185_v6, %v184_v5  ;;  %v91_v9 = vld [vmem:[%s10496_s0 + $0x10] sm:$0xff]  ;;  %v92_v10 = vld [vmem:[%s10496_s0 + $0x18] sm:$0xff]  ;;  %v84_v11 = vld [vmem:[%s10497_s29] sm:$0xff] }
  0x18   :  { %8695 = vmatprep.subr.bf16.mxu1 %v8694_v3  ;;  %v8690_v12 = vpack.c.bf16 %v92_v10, %v91_v9  ;;  %v86_v13 = vld [vmem:[%s10498_s2] sm:$0xff]  ;;  %v85_v14 = vld [vmem:[%s10497_s29 + $0x8] sm:$0xff] }
  0x19   :  { %8697 = vmatpush3.bf16.msra.mxu1 %v8694_v3  ;;  %8687 = vmatprep.subr.bf16.mxu0 %v8686_v7  ;;  %v9313_v15 = vadd.f32 %v86_v13, %v84_v11 }
  0x1a   :  { %31 = vsyncpa [#allocation3], 0  ;;  %8689 = vmatpush3.bf16.msra.mxu0 %v8686_v7  ;;  %8699 = vmatprep.subr.bf16.mxu1 %v8698_v8  ;;  %v9317_v16 = vadd.f32 %v86_v13, %v85_v14  ;;  %v9138_v17 = vmov 0.0   ;;  %vm9139_vm1 = vmmov 0   ;;  %s10499_s27 = sld [smem:[#allocation10_spill]]  ;;  %s10500_s8 = sld [smem:[#allocation8_spill]] }
  0x1b   :  { %8691 = vmatprep.subr.bf16.mxu0 %v8690_v12  ;;  %8044 = vmatprep.mubr.msk.f32.mxu1 %vm100_vm0, %v9313_v15  ;;  %vm354_vm2 = vcmask 64512   ;;  %s10501_s9 = sld [smem:[#allocation11_spill]]  ;;  %s10502_s4 = sld [smem:[#allocation12_spill]]  ;;  %v7385_v57 = vld [vmem:[%s10496_s0 + $0x20] sm:$0xff]  ;;  %v7386_v58 = vld [vmem:[%s10496_s0 + $0x28] sm:$0xff]  ;;  %v7387_v60 = vld [vmem:[%s10496_s0 + $0x30] sm:$0xff] }
  0x1c   :  { %8033 = vmatprep.mubr.msk.f32.mxu0 %vm100_vm0, %v9313_v15  ;;  %v8710_v59 = vpack.c.bf16 %v7386_v58, %v7385_v57  ;;  %v7388_v61 = vld [vmem:[%s10496_s0 + $0x38] sm:$0xff]  ;;  %v7393_v1 = vld [vmem:[%s10495_s7 + $0x20] sm:$0xff]  ;;  %v7394_v2 = vld [vmem:[%s10495_s7 + $0x28] sm:$0xff]  ;;  %s10503_s6 = sld [smem:[#allocation13_spill]]  ;;  %s10504_s25 = sld [smem:[#allocation14_spill]]  ;;  %vm2935_vm3 = vcmask 523264  }
  0x1d   :  { %8701 = vmatpush3.bf16.msra.mxu1 %v8698_v8  ;;  %v8714_v62 = vpack.c.bf16 %v7388_v61, %v7387_v60  ;;  %v8718_v5 = vpack.c.bf16 %v7394_v2, %v7393_v1  ;;  %v7395_v6 = vld [vmem:[%s10495_s7 + $0x30] sm:$0xff]  ;;  %v7396_v7 = vld [vmem:[%s10495_s7 + $0x38] sm:$0xff]  ;;  %v7420_v1 = vld [vmem:[%s10496_s0 + $0x40] sm:$0xff]  ;;  %s10505_s3 = sld [smem:[#allocation15_spill]]  ;;  %vm6058_vm4 = vcmask 1041409   ;;  %vm7329_vm5 = vcmask 8192  }
  0x1e   :  { %8693 = vmatpush3.bf16.msra.mxu0 %v8690_v12  ;;  %8058 = vmatprep.subr.mxu1 %v9138_v17  ;;  %v8722_v10 = vpack.c.bf16 %v7396_v7, %v7395_v6  ;;  %v7421_v2 = vld [vmem:[%s10496_s0 + $0x48] sm:$0xff] }
  0x20   :  { %8045 = vmatmul.mubr.msk.f32.vlgmr.msra.gmra.mrb[0].mxu1 %vm100_vm0, %v9317_v16  ;;  %v7373_v18 = vld [vmem:[%s10499_s27] ss:$0 sm:$0xff] }
  0x21   :  { %8034 = vmatmul.mubr.msk.f32.vlgmr.msra.gmra.mrb[0].mxu0 %vm100_vm0, %v9317_v16  ;;  %8060 = vmatprep.mubr.msk.f32.mxu1 %vm9139_vm1, %v9138_v17  ;;  %v7370_v20 = vld [vmem:[%s10500_s8] ss:$0 sm:$0xff]  ;;  %v269_v29 = vld [vmem:[%s10501_s9 + $0x8] sm:$0xff]  ;;  %v270_v30 = vld [vmem:[%s10501_s9 + $0x10] sm:$0xff] }
  0x22   :  { %8055 = vmatprep.mubr.msk.f32.mxu0 %vm100_vm0, %v9313_v15  ;;  %v268_v28 = vld [vmem:[%s10501_s9] sm:$0xff]  ;;  %v271_v32 = vld [vmem:[%s10501_s9 + $0x18] sm:$0xff] }
  0x23   :  { %v8702_v31 = vpack.c.bf16 %v269_v29, %v268_v28  ;;  %v8706_v33 = vpack.c.bf16 %v271_v32, %v270_v30  ;;  %v7376_v53 = vld [vmem:[%s10502_s4] ss:$0 sm:$0xff]  ;;  %v7402_v29 = vld [vmem:[%s10501_s9 + $0x28] sm:$0xff]  ;;  %v7403_v30 = vld [vmem:[%s10501_s9 + $0x30] sm:$0xff] }
  0x24   :  { %v7401_v28 = vld [vmem:[%s10501_s9 + $0x20] sm:$0xff]  ;;  %v7404_v32 = vld [vmem:[%s10501_s9 + $0x38] sm:$0xff] }
  0x25   :  { %8703 = vmatprep.subr.bf16.mxu0 %v8702_v31  ;;  %v7436_v7 = vld [vmem:[%s10501_s9 + $0x40] sm:$0xff] }
  0x26   :  { %8705 = vmatpush3.bf16.msra.mxu0 %v8702_v31  ;;  %v8726_v31 = vpack.c.bf16 %v7402_v29, %v7401_v28 }
  0x27   :  { %8707 = vmatprep.subr.bf16.mxu0 %v8706_v33 }
  0x2a   :  { %8709 = vmatpush3.bf16.msra.mxu0 %v8706_v33  ;;  %v8730_v33 = vpack.c.bf16 %v7404_v32, %v7403_v30 }
  0x2b   :  { %8711 = vmatprep.subr.bf16.mxu0 %v8710_v59 }
  0x2d   :  { %8056 = vmatmul.mubr.msk.f32.vlgmr.msra.gmra.mrb[2].mxu0 %vm100_vm0, %v9317_v16 }
  0x2e   :  { %8086 = vmatprep.mubr.msk.f32.mxu0 %vm100_vm0, %v9313_v15  ;;  %8713 = vmatpush3.bf16.msra.mxu0 %v8710_v59 }
  0x2f   :  { %8715 = vmatprep.subr.bf16.mxu0 %v8714_v62 }
  0x32   :  { %8717 = vmatpush3.bf16.msra.mxu0 %v8714_v62 }
  0x33   :  { %8727 = vmatprep.subr.bf16.mxu0 %v8726_v31 }
  0x35   :  { %8087 = vmatmul.mubr.msk.f32.vlgmr.msra.gmra.mrb[4].mxu0 %vm100_vm0, %v9317_v16 }
  0x36   :  { %8108 = vmatprep.mubr.msk.f32.mxu0 %vm100_vm0, %v9313_v15  ;;  %8729 = vmatpush3.bf16.msra.mxu0 %v8726_v31  ;;  %v7425_v31 = vld [vmem:[%s10500_s8 + $0x2] ss:$0 sm:$0xff] }
  0x37   :  { %8731 = vmatprep.subr.bf16.mxu0 %v8730_v33 }
  0x3a   :  { %8733 = vmatpush3.bf16.msra.mxu0 %v8730_v33  ;;  %v7441_v33 = vld [vmem:[%s10502_s4 + $0x2] ss:$0 sm:$0xff] }
  0x3b   :  { %8121 = vmatprep.subr.mxu0 %v9138_v17 }
  0x3d   :  { %8109 = vmatmul.mubr.msk.f32.vlgmr.msra.gmra.mrb[6].mxu0 %vm100_vm0, %v9317_v16 }
  0x3e   :  { %8123 = vmatprep.mubr.msk.f32.mxu0 %vm9139_vm1, %v9138_v17 }
  0xf3   :  { %v8046_v19 = vpop.f32.mrb[0].mxu1 }
  0xf4   :  { %v259_v21 = vpop.f32.mrb[1].mxu1  ;;  %v8035_v22 = vpop.f32.mrb[0].mxu0  ;;  %v265_v26 = vadd.f32 %v8046_v19, %v7373_v18 }
  0xf5   :  { %v260_v23 = vadd.f32 %v7373_v18, %v259_v21  ;;  %v173_v24 = vpop.f32.mrb[1].mxu0  ;;  %v179_v27 = vadd.f32 %v8035_v22, %v7370_v20  ;;  %v7390_v22 = vld [vmem:[%s10500_s8 + $0x1] ss:$0 sm:$0xff] }
  0xf6   :  { %v174_v25 = vadd.f32 %v7370_v20, %v173_v24  ;;  %v7398_v20 = vld [vmem:[%s10499_s27 + $0x1] ss:$0 sm:$0xff] }
  0xf7   :  { %8059 = vmatpush3.xpose.msk.msra.mxu1 %vm354_vm2, %v260_v23 }
  0xf8   :  { %8063 = vmatprep.subr.mxu1 %v9138_v17 }
  0xfa   :  { %8061 = vmatmul.mubr.msk.f32.vlgmr.msra.gmra.mrb[2].mxu1 %vm354_vm2, %v174_v25 }
  0xfb   :  { %8064 = vmatpush3.xpose.msk.msra.mxu1 %vm354_vm2, %v265_v26  ;;  %8065 = vmatprep.mubr.msk.f32.mxu1 %vm9139_vm1, %v9138_v17 }
  0xfc   :  { %8068 = vmatprep.subr.mxu1 %v9138_v17 }
  0xfe   :  { %8066 = vmatmul.mubr.msk.f32.vlgmr.msra.gmra.mrb[4].mxu1 %vm354_vm2, %v179_v27 }
  0xff   :  { %8070 = vmatprep.mubr.msk.f32.mxu1 %vm9139_vm1, %v9138_v17 }
 0x100   :  { %v8057_v52 = vpop.f32.mrb[2].mxu0 }
 0x101   :  { %v345_v54 = vpop.f32.mrb[3].mxu0  ;;  %v351_v55 = vadd.f32 %v8057_v52, %v7376_v53 }
 0x102   :  { %v346_v56 = vadd.f32 %v7376_v53, %v345_v54  ;;  %v7406_v53 = vld [vmem:[%s10502_s4 + $0x1] ss:$0 sm:$0xff] }
 0x104   :  { %8069 = vmatpush3.msra.mxu1 %v346_v56 }
 0x105   :  { %8073 = vmatprep.subr.mxu1 %v9138_v17 }
 0x108   :  { %v8088_v11 = vpop.f32.mrb[4].mxu0 }
 0x109   :  { %v757_v12 = vpop.f32.mrb[5].mxu0  ;;  %v763_v27 = vadd.f32 %v8088_v11, %v7390_v22  ;;  %v7439_v11 = vld [vmem:[%s10501_s9 + $0x58] sm:$0xff] }
 0x10a   :  { %v758_v25 = vadd.f32 %v7390_v22, %v757_v12 }
 0x110   :  { %v8110_v52 = vpop.f32.mrb[6].mxu0 }
 0x111   :  { %v933_v54 = vpop.f32.mrb[7].mxu0  ;;  %v939_v56 = vadd.f32 %v8110_v52, %v7406_v53 }
 0x1cd   :  { %v427_v34 = vpop.f32.mrb[2].mxu1 }
 0x1ce   :  { %v507_v35 = vmul.f32 0.35355338, %v427_v34  ;;  %v8062_v36 = vpop.f32.mrb[3].mxu1 }
 0x1d0   :  { %v509_v37 = vsel %vm354_vm2, %v507_v35, -inf }
 0x1d1   :  { %510 = vmax.xlane.f32.xlu0 %v509_v37  ;;  %v503_v38 = vpop.f32.mrb[4].mxu1 }
 0x1d2   :  { %v508_v39 = vmul.f32 0.35355338, %v503_v38  ;;  %v8067_v40 = vpop.f32.mrb[5].mxu1 }
 0x1d4   :  { %v512_v41 = vsel %vm354_vm2, %v508_v39, -inf }
 0x1d5   :  { %513 = vmax.xlane.f32.xlu0 %v512_v41 }
 0x25e   :  { %v511_v42 = vpop.xlane.xlu0 %510 }
 0x25f   :  { %v515_v43 = vsub.f32 %v507_v35, %v511_v42 }
 0x261   :  { %v517_v44 = vmul.f32 1.442695, %v515_v43 }
 0x262   :  { %v514_v45 = vpop.xlane.xlu0 %513 }
 0x263   :  { %9026 = vpow2.f32 %v517_v44  ;;  %v516_v46 = vsub.f32 %v508_v39, %v514_v45 }
 0x265   :  { %v519_v47 = vmul.f32 1.442695, %v516_v46 }
 0x267   :  { %9028 = vpow2.f32 %v519_v47 }
 0x26d   :  { %v9027_v48 = vpop.eup %9026 }
 0x26e   :  { %v521_v49 = vsel %vm354_vm2, %v9027_v48, 0.0 }
 0x26f   :  { %522 = vadd.xlane.f32.xlu1 %v521_v49 }
 0x271   :  { %v9029_v50 = vpop.eup %9028 }
 0x272   :  { %v524_v51 = vsel %vm354_vm2, %v9029_v50, 0.0 }
 0x273   :  { %525 = vadd.xlane.f32.xlu1 %v524_v51 }
 0x2fc   :  { %v523_v63 = vpop.xlane.xlu1 %522 }
 0x2fd   :  { %9030 = vrcp.f32 %v523_v63  ;;  %v7415_v63 = vld [vmem:[%s10503_s6 + $0x8] sm:$0xff] }
 0x300   :  { %v526_v0 = vpop.xlane.xlu1 %525 }
 0x301   :  { %9032 = vrcp.f32 %v526_v0  ;;  %v677_v0 = vld [vmem:[%s10503_s6] sm:$0xff] }
 0x307   :  { %v9031_v3 = vpop.eup %9030 }
 0x308   :  { %v529_v4 = vmul.f32 %v9031_v3, %v9027_v48  ;;  %v8734_v3 = vpack.c.bf16 %v7421_v2, %v7420_v1  ;;  %v7461_v2 = vld [vmem:[%s10495_s7 + $0x60] sm:$0xff] }
 0x30a   :  { %8071 = vmatmul.mubr.msk.f32.vlgmr.msra.gmra.mrb[6].mxu1 %vm354_vm2, %v529_v4  ;;  %v7422_v4 = vld [vmem:[%s10496_s0 + $0x50] sm:$0xff] }
 0x30b   :  { %v9033_v8 = vpop.eup %9032  ;;  %8074 = vmatpush3.msra.mxu1 %v351_v55  ;;  %8075 = vmatprep.mubr.msk.f32.mxu1 %vm9139_vm1, %v9138_v17  ;;  %v934_v55 = vadd.f32 %v7406_v53, %v933_v54 }
 0x30c   :  { %v530_v9 = vmul.f32 %v9033_v8, %v9029_v50  ;;  %8719 = vmatprep.subr.bf16.mxu1 %v8718_v5  ;;  %v7437_v8 = vld [vmem:[%s10501_s9 + $0x48] sm:$0xff] }
 0x30d   :  { %8122 = vmatpush3.msra.mxu0 %v934_v55 }
 0x30e   :  { %8076 = vmatmul.mubr.msk.f32.vlgmr.msra.gmra.mrb[8].mxu1 %vm354_vm2, %v530_v9  ;;  %8131 = vmatprep.subr.mxu0 %v7415_v63  ;;  %v7438_v9 = vld [vmem:[%s10501_s9 + $0x50] sm:$0xff] }
 0x30f   :  { %8721 = vmatpush3.bf16.msra.mxu1 %v8718_v5  ;;  %8097 = vmatprep.mubr.msk.f32.mxu1 %vm100_vm0, %v9313_v15  ;;  %v7423_v5 = vld [vmem:[%s10496_s0 + $0x58] sm:$0xff]  ;;  %v8754_v12 = vpack.c.bf16 %v7439_v11, %v7438_v9  ;;  %v7463_v11 = vld [vmem:[%s10495_s7 + $0x70] sm:$0xff] }
 0x310   :  { %8723 = vmatprep.subr.bf16.mxu1 %v8722_v10  ;;  %v8738_v6 = vpack.c.bf16 %v7423_v5, %v7422_v4  ;;  %v7453_v5 = vld [vmem:[%s10496_s0 + $0x60] sm:$0xff]  ;;  %v7456_v9 = vld [vmem:[%s10496_s0 + $0x78] sm:$0xff] }
 0x313   :  { %8725 = vmatpush3.bf16.msra.mxu1 %v8722_v10  ;;  %v8750_v10 = vpack.c.bf16 %v7437_v8, %v7436_v7  ;;  %v7455_v8 = vld [vmem:[%s10496_s0 + $0x70] sm:$0xff] }
 0x314   :  { %8111 = vmatprep.subr.mxu1 %v9138_v17 }
 0x316   :  { %8098 = vmatmul.mubr.msk.f32.vlgmr.msra.gmra.mrb[10].mxu1 %vm100_vm0, %v9317_v16 }
 0x317   :  { %8113 = vmatprep.mubr.msk.f32.mxu1 %vm9139_vm1, %v9138_v17 }
 0x3dd   :  { %v9409_v13 = vpop.f32.mrb[6].mxu1 }
 0x3de   :  { %v8072_v14 = vpop.f32.mrb[7].mxu1 }
 0x3e1   :  { %v9411_v18 = vpop.f32.mrb[8].mxu1 }
 0x3e2   :  { %v8077_v19 = vpop.f32.mrb[9].mxu1 }
 0x3e3   :  { %v7428_v19 = vld [vmem:[%s10495_s7 + $0x40] sm:$0xff] }
 0x3e9   :  { %v8099_v21 = vpop.f32.mrb[10].mxu1 }
 0x3ea   :  { %v845_v23 = vpop.f32.mrb[11].mxu1  ;;  %v851_v26 = vadd.f32 %v8099_v21, %v7398_v20 }
 0x3eb   :  { %v846_v24 = vadd.f32 %v7398_v20, %v845_v23  ;;  %v7429_v20 = vld [vmem:[%s10495_s7 + $0x48] sm:$0xff] }
 0x3ec   :  { %v8742_v22 = vpack.c.bf16 %v7429_v20, %v7428_v19 }
 0x3ed   :  { %8112 = vmatpush3.xpose.msk.msra.mxu1 %vm354_vm2, %v846_v24 }
 0x3ee   :  { %8116 = vmatprep.subr.mxu1 %v9138_v17 }
 0x3f0   :  { %8114 = vmatmul.mubr.msk.f32.vlgmr.msra.gmra.mrb[12].mxu1 %vm354_vm2, %v758_v25  ;;  %v7430_v25 = vld [vmem:[%s10495_s7 + $0x50] sm:$0xff] }
 0x3f1   :  { %8117 = vmatpush3.xpose.msk.msra.mxu1 %vm354_vm2, %v851_v26  ;;  %8118 = vmatprep.mubr.msk.f32.mxu1 %vm9139_vm1, %v9138_v17  ;;  %v7431_v26 = vld [vmem:[%s10495_s7 + $0x58] sm:$0xff] }
 0x3f2   :  { %8126 = vmatprep.subr.mxu1 %v9138_v17 }
 0x3f4   :  { %8119 = vmatmul.mubr.msk.f32.vlgmr.msra.gmra.mrb[14].mxu1 %vm354_vm2, %v763_v27  ;;  %v8746_v27 = vpack.c.bf16 %v7431_v26, %v7430_v25  ;;  %v7466_v25 = vld [vmem:[%s10499_s27 + $0x3] ss:$0 sm:$0xff] }
 0x3f5   :  { %8128 = vmatprep.mubr.msk.f32.mxu1 %vm9139_vm1, %v9138_v17  ;;  %8127 = vmatpush3.msra.mxu1 %v939_v56 }
 0x3f6   :  { %8735 = vmatprep.subr.bf16.mxu1 %v8734_v3 }
 0x4c3   :  { %v1014_v34 = vpop.f32.mrb[12].mxu1 }
 0x4c4   :  { %v1094_v35 = vmul.f32 0.35355338, %v1014_v34  ;;  %v8115_v36 = vpop.f32.mrb[13].mxu1 }
 0x4c6   :  { %v1096_v37 = vsel %vm354_vm2, %v1094_v35, -inf }
 0x4c7   :  { %1097 = vmax.xlane.f32.xlu0 %v1096_v37  ;;  %v1090_v38 = vpop.f32.mrb[14].mxu1 }
 0x4c8   :  { %v1095_v39 = vmul.f32 0.35355338, %v1090_v38  ;;  %v8120_v40 = vpop.f32.mrb[15].mxu1 }
 0x4ca   :  { %v1099_v41 = vsel %vm354_vm2, %v1095_v39, -inf }
 0x4cb   :  { %1100 = vmax.xlane.f32.xlu1 %v1099_v41 }
 0x554   :  { %v1098_v42 = vpop.xlane.xlu0 %1097 }
 0x555   :  { %v1102_v43 = vsub.f32 %v1094_v35, %v1098_v42 }
 0x557   :  { %v1104_v44 = vmul.f32 1.442695, %v1102_v43 }
 0x558   :  { %v1101_v45 = vpop.xlane.xlu1 %1100 }
 0x559   :  { %9034 = vpow2.f32 %v1104_v44  ;;  %v1103_v46 = vsub.f32 %v1095_v39, %v1101_v45 }
 0x55b   :  { %v1106_v47 = vmul.f32 1.442695, %v1103_v46 }
 0x55d   :  { %9036 = vpow2.f32 %v1106_v47 }
 0x563   :  { %v9035_v48 = vpop.eup %9034 }
 0x564   :  { %v1108_v49 = vsel %vm354_vm2, %v9035_v48, 0.0 }
 0x565   :  { %1109 = vadd.xlane.f32.xlu0 %v1108_v49 }
 0x567   :  { %v9037_v50 = vpop.eup %9036 }
 0x568   :  { %v1111_v51 = vsel %vm354_vm2, %v9037_v50, 0.0 }
 0x569   :  { %1112 = vadd.xlane.f32.xlu1 %v1111_v51 }
 0x5f2   :  { %v1110_v57 = vpop.xlane.xlu0 %1109 }
 0x5f3   :  { %9038 = vrcp.f32 %v1110_v57 }
 0x5f6   :  { %v1113_v58 = vpop.xlane.xlu1 %1112 }
 0x5f7   :  { %9040 = vrcp.f32 %v1113_v58 }
 0x5fd   :  { %v9039_v59 = vpop.eup %9038 }
 0x5fe   :  { %v1116_v60 = vmul.f32 %v9039_v59, %v9035_v48  ;;  %v7450_v59 = vld [vmem:[%s10503_s6 + $0x10] sm:$0xff] }
 0x600   :  { %8124 = vmatmul.mubr.msk.f32.vlgmr.msra.gmra.mrb[8].mxu0 %vm354_vm2, %v1116_v60 }
 0x601   :  { %v9041_v61 = vpop.eup %9040  ;;  %8132 = vmatpush3.msra.mxu0 %v7415_v63 }
 0x602   :  { %v1117_v62 = vmul.f32 %v9041_v61, %v9037_v50  ;;  %8136 = vmatprep.subr.mxu0 %v677_v0 }
 0x604   :  { %8129 = vmatmul.mubr.msk.f32.vlgmr.msra.gmra.mrb[16].mxu1 %vm354_vm2, %v1117_v62 }
 0x605   :  { %8149 = vmatprep.mubr.msk.f32.mxu1 %vm100_vm0, %v9313_v15  ;;  %8737 = vmatpush3.bf16.msra.mxu1 %v8734_v3  ;;  %v7462_v3 = vld [vmem:[%s10495_s7 + $0x68] sm:$0xff] }
 0x606   :  { %8739 = vmatprep.subr.bf16.mxu1 %v8738_v6  ;;  %v8766_v4 = vpack.c.bf16 %v7462_v3, %v7461_v2  ;;  %v7483_v2 = vld [vmem:[%s10503_s6 + $0x18] sm:$0xff] }
 0x609   :  { %8741 = vmatpush3.bf16.msra.mxu1 %v8738_v6  ;;  %v7454_v6 = vld [vmem:[%s10496_s0 + $0x68] sm:$0xff] }
 0x60a   :  { %8751 = vmatprep.subr.bf16.mxu1 %v8750_v10  ;;  %v8758_v7 = vpack.c.bf16 %v7454_v6, %v7453_v5 }
 0x60c   :  { %8150 = vmatmul.mubr.msk.f32.vlgmr.msra.gmra.mrb[18].mxu1 %vm100_vm0, %v9317_v16 }
 0x60d   :  { %8171 = vmatprep.mubr.msk.f32.mxu1 %vm100_vm0, %v9313_v15  ;;  %8753 = vmatpush3.bf16.msra.mxu1 %v8750_v10  ;;  %v8762_v10 = vpack.c.bf16 %v7456_v9, %v7455_v8 }
 0x60e   :  { %8755 = vmatprep.subr.bf16.mxu1 %v8754_v12 }
 0x611   :  { %8757 = vmatpush3.bf16.msra.mxu1 %v8754_v12  ;;  %v7464_v12 = vld [vmem:[%s10495_s7 + $0x78] sm:$0xff] }
 0x612   :  { %8179 = vmatprep.subr.mxu1 %v9138_v17 }
 0x614   :  { %8172 = vmatmul.mubr.msk.f32.vlgmr.msra.gmra.mrb[20].mxu1 %vm100_vm0, %v9317_v16 }
 0x615   :  { %8181 = vmatprep.mubr.msk.f32.mxu1 %vm9139_vm1, %v9138_v17 }
 0x6d3   :  { %v1187_v14 = vpop.f32.mrb[8].mxu0 }
 0x6d4   :  { %v8125_v21 = vpop.f32.mrb[9].mxu0  ;;  %8133 = vmatprep.mubr.msk.f32.mxu0 %vm354_vm2, %v1187_v14 }
 0x6d5   :  { %v8770_v21 = vpack.c.bf16 %v7464_v12, %v7463_v11 }
 0x6d7   :  { %v1260_v23 = vpop.f32.mrb[16].mxu1 }
 0x6d8   :  { %v8130_v24 = vpop.f32.mrb[17].mxu1  ;;  %8134 = vmatmul.mubr.msk.f32.vlgmr.msra.gmra.mrb[10].mxu0 %vm354_vm2, %v1260_v23 }
 0x6d9   :  { %8137 = vmatpush3.msra.mxu0 %v677_v0  ;;  %8138 = vmatprep.mubr.msk.f32.mxu0 %vm354_vm2, %v9409_v13 }
 0x6da   :  { %8743 = vmatprep.subr.bf16.mxu0 %v8742_v22 }
 0x6df   :  { %v8151_v13 = vpop.f32.mrb[18].mxu1 }
 0x6e0   :  { %8139 = vmatmul.mubr.msk.f32.vlgmr.msra.gmra.mrb[10].mxu0 %vm354_vm2, %v9411_v18  ;;  %v1507_v28 = vpop.f32.mrb[19].mxu1  ;;  %v7433_v18 = vld [vmem:[%s10499_s27 + $0x2] ss:$0 sm:$0xff]  ;;  %v1513_v37 = vadd.f32 %v8151_v13, %v7425_v31 }
 0x6e1   :  { %8745 = vmatpush3.bf16.msra.mxu0 %v8742_v22  ;;  %8160 = vmatprep.mubr.msk.f32.mxu0 %vm100_vm0, %v9313_v15  ;;  %v1508_v38 = vadd.f32 %v7425_v31, %v1507_v28  ;;  %v7469_v31 = vld [vmem:[%s10501_s9 + $0x60] sm:$0xff] }
 0x6e2   :  { %8747 = vmatprep.subr.bf16.mxu0 %v8746_v27 }
 0x6e5   :  { %8749 = vmatpush3.bf16.msra.mxu0 %v8746_v27  ;;  %v7458_v27 = vld [vmem:[%s10500_s8 + $0x3] ss:$0 sm:$0xff] }
 0x6e6   :  { %8174 = vmatprep.subr.mxu0 %v9138_v17 }
 0x6e7   :  { %v8173_v29 = vpop.f32.mrb[20].mxu1 }
 0x6e8   :  { %8161 = vmatmul.mubr.msk.f32.vlgmr.msra.gmra.mrb[12].mxu0 %vm100_vm0, %v9317_v16  ;;  %v1683_v30 = vpop.f32.mrb[21].mxu1  ;;  %v1689_v39 = vadd.f32 %v8173_v29, %v7441_v33 }
 0x6e9   :  { %8176 = vmatprep.mubr.msk.f32.mxu0 %vm9139_vm1, %v9138_v17  ;;  %v1684_v40 = vadd.f32 %v7441_v33, %v1683_v30  ;;  %v7471_v33 = vld [vmem:[%s10501_s9 + $0x70] sm:$0xff] }
 0x7bb   :  { %v8162_v32 = vpop.f32.mrb[12].mxu0 }
 0x7bc   :  { %v1601_v34 = vadd.f32 %v8162_v32, %v7433_v18  ;;  %v1595_v35 = vpop.f32.mrb[13].mxu0  ;;  %v7470_v32 = vld [vmem:[%s10501_s9 + $0x68] sm:$0xff] }
 0x7bd   :  { %v1596_v36 = vadd.f32 %v7433_v18, %v1595_v35  ;;  %v7472_v35 = vld [vmem:[%s10501_s9 + $0x78] sm:$0xff] }
 0x7be   :  { %8180 = vmatpush3.xpose.msk.msra.mxu1 %vm354_vm2, %v1601_v34  ;;  %v8774_v34 = vpack.c.bf16 %v7470_v32, %v7469_v31  ;;  %v2829_v31 = vld [vmem:[%s10455_s12 + $0x18] sm:$0xff] }
 0x7bf   :  { %8175 = vmatpush3.xpose.msk.msra.mxu0 %vm354_vm2, %v1596_v36  ;;  %8189 = vmatprep.subr.mxu1 %v9138_v17  ;;  %v8778_v36 = vpack.c.bf16 %v7472_v35, %v7471_v33  ;;  %v2920_v33 = vld [vmem:[%s10457_s14] sm:$0xff]  ;;  %v2922_v35 = vld [vmem:[%s10457_s14 + $0x10] sm:$0xff] }
 0x7c0   :  { %8184 = vmatprep.subr.mxu0 %v9138_v17 }
 0x7c1   :  { %8182 = vmatmul.mubr.msk.f32.vlgmr.msra.gmra.mrb[22].mxu1 %vm354_vm2, %v1513_v37 }
 0x7c2   :  { %8177 = vmatmul.mubr.msk.f32.vlgmr.msra.gmra.mrb[14].mxu0 %vm354_vm2, %v1508_v38  ;;  %8190 = vmatpush3.msra.mxu1 %v1689_v39 }
 0x7c3   :  { %8185 = vmatpush3.msra.mxu0 %v1684_v40  ;;  %8191 = vmatprep.mubr.msk.f32.mxu1 %vm9139_vm1, %v9138_v17 }
 0x7c4   :  { %8186 = vmatprep.mubr.msk.f32.mxu0 %vm9139_vm1, %v9138_v17  ;;  %8194 = vmatprep.subr.mxu0 %v7450_v59 }
 0x7c5   :  { %8759 = vmatprep.subr.bf16.mxu1 %v8758_v7 }
 0x894   :  { %v1840_v41 = vpop.f32.mrb[22].mxu1 }
 0x895   :  { %v1845_v42 = vmul.f32 0.35355338, %v1840_v41  ;;  %v1764_v43 = vpop.f32.mrb[14].mxu0  ;;  %v8183_v44 = vpop.f32.mrb[23].mxu1 }
 0x896   :  { %v1844_v45 = vmul.f32 0.35355338, %v1764_v43  ;;  %v8178_v46 = vpop.f32.mrb[15].mxu0 }
 0x897   :  { %v1849_v47 = vsel %vm354_vm2, %v1845_v42, -inf }
 0x898   :  { %1850 = vmax.xlane.f32.xlu1 %v1849_v47  ;;  %v1846_v48 = vsel %vm354_vm2, %v1844_v45, -inf }
 0x899   :  { %1847 = vmax.xlane.f32.xlu0 %v1846_v48 }
 0x925   :  { %v1851_v49 = vpop.xlane.xlu1 %1850 }
 0x926   :  { %v1853_v50 = vsub.f32 %v1845_v42, %v1851_v49  ;;  %v1848_v51 = vpop.xlane.xlu0 %1847 }
 0x927   :  { %v1852_v52 = vsub.f32 %v1844_v45, %v1848_v51 }
 0x928   :  { %v1856_v53 = vmul.f32 1.442695, %v1853_v50 }
 0x929   :  { %v1854_v54 = vmul.f32 1.442695, %v1852_v52 }
 0x92a   :  { %9042 = vpow2.f32 %v1856_v53 }
 0x92b   :  { %9044 = vpow2.f32 %v1854_v54 }
 0x934   :  { %v9043_v55 = vpop.eup %9042 }
 0x935   :  { %v9045_v56 = vpop.eup %9044  ;;  %v1861_v57 = vsel %vm354_vm2, %v9043_v55, 0.0 }
 0x936   :  { %1862 = vadd.xlane.f32.xlu1 %v1861_v57  ;;  %v1858_v58 = vsel %vm354_vm2, %v9045_v56, 0.0 }
 0x937   :  { %1859 = vadd.xlane.f32.xlu0 %v1858_v58 }
 0x9c3   :  { %v1863_v60 = vpop.xlane.xlu1 %1862 }
 0x9c4   :  { %9046 = vrcp.f32 %v1863_v60  ;;  %v1860_v61 = vpop.xlane.xlu0 %1859 }
 0x9c5   :  { %9048 = vrcp.f32 %v1860_v61 }
 0x9ce   :  { %v9047_v62 = vpop.eup %9046 }
 0x9cf   :  { %v9049_v63 = vpop.eup %9048  ;;  %v1867_v0 = vmul.f32 %v9047_v62, %v9043_v55 }
 0x9d0   :  { %v1866_v1 = vmul.f32 %v9049_v63, %v9045_v56  ;;  %v7474_v56 = vld [vmem:[%s10502_s4 + $0x3] ss:$0 sm:$0xff] }
 0x9d1   :  { %8192 = vmatmul.mubr.msk.f32.vlgmr.msra.gmra.mrb[24].mxu1 %vm354_vm2, %v1867_v0 }
 0x9d2   :  { %8187 = vmatmul.mubr.msk.f32.vlgmr.msra.gmra.mrb[16].mxu0 %vm354_vm2, %v1866_v1  ;;  %8207 = vmatprep.mubr.msk.f32.mxu1 %vm100_vm0, %v9313_v15 }
 0x9d3   :  { %8195 = vmatpush3.msra.mxu0 %v7450_v59  ;;  %8761 = vmatpush3.bf16.msra.mxu1 %v8758_v7  ;;  %v7486_v7 = vld [vmem:[%s10504_s25] ss:$0 sm:$0xff] }
 0x9d4   :  { %8767 = vmatprep.subr.bf16.mxu0 %v8766_v4  ;;  %8763 = vmatprep.subr.bf16.mxu1 %v8762_v10 }
 0x9d7   :  { %8765 = vmatpush3.bf16.msra.mxu1 %v8762_v10 }
 0x9d8   :  { %8775 = vmatprep.subr.bf16.mxu1 %v8774_v34 }
 0x9da   :  { %8208 = vmatmul.mubr.msk.f32.vlgmr.msra.gmra.mrb[26].mxu1 %vm100_vm0, %v9317_v16 }
 0x9db   :  { %8229 = vmatprep.mubr.msk.f32.mxu1 %vm100_vm0, %v9313_v15  ;;  %8777 = vmatpush3.bf16.msra.mxu1 %v8774_v34  ;;  %v2921_v34 = vld [vmem:[%s10457_s14 + $0x8] sm:$0xff] }
 0x9dc   :  { %8779 = vmatprep.subr.bf16.mxu1 %v8778_v36 }
 0x9df   :  { %8781 = vmatpush3.bf16.msra.mxu1 %v8778_v36  ;;  %v8790_v36 = vpack.c.bf16 %v2921_v34, %v2920_v33  ;;  %v7515_v33 = vld [vmem:[%s10501_s9 + $0x90] sm:$0xff]  ;;  %v7516_v34 = vld [vmem:[%s10501_s9 + $0x98] sm:$0xff] }
 0x9e0   :  { %8242 = vmatprep.subr.mxu1 %v9138_v17 }
 0x9e2   :  { %8230 = vmatmul.mubr.msk.f32.vlgmr.msra.gmra.mrb[28].mxu1 %vm100_vm0, %v9317_v16 }
 0x9e3   :  { %8244 = vmatprep.mubr.msk.f32.mxu1 %vm9139_vm1, %v9138_v17 }
 0xaa4   :  { %v2010_v14 = vpop.f32.mrb[24].mxu1 }
 0xaa5   :  { %v1937_v19 = vpop.f32.mrb[16].mxu0  ;;  %v8193_v20 = vpop.f32.mrb[25].mxu1 }
 0xaa6   :  { %v8188_v22 = vpop.f32.mrb[17].mxu0  ;;  %8196 = vmatprep.mubr.msk.f32.mxu0 %vm354_vm2, %v1937_v19 }
 0xaa7   :  { %8197 = vmatmul.mubr.msk.f32.vlgmr.msra.gmra.mrb[10].mxu0 %vm354_vm2, %v2010_v14 }
 0xaa8   :  { %8769 = vmatpush3.bf16.msra.mxu0 %v8766_v4  ;;  %8218 = vmatprep.mubr.msk.f32.mxu0 %vm100_vm0, %v9313_v15 }
 0xaa9   :  { %8771 = vmatprep.subr.bf16.mxu0 %v8770_v21 }
 0xaac   :  { %8773 = vmatpush3.bf16.msra.mxu0 %v8770_v21 }
 0xaad   :  { %8232 = vmatprep.subr.mxu0 %v9138_v17  ;;  %v8209_v23 = vpop.f32.mrb[26].mxu1 }
 0xaae   :  { %v2178_v24 = vpop.f32.mrb[27].mxu1  ;;  %v2184_v18 = vadd.f32 %v8209_v23, %v7458_v27 }
 0xaaf   :  { %8219 = vmatmul.mubr.msk.f32.vlgmr.msra.gmra.mrb[18].mxu0 %vm100_vm0, %v9317_v16  ;;  %v2179_v29 = vadd.f32 %v7458_v27, %v2178_v24 }
 0xab0   :  { %8234 = vmatprep.mubr.msk.f32.mxu0 %vm9139_vm1, %v9138_v17 }
 0xab5   :  { %v8231_v55 = vpop.f32.mrb[28].mxu1 }
 0xab6   :  { %v2354_v57 = vpop.f32.mrb[29].mxu1  ;;  %v2360_v59 = vadd.f32 %v8231_v55, %v7474_v56 }
 0xab7   :  { %v2355_v58 = vadd.f32 %v7474_v56, %v2354_v57 }
 0xab9   :  { %8243 = vmatpush3.msra.mxu1 %v2355_v58  ;;  %v2926_v58 = vld [vmem:[%s10457_s14 + $0x30] sm:$0xff] }
 0xb82   :  { %v8220_v26 = vpop.f32.mrb[18].mxu0 }
 0xb83   :  { %v2266_v13 = vpop.f32.mrb[19].mxu0  ;;  %v2272_v30 = vadd.f32 %v8220_v26, %v7466_v25 }
 0xb84   :  { %v2267_v28 = vadd.f32 %v7466_v25, %v2266_v13 }
 0xb86   :  { %8233 = vmatpush3.xpose.msk.msra.mxu0 %vm354_vm2, %v2267_v28 }
 0xb87   :  { %8237 = vmatprep.subr.mxu0 %v9138_v17 }
 0xb89   :  { %8235 = vmatmul.mubr.msk.f32.vlgmr.msra.gmra.mrb[20].mxu0 %vm354_vm2, %v2179_v29  ;;  %v2827_v29 = vld [vmem:[%s10455_s12 + $0x8] sm:$0xff] }
 0xb8a   :  { %8238 = vmatpush3.xpose.msk.msra.mxu0 %vm354_vm2, %v2272_v30  ;;  %8239 = vmatprep.mubr.msk.f32.mxu0 %vm9139_vm1, %v9138_v17 }
 0xb8b   :  { %8247 = vmatprep.subr.mxu0 %v9138_v17 }
 0xb8d   :  { %8240 = vmatmul.mubr.msk.f32.vlgmr.msra.gmra.mrb[22].mxu0 %vm354_vm2, %v2184_v18  ;;  %v2828_v18 = vld [vmem:[%s10455_s12 + $0x10] sm:$0xff] }
 0xb8e   :  { %8249 = vmatprep.mubr.msk.f32.mxu0 %vm9139_vm1, %v9138_v17  ;;  %8248 = vmatpush3.msra.mxu0 %v2360_v59  ;;  %v8786_v32 = vpack.c.bf16 %v2829_v31, %v2828_v18  ;;  %v2927_v59 = vld [vmem:[%s10457_s14 + $0x38] sm:$0xff]  ;;  %v7499_v18 = vld [vmem:[%s10496_s0 + $0x90] sm:$0xff] }
 0xb8f   :  { %8252 = vmatprep.subr.mxu0 %v7483_v2  ;;  %v7500_v31 = vld [vmem:[%s10496_s0 + $0x98] sm:$0xff] }
 0xc5c   :  { %v2435_v37 = vpop.f32.mrb[20].mxu0 }
 0xc5d   :  { %v2515_v38 = vmul.f32 0.35355338, %v2435_v37  ;;  %v8236_v39 = vpop.f32.mrb[21].mxu0  ;;  %v2923_v37 = vld [vmem:[%s10457_s14 + $0x18] sm:$0xff] }
 0xc5e   :  { %v2924_v39 = vld [vmem:[%s10457_s14 + $0x20] sm:$0xff] }
 0xc5f   :  { %v2517_v40 = vsel %vm354_vm2, %v2515_v38, -inf }
 0xc60   :  { %2518 = vmax.xlane.f32.xlu0 %v2517_v40  ;;  %v2511_v41 = vpop.f32.mrb[22].mxu0  ;;  %v2925_v40 = vld [vmem:[%s10457_s14 + $0x28] sm:$0xff] }
 0xc61   :  { %v2516_v42 = vmul.f32 0.35355338, %v2511_v41  ;;  %v8241_v43 = vpop.f32.mrb[23].mxu0  ;;  %v8798_v41 = vpack.c.bf16 %v2925_v40, %v2924_v39 }
 0xc63   :  { %v2520_v44 = vsel %vm354_vm2, %v2516_v42, -inf }
 0xc64   :  { %2521 = vmax.xlane.f32.xlu1 %v2520_v44 }
 0xced   :  { %v2519_v45 = vpop.xlane.xlu0 %2518 }
 0xcee   :  { %v2523_v46 = vsub.f32 %v2515_v38, %v2519_v45  ;;  %v8794_v38 = vpack.c.bf16 %v2923_v37, %v2922_v35  ;;  %v8826_v35 = vpack.c.bf16 %v7516_v34, %v7515_v33  ;;  %v7506_v37 = vld [vmem:[%s10495_s7 + $0x88] sm:$0xff] }
 0xcf0   :  { %v2525_v47 = vmul.f32 1.442695, %v2523_v46 }
 0xcf1   :  { %v2522_v48 = vpop.xlane.xlu1 %2521 }
 0xcf2   :  { %9050 = vpow2.f32 %v2525_v47  ;;  %v2524_v49 = vsub.f32 %v2516_v42, %v2522_v48 }
 0xcf4   :  { %v2527_v50 = vmul.f32 1.442695, %v2524_v49  ;;  %v7487_v49 = vld [vmem:[%s10505_s3] ss:$0 sm:$0xff] }
 0xcf6   :  { %9052 = vpow2.f32 %v2527_v50 }
 0xcfc   :  { %v9051_v51 = vpop.eup %9050 }
 0xcfd   :  { %v2529_v52 = vsel %vm354_vm2, %v9051_v51, 0.0 }
 0xcfe   :  { %2530 = vadd.xlane.f32.xlu0 %v2529_v52 }
 0xd00   :  { %v9053_v53 = vpop.eup %9052 }
 0xd01   :  { %v2532_v54 = vsel %vm354_vm2, %v9053_v53, 0.0 }
 0xd02   :  { %2533 = vadd.xlane.f32.xlu1 %v2532_v54 }
 0xd8b   :  { %v2531_v60 = vpop.xlane.xlu0 %2530 }
 0xd8c   :  { %9054 = vrcp.f32 %v2531_v60  ;;  %v8802_v60 = vpack.c.bf16 %v2927_v59, %v2926_v58  ;;  %v7518_v58 = vld [vmem:[%s10502_s4 + $0x4] ss:$0 sm:$0xff] }
 0xd8f   :  { %v2534_v61 = vpop.xlane.xlu1 %2533 }
 0xd90   :  { %9056 = vrcp.f32 %v2534_v61  ;;  %v7489_v61 = vld [vmem:[%s10456_s13] ss:$0 sm:$0xff] }
 0xd96   :  { %v9055_v62 = vpop.eup %9054 }
 0xd97   :  { %v2537_v63 = vmul.f32 %v9055_v62, %v9051_v51 }
 0xd99   :  { %8245 = vmatmul.mubr.msk.f32.vlgmr.msra.gmra.mrb[30].mxu1 %vm354_vm2, %v2537_v63 }
 0xd9a   :  { %v9057_v0 = vpop.eup %9056 }
 0xd9b   :  { %v2538_v1 = vmul.f32 %v9057_v0, %v9053_v53  ;;  %v7488_v53 = vld [vmem:[%s10454_s11] ss:$0 sm:$0xff] }
 0xd9d   :  { %8250 = vmatmul.mubr.msk.f32.vlgmr.msra.gmra.mrb[24].mxu0 %vm354_vm2, %v2538_v1 }
 0xd9e   :  { %8253 = vmatpush3.msra.mxu0 %v7483_v2 }
 0xd9f   :  { %8791 = vmatprep.subr.bf16.mxu0 %v8790_v36 }
 0xe6c   :  { %v2608_v3 = vpop.f32.mrb[30].mxu1 }
 0xe6d   :  { %v8246_v4 = vpop.f32.mrb[31].mxu1  ;;  %8254 = vmatprep.mubr.msk.f32.mxu0 %vm354_vm2, %v2608_v3 }
 0xe6e   :  { %v7492_v4 = vld [vmem:[%s10458_s15] ss:$0 sm:$0xff] }
 0xe70   :  { %v2681_v5 = vpop.f32.mrb[24].mxu0 }
 0xe71   :  { %v8251_v6 = vpop.f32.mrb[25].mxu0  ;;  %8255 = vmatmul.mubr.msk.f32.vlgmr.msra.gmra.mrb[10].mxu0 %vm354_vm2, %v2681_v5 }
 0xe72   :  { %8793 = vmatpush3.bf16.msra.mxu0 %v8790_v36  ;;  %v7505_v36 = vld [vmem:[%s10495_s7 + $0x80] sm:$0xff] }
 0xe73   :  { %8795 = vmatprep.subr.bf16.mxu0 %v8794_v38 }
 0xe76   :  { %8797 = vmatpush3.bf16.msra.mxu0 %v8794_v38  ;;  %v8814_v38 = vpack.c.bf16 %v7506_v37, %v7505_v36  ;;  %v7530_v36 = vld [vmem:[%s10496_s0 + $0xb0] sm:$0xff]  ;;  %v7531_v37 = vld [vmem:[%s10496_s0 + $0xb8] sm:$0xff] }
 0xe77   :  { %8799 = vmatprep.subr.bf16.mxu0 %v8798_v41 }
 0xe7a   :  { %8801 = vmatpush3.bf16.msra.mxu0 %v8798_v41 }
 0xe7b   :  { %8803 = vmatprep.subr.bf16.mxu0 %v8802_v60 }
 0xe7e   :  { %8805 = vmatpush3.bf16.msra.mxu0 %v8802_v60 }
 0xf44   :  { %v8256_v8 = vpop.f32.mrb[10].mxu0 }
 0xf45   :  { %v2778_v9 = vadd.f32 %v8256_v8, %v7486_v7  ;;  %v2759_v10 = vpop.f32.mrb[11].mxu0 }
 0xf46   :  { %v2777_v11 = vadd.f32 %v7486_v7, %v2759_v10 }
 0xf47   :  { %v2780_v12 = vadd.f32 %v2778_v9, %v9317_v16 }
 0xf48   :  { %v2779_v14 = vadd.f32 %v2777_v11, %v9313_v15  ;;  %v2826_v15 = vld [vmem:[%s10455_s12] sm:$0xff] }
 0xf49   :  { %v2786_v19 = vsel %vm100_vm0, %v2780_v12, 0.0  ;;  %v8782_v30 = vpack.c.bf16 %v2827_v29, %v2826_v15  ;;  %v7513_v15 = vld [vmem:[%s10501_s9 + $0x80] sm:$0xff]  ;;  %v7514_v29 = vld [vmem:[%s10501_s9 + $0x88] sm:$0xff] }
 0xf4a   :  { %2787 = vadd.xlane.f32.xlu1 %v2786_v19  ;;  %v2783_v20 = vsel %vm100_vm0, %v2779_v14, 0.0 }
 0xf4b   :  { %2784 = vadd.xlane.f32.xlu0 %v2783_v20  ;;  %8783 = vmatprep.subr.bf16.mxu1 %v8782_v30 }
 0xf4c   :  { %8785 = vmatpush3.bf16.msra.mxu1 %v8782_v30  ;;  %v8822_v30 = vpack.c.bf16 %v7514_v29, %v7513_v15  ;;  %v7528_v29 = vld [vmem:[%s10496_s0 + $0xa0] sm:$0xff] }
 0xf4d   :  { %8787 = vmatprep.subr.bf16.mxu1 %v8786_v32 }
 0xf4e   :  { %8823 = vmatprep.subr.bf16.mxu0 %v8822_v30 }
 0xf50   :  { %8789 = vmatpush3.bf16.msra.mxu1 %v8786_v32  ;;  %v8810_v32 = vpack.c.bf16 %v7500_v31, %v7499_v18  ;;  %v7536_v31 = vld [vmem:[%s10495_s7 + $0xa0] sm:$0xff] }
 0xfd7   :  { %v2788_v21 = vpop.xlane.xlu1 %2787 }
 0xfd8   :  { %v2791_v22 = vmul.f32 0.03125, %v2788_v21  ;;  %v2785_v23 = vpop.xlane.xlu0 %2784 }
 0xfd9   :  { %v2790_v24 = vmul.f32 0.03125, %v2785_v23 }
 0xfda   :  { %v2793_v25 = vsub.f32 %v2780_v12, %v2791_v22 }
 0xfdb   :  { %v2792_v26 = vsub.f32 %v2779_v14, %v2790_v24 }
 0xfdc   :  { %v2795_v27 = vmul.f32 %v2793_v25, %v2793_v25 }
 0xfdd   :  { %v2794_v13 = vmul.f32 %v2792_v26, %v2792_v26 }
 0xfde   :  { %v2799_v28 = vsel %vm100_vm0, %v2795_v27, 0.0 }
 0xfdf   :  { %2800 = vadd.xlane.f32.xlu1 %v2799_v28  ;;  %v2796_v16 = vsel %vm100_vm0, %v2794_v13, 0.0  ;;  %v7497_v13 = vld [vmem:[%s10496_s0 + $0x80] sm:$0xff]  ;;  %v7498_v28 = vld [vmem:[%s10496_s0 + $0x88] sm:$0xff] }
 0xfe0   :  { %2797 = vadd.xlane.f32.xlu0 %v2796_v16  ;;  %v8806_v16 = vpack.c.bf16 %v7498_v28, %v7497_v13 }
 0xfe2   :  { %8807 = vmatprep.subr.bf16.mxu1 %v8806_v16 }
0x106c   :  { %v2801_v42 = vpop.xlane.xlu1 %2800 }
0x106d   :  { %v2803_v43 = vmul.f32 0.03125, %v2801_v42  ;;  %v2798_v44 = vpop.xlane.xlu0 %2797 }
0x106e   :  { %v2802_v45 = vmul.f32 0.03125, %v2798_v44 }
0x106f   :  { %v2805_v46 = vadd.f32 1e-05, %v2803_v43 }
0x1070   :  { %v2804_v47 = vadd.f32 1e-05, %v2802_v45 }
0x1071   :  { %9058 = vrsqrt.f32 %v2805_v46  ;;  %v7495_v46 = vld [vmem:[%s10459_s16] ss:$0 sm:$0xff] }
0x1072   :  { %9060 = vrsqrt.f32 %v2804_v47 }
0x107b   :  { %v9059_v48 = vpop.eup %9058 }
0x107c   :  { %v9061_v50 = vpop.eup %9060  ;;  %v2809_v51 = vmul.f32 %v9059_v48, %v2793_v25 }
0x107d   :  { %v2808_v52 = vmul.f32 %v9061_v50, %v2792_v26  ;;  %v7496_v50 = vld [vmem:[%s10460_s17] ss:$0 sm:$0xff] }
0x107e   :  { %v2817_v54 = vmul.f32 %v7487_v49, %v2809_v51 }
0x107f   :  { %v2816_v55 = vmul.f32 %v7487_v49, %v2808_v52 }
0x1080   :  { %v2825_v57 = vadd.f32 %v7488_v53, %v2817_v54  ;;  %v7508_v54 = vld [vmem:[%s10495_s7 + $0x98] sm:$0xff] }
0x1081   :  { %v2824_v56 = vadd.f32 %v7488_v53, %v2816_v55  ;;  %v7507_v53 = vld [vmem:[%s10495_s7 + $0x90] sm:$0xff] }
0x1083   :  { %8265 = vmatprep.mubr.msk.f32.mxu1 %vm100_vm0, %v2824_v56 }
0x1084   :  { %8266 = vmatmul.mubr.msk.f32.vlgmr.msra.gmra.mrb[32].mxu1 %vm100_vm0, %v2825_v57 }
0x1085   :  { %8809 = vmatpush3.bf16.msra.mxu1 %v8806_v16 }
0x1086   :  { %8811 = vmatprep.subr.bf16.mxu1 %v8810_v32 }
0x1089   :  { %8813 = vmatpush3.bf16.msra.mxu1 %v8810_v32  ;;  %v7537_v32 = vld [vmem:[%s10495_s7 + $0xa8] sm:$0xff] }
0x108a   :  { %8815 = vmatprep.subr.bf16.mxu1 %v8814_v38  ;;  %v8838_v33 = vpack.c.bf16 %v7537_v32, %v7536_v31 }
0x1157   :  { %v8267_v62 = vpop.f32.mrb[32].mxu1 }
0x1158   :  { %v2915_v63 = vadd.f32 %v8267_v62, %v7489_v61  ;;  %v2909_v0 = vpop.f32.mrb[33].mxu1 }
0x1159   :  { %v2910_v1 = vadd.f32 %v7489_v61, %v2909_v0  ;;  %v7510_v0 = vld [vmem:[%s10499_s27 + $0x4] ss:$0 sm:$0xff] }
0x115a   :  { %v2919_v3 = vmax.f32 %v2915_v63, 0.0 }
0x115b   :  { %v2918_v2 = vmax.f32 %v2910_v1, 0.0 }
0x115d   :  { %8284 = vmatprep.mubr.msk.f32.mxu0 %vm2935_vm3, %v2918_v2 }
0x115e   :  { %8285 = vmatmul.mubr.msk.f32.vlgmr.msra.gmra.mrb[26].mxu0 %vm2935_vm3, %v2919_v3  ;;  %v7502_v3 = vld [vmem:[%s10500_s8 + $0x4] ss:$0 sm:$0xff] }
0x115f   :  { %8825 = vmatpush3.bf16.msra.mxu0 %v8822_v30  ;;  %v7529_v30 = vld [vmem:[%s10496_s0 + $0xa8] sm:$0xff] }
0x1160   :  { %8827 = vmatprep.subr.bf16.mxu0 %v8826_v35  ;;  %v8830_v18 = vpack.c.bf16 %v7529_v30, %v7528_v29  ;;  %v7563_v29 = vld [vmem:[%s10496_s0 + $0xc0] sm:$0xff]  ;;  %v7564_v30 = vld [vmem:[%s10496_s0 + $0xc8] sm:$0xff] }
0x1163   :  { %8829 = vmatpush3.bf16.msra.mxu0 %v8826_v35 }
0x1164   :  { %8330 = vmatprep.subr.mxu0 %v9138_v17 }
0x1231   :  { %v8286_v5 = vpop.f32.mrb[26].mxu0 }
0x1232   :  { %v3014_v6 = vadd.f32 %v8286_v5, %v7492_v4  ;;  %v3008_v7 = vpop.f32.mrb[27].mxu0 }
0x1233   :  { %v3009_v8 = vadd.f32 %v7492_v4, %v3008_v7 }
0x1234   :  { %v3018_v9 = vadd.f32 %v3014_v6, %v2825_v57  ;;  %v8818_v57 = vpack.c.bf16 %v7508_v54, %v7507_v53 }
0x1235   :  { %v3017_v10 = vadd.f32 %v3009_v8, %v2824_v56 }
0x1236   :  { %v3024_v11 = vsel %vm100_vm0, %v3018_v9, 0.0 }
0x1237   :  { %3025 = vadd.xlane.f32.xlu1 %v3024_v11  ;;  %v3021_v12 = vsel %vm100_vm0, %v3017_v10, 0.0 }
0x1238   :  { %3022 = vadd.xlane.f32.xlu0 %v3021_v12 }
0x12c4   :  { %v3026_v14 = vpop.xlane.xlu1 %3025 }
0x12c5   :  { %v3028_v19 = vmul.f32 0.03125, %v3026_v14  ;;  %v3023_v20 = vpop.xlane.xlu0 %3022 }
0x12c6   :  { %v3027_v21 = vmul.f32 0.03125, %v3023_v20 }
0x12c7   :  { %v3030_v22 = vsub.f32 %v3018_v9, %v3028_v19 }
0x12c8   :  { %v3029_v23 = vsub.f32 %v3017_v10, %v3027_v21 }
0x12c9   :  { %v3032_v24 = vmul.f32 %v3030_v22, %v3030_v22 }
0x12ca   :  { %v3031_v25 = vmul.f32 %v3029_v23, %v3029_v23 }
0x12cb   :  { %v3036_v26 = vsel %vm100_vm0, %v3032_v24, 0.0 }
0x12cc   :  { %3037 = vadd.xlane.f32.xlu1 %v3036_v26  ;;  %v3033_v27 = vsel %vm100_vm0, %v3031_v25, 0.0 }
0x12cd   :  { %3034 = vadd.xlane.f32.xlu0 %v3033_v27 }
0x1359   :  { %v3038_v39 = vpop.xlane.xlu1 %3037 }
0x135a   :  { %v3040_v40 = vmul.f32 0.03125, %v3038_v39  ;;  %v3035_v41 = vpop.xlane.xlu0 %3034 }
0x135b   :  { %v3039_v42 = vmul.f32 0.03125, %v3035_v41  ;;  %v7538_v41 = vld [vmem:[%s10495_s7 + $0xb0] sm:$0xff] }
0x135c   :  { %v3042_v43 = vadd.f32 1e-05, %v3040_v40  ;;  %v8834_v40 = vpack.c.bf16 %v7531_v37, %v7530_v36  ;;  %v7566_v36 = vld [vmem:[%s10496_s0 + $0xd8] sm:$0xff] }
0x135d   :  { %v3041_v44 = vadd.f32 1e-05, %v3039_v42  ;;  %v7539_v42 = vld [vmem:[%s10495_s7 + $0xb8] sm:$0xff] }
0x135e   :  { %9062 = vrsqrt.f32 %v3042_v43  ;;  %v7544_v43 = vld [vmem:[%s10501_s9 + $0xa0] sm:$0xff] }
0x135f   :  { %9064 = vrsqrt.f32 %v3041_v44  ;;  %v7545_v44 = vld [vmem:[%s10501_s9 + $0xa8] sm:$0xff] }
0x1368   :  { %v9063_v45 = vpop.eup %9062 }
0x1369   :  { %v9065_v47 = vpop.eup %9064  ;;  %v3046_v48 = vmul.f32 %v9063_v45, %v3030_v22 }
0x136a   :  { %v3045_v49 = vmul.f32 %v9065_v47, %v3029_v23  ;;  %v8842_v47 = vpack.c.bf16 %v7539_v42, %v7538_v41  ;;  %v7580_v41 = vld [vmem:[%s10501_s9 + $0xc8] sm:$0xff] }
0x136b   :  { %v3054_v51 = vmul.f32 %v7495_v46, %v3046_v48  ;;  %v8846_v48 = vpack.c.bf16 %v7545_v44, %v7544_v43  ;;  %v7581_v43 = vld [vmem:[%s10501_s9 + $0xd0] sm:$0xff]  ;;  %v7582_v44 = vld [vmem:[%s10501_s9 + $0xd8] sm:$0xff] }
0x136c   :  { %v3053_v52 = vmul.f32 %v7495_v46, %v3045_v49  ;;  %v7546_v49 = vld [vmem:[%s10501_s9 + $0xb0] sm:$0xff] }
0x136d   :  { %v9745_v56 = vadd.f32 %v7496_v50, %v3054_v51 }
0x136e   :  { %v9743_v55 = vadd.f32 %v7496_v50, %v3053_v52  ;;  %v7547_v50 = vld [vmem:[%s10501_s9 + $0xb8] sm:$0xff] }
0x136f   :  { %v8850_v51 = vpack.c.bf16 %v7547_v50, %v7546_v49  ;;  %v7571_v49 = vld [vmem:[%s10495_s7 + $0xc0] sm:$0xff]  ;;  %v7572_v50 = vld [vmem:[%s10495_s7 + $0xc8] sm:$0xff] }
0x1370   :  { %8295 = vmatprep.mubr.msk.f32.mxu1 %vm100_vm0, %v9743_v55  ;;  %8317 = vmatprep.mubr.msk.f32.mxu0 %vm100_vm0, %v9743_v55 }
0x1371   :  { %8296 = vmatmul.mubr.msk.f32.vlgmr.msra.gmra.mrb[34].mxu1 %vm100_vm0, %v9745_v56  ;;  %8318 = vmatmul.mubr.msk.f32.vlgmr.msra.gmra.mrb[28].mxu0 %vm100_vm0, %v9745_v56 }
0x1372   :  { %8817 = vmatpush3.bf16.msra.mxu1 %v8814_v38  ;;  %8306 = vmatprep.mubr.msk.f32.mxu1 %vm100_vm0, %v9743_v55 }
0x1373   :  { %8819 = vmatprep.subr.bf16.mxu1 %v8818_v57  ;;  %8332 = vmatprep.mubr.msk.f32.mxu0 %vm9139_vm1, %v9138_v17 }
0x1376   :  { %8821 = vmatpush3.bf16.msra.mxu1 %v8818_v57 }
0x1377   :  { %8320 = vmatprep.subr.mxu1 %v9138_v17 }
0x1379   :  { %8307 = vmatmul.mubr.msk.f32.vlgmr.msra.gmra.mrb[36].mxu1 %vm100_vm0, %v9745_v56 }
0x137a   :  { %8322 = vmatprep.mubr.msk.f32.mxu1 %vm9139_vm1, %v9138_v17 }
0x1444   :  { %v8297_v59 = vpop.f32.mrb[34].mxu1  ;;  %v8319_v60 = vpop.f32.mrb[28].mxu0 }
0x1445   :  { %v3148_v61 = vpop.f32.mrb[35].mxu1  ;;  %v3324_v62 = vpop.f32.mrb[29].mxu0  ;;  %v3154_v7 = vadd.f32 %v8297_v59, %v7502_v3  ;;  %v3330_v8 = vadd.f32 %v8319_v60, %v7518_v58  ;;  %v7541_v60 = vld [vmem:[%s10499_s27 + $0x5] ss:$0 sm:$0xff] }
0x1446   :  { %v3325_v63 = vadd.f32 %v7518_v58, %v3324_v62  ;;  %v3149_v5 = vadd.f32 %v7502_v3, %v3148_v61 }
0x1448   :  { %8331 = vmatpush3.msra.mxu0 %v3325_v63  ;;  %v7533_v63 = vld [vmem:[%s10500_s8 + $0x5] ss:$0 sm:$0xff] }
0x1449   :  { %8831 = vmatprep.subr.bf16.mxu0 %v8830_v18 }
0x144c   :  { %v8308_v1 = vpop.f32.mrb[36].mxu1 }
0x144d   :  { %v3236_v2 = vpop.f32.mrb[37].mxu1  ;;  %v3242_v6 = vadd.f32 %v8308_v1, %v7510_v0  ;;  %v7549_v1 = vld [vmem:[%s10502_s4 + $0x5] ss:$0 sm:$0xff] }
0x144e   :  { %v3237_v4 = vadd.f32 %v7510_v0, %v3236_v2 }
0x1450   :  { %8321 = vmatpush3.xpose.msk.msra.mxu1 %vm354_vm2, %v3237_v4 }
0x1451   :  { %8325 = vmatprep.subr.mxu1 %v9138_v17 }
0x1453   :  { %8323 = vmatmul.mubr.msk.f32.vlgmr.msra.gmra.mrb[38].mxu1 %vm354_vm2, %v3149_v5 }
0x1454   :  { %8326 = vmatpush3.xpose.msk.msra.mxu1 %vm354_vm2, %v3242_v6  ;;  %8327 = vmatprep.mubr.msk.f32.mxu1 %vm9139_vm1, %v9138_v17 }
0x1455   :  { %8335 = vmatprep.subr.mxu1 %v9138_v17 }
0x1457   :  { %8328 = vmatmul.mubr.msk.f32.vlgmr.msra.gmra.mrb[40].mxu1 %vm354_vm2, %v3154_v7 }
0x1458   :  { %8336 = vmatpush3.msra.mxu1 %v3330_v8  ;;  %8337 = vmatprep.mubr.msk.f32.mxu1 %vm9139_vm1, %v9138_v17 }
0x1459   :  { %8839 = vmatprep.subr.bf16.mxu1 %v8838_v33 }
0x1526   :  { %v3405_v9 = vpop.f32.mrb[38].mxu1 }
0x1527   :  { %v3485_v10 = vmul.f32 0.35355338, %v3405_v9  ;;  %v8324_v11 = vpop.f32.mrb[39].mxu1 }
0x1529   :  { %v3487_v12 = vsel %vm354_vm2, %v3485_v10, -inf }
0x152a   :  { %3488 = vmax.xlane.f32.xlu1 %v3487_v12  ;;  %v3481_v14 = vpop.f32.mrb[40].mxu1 }
0x152b   :  { %v3486_v19 = vmul.f32 0.35355338, %v3481_v14  ;;  %v8329_v20 = vpop.f32.mrb[41].mxu1 }
0x152d   :  { %v3490_v21 = vsel %vm354_vm2, %v3486_v19, -inf }
0x152e   :  { %3491 = vmax.xlane.f32.xlu0 %v3490_v21 }
0x15b7   :  { %v3489_v22 = vpop.xlane.xlu1 %3488 }
0x15b8   :  { %v3493_v23 = vsub.f32 %v3485_v10, %v3489_v22 }
0x15ba   :  { %v3495_v24 = vmul.f32 1.442695, %v3493_v23 }
0x15bb   :  { %v3492_v25 = vpop.xlane.xlu0 %3491 }
0x15bc   :  { %9066 = vpow2.f32 %v3495_v24  ;;  %v3494_v26 = vsub.f32 %v3486_v19, %v3492_v25 }
0x15be   :  { %v3497_v27 = vmul.f32 1.442695, %v3494_v26 }
0x15c0   :  { %9068 = vpow2.f32 %v3497_v27 }
0x15c6   :  { %v9067_v13 = vpop.eup %9066 }
0x15c7   :  { %v3499_v28 = vsel %vm354_vm2, %v9067_v13, 0.0 }
0x15c8   :  { %3500 = vadd.xlane.f32.xlu1 %v3499_v28 }
0x15ca   :  { %v9069_v16 = vpop.eup %9068 }
0x15cb   :  { %v3502_v15 = vsel %vm354_vm2, %v9069_v16, 0.0 }
0x15cc   :  { %3503 = vadd.xlane.f32.xlu0 %v3502_v15 }
0x1655   :  { %v3501_v34 = vpop.xlane.xlu1 %3500 }
0x1656   :  { %9070 = vrcp.f32 %v3501_v34 }
0x1659   :  { %v3504_v35 = vpop.xlane.xlu0 %3503 }
0x165a   :  { %9072 = vrcp.f32 %v3504_v35  ;;  %v7565_v35 = vld [vmem:[%s10496_s0 + $0xd0] sm:$0xff] }
0x1660   :  { %v9071_v38 = vpop.eup %9070 }
0x1661   :  { %v3507_v39 = vmul.f32 %v9071_v38, %v9067_v13 }
0x1663   :  { %8333 = vmatmul.mubr.msk.f32.vlgmr.msra.gmra.mrb[30].mxu0 %vm354_vm2, %v3507_v39  ;;  %v8858_v39 = vpack.c.bf16 %v7566_v36, %v7565_v35  ;;  %v7598_v36 = vld [vmem:[%s10496_s0 + $0xf0] sm:$0xff] }
0x1664   :  { %v9073_v45 = vpop.eup %9072  ;;  %8833 = vmatpush3.bf16.msra.mxu0 %v8830_v18  ;;  %8348 = vmatprep.mubr.msk.f32.mxu0 %vm100_vm0, %v9743_v55  ;;  %v8854_v18 = vpack.c.bf16 %v7564_v30, %v7563_v29 }
0x1665   :  { %v3508_v46 = vmul.f32 %v9073_v45, %v9069_v16  ;;  %8835 = vmatprep.subr.bf16.mxu0 %v8834_v40  ;;  %v8874_v45 = vpack.c.bf16 %v7582_v44, %v7581_v43  ;;  %v7612_v43 = vld [vmem:[%s10501_s9 + $0xe0] sm:$0xff]  ;;  %v7613_v44 = vld [vmem:[%s10501_s9 + $0xe8] sm:$0xff] }
0x1667   :  { %8338 = vmatmul.mubr.msk.f32.vlgmr.msra.gmra.mrb[42].mxu1 %vm354_vm2, %v3508_v46  ;;  %v7558_v46 = vld [vmem:[%s10503_s6 + $0x28] sm:$0xff] }
0x1668   :  { %8837 = vmatpush3.bf16.msra.mxu0 %v8834_v40  ;;  %8841 = vmatpush3.bf16.msra.mxu1 %v8838_v33  ;;  %v7579_v40 = vld [vmem:[%s10501_s9 + $0xc0] sm:$0xff] }
0x1669   :  { %8359 = vmatprep.mubr.msk.f32.mxu1 %vm100_vm0, %v9743_v55  ;;  %8843 = vmatprep.subr.bf16.mxu1 %v8842_v47  ;;  %v8870_v42 = vpack.c.bf16 %v7580_v41, %v7579_v40 }
0x166a   :  { %8847 = vmatprep.subr.bf16.mxu0 %v8846_v48 }
0x166b   :  { %8349 = vmatmul.mubr.msk.f32.vlgmr.msra.gmra.mrb[32].mxu0 %vm100_vm0, %v9745_v56 }
0x166c   :  { %8845 = vmatpush3.bf16.msra.mxu1 %v8842_v47  ;;  %8849 = vmatpush3.bf16.msra.mxu0 %v8846_v48  ;;  %v7527_v47 = vld [vmem:[%s10503_s6 + $0x20] sm:$0xff] }
0x166d   :  { %8370 = vmatprep.mubr.msk.f32.mxu0 %vm100_vm0, %v9743_v55  ;;  %8851 = vmatprep.subr.bf16.mxu0 %v8850_v51 }
0x166e   :  { %8373 = vmatprep.subr.mxu1 %v9138_v17 }
0x166f   :  { %8360 = vmatmul.mubr.msk.f32.vlgmr.msra.gmra.mrb[44].mxu1 %vm100_vm0, %v9745_v56 }
0x1670   :  { %8853 = vmatpush3.bf16.msra.mxu0 %v8850_v51  ;;  %8375 = vmatprep.mubr.msk.f32.mxu1 %vm9139_vm1, %v9138_v17 }
0x1671   :  { %8383 = vmatprep.subr.mxu0 %v9138_v17 }
0x1673   :  { %8371 = vmatmul.mubr.msk.f32.vlgmr.msra.gmra.mrb[34].mxu0 %vm100_vm0, %v9745_v56 }
0x1674   :  { %8385 = vmatprep.mubr.msk.f32.mxu0 %vm9139_vm1, %v9138_v17 }
0x1736   :  { %v9843_v52 = vpop.f32.mrb[30].mxu0 }
0x1737   :  { %v8334_v53 = vpop.f32.mrb[31].mxu0 }
0x1738   :  { %v8862_v53 = vpack.c.bf16 %v7572_v50, %v7571_v49  ;;  %v7604_v49 = vld [vmem:[%s10495_s7 + $0xe0] sm:$0xff]  ;;  %v7605_v50 = vld [vmem:[%s10495_s7 + $0xe8] sm:$0xff] }
0x173a   :  { %v9845_v54 = vpop.f32.mrb[42].mxu1 }
0x173b   :  { %v8339_v57 = vpop.f32.mrb[43].mxu1 }
0x173e   :  { %v8350_v58 = vpop.f32.mrb[32].mxu0 }
0x173f   :  { %v3736_v59 = vpop.f32.mrb[33].mxu0  ;;  %v3742_v7 = vadd.f32 %v8350_v58, %v7533_v63 }
0x1740   :  { %v3737_v3 = vadd.f32 %v7533_v63, %v3736_v59  ;;  %v7573_v59 = vld [vmem:[%s10495_s7 + $0xd0] sm:$0xff] }
0x1742   :  { %v8361_v61 = vpop.f32.mrb[44].mxu1 }
0x1743   :  { %v3824_v62 = vpop.f32.mrb[45].mxu1  ;;  %v3830_v5 = vadd.f32 %v8361_v61, %v7541_v60 }
0x1744   :  { %v3825_v0 = vadd.f32 %v7541_v60, %v3824_v62  ;;  %v7574_v60 = vld [vmem:[%s10495_s7 + $0xd8] sm:$0xff] }
0x1745   :  { %v8866_v61 = vpack.c.bf16 %v7574_v60, %v7573_v59 }
0x1746   :  { %v8372_v2 = vpop.f32.mrb[34].mxu0  ;;  %8374 = vmatpush3.xpose.msk.msra.mxu1 %vm354_vm2, %v3825_v0 }
0x1747   :  { %v3912_v4 = vpop.f32.mrb[35].mxu0  ;;  %8378 = vmatprep.subr.mxu1 %v9138_v17  ;;  %v3918_v8 = vadd.f32 %v8372_v2, %v7549_v1  ;;  %v7568_v2 = vld [vmem:[%s10500_s8 + $0x6] ss:$0 sm:$0xff] }
0x1748   :  { %v3913_v6 = vadd.f32 %v7549_v1, %v3912_v4 }
0x1749   :  { %8376 = vmatmul.mubr.msk.f32.vlgmr.msra.gmra.mrb[46].mxu1 %vm354_vm2, %v3737_v3 }
0x174a   :  { %8379 = vmatpush3.xpose.msk.msra.mxu1 %vm354_vm2, %v3830_v5  ;;  %8384 = vmatpush3.msra.mxu0 %v3913_v6  ;;  %v7584_v5 = vld [vmem:[%s10502_s4 + $0x6] ss:$0 sm:$0xff] }
0x174b   :  { %8380 = vmatprep.mubr.msk.f32.mxu1 %vm9139_vm1, %v9138_v17  ;;  %8388 = vmatprep.subr.mxu1 %v9138_v17 }
0x174c   :  { %8393 = vmatprep.subr.mxu0 %v7558_v46 }
0x174d   :  { %8381 = vmatmul.mubr.msk.f32.vlgmr.msra.gmra.mrb[48].mxu1 %vm354_vm2, %v3742_v7 }
0x174e   :  { %8389 = vmatpush3.msra.mxu1 %v3918_v8  ;;  %8390 = vmatprep.mubr.msk.f32.mxu1 %vm9139_vm1, %v9138_v17 }
0x174f   :  { %8855 = vmatprep.subr.bf16.mxu1 %v8854_v18 }
0x181c   :  { %v3993_v9 = vpop.f32.mrb[46].mxu1 }
0x181d   :  { %v4073_v10 = vmul.f32 0.35355338, %v3993_v9  ;;  %v8377_v11 = vpop.f32.mrb[47].mxu1 }
0x181f   :  { %v4075_v12 = vsel %vm354_vm2, %v4073_v10, -inf }
0x1820   :  { %4076 = vmax.xlane.f32.xlu0 %v4075_v12  ;;  %v4069_v14 = vpop.f32.mrb[48].mxu1 }
0x1821   :  { %v4074_v19 = vmul.f32 0.35355338, %v4069_v14  ;;  %v8382_v20 = vpop.f32.mrb[49].mxu1 }
0x1823   :  { %v4078_v21 = vsel %vm354_vm2, %v4074_v19, -inf }
0x1824   :  { %4079 = vmax.xlane.f32.xlu1 %v4078_v21 }
0x18ad   :  { %v4077_v22 = vpop.xlane.xlu0 %4076 }
0x18ae   :  { %v4081_v23 = vsub.f32 %v4073_v10, %v4077_v22 }
0x18b0   :  { %v4083_v24 = vmul.f32 1.442695, %v4081_v23 }
0x18b1   :  { %v4080_v25 = vpop.xlane.xlu1 %4079 }
0x18b2   :  { %9074 = vpow2.f32 %v4083_v24  ;;  %v4082_v26 = vsub.f32 %v4074_v19, %v4080_v25 }
0x18b4   :  { %v4085_v27 = vmul.f32 1.442695, %v4082_v26 }
0x18b6   :  { %9076 = vpow2.f32 %v4085_v27 }
0x18bc   :  { %v9075_v13 = vpop.eup %9074 }
0x18bd   :  { %v4087_v28 = vsel %vm354_vm2, %v9075_v13, 0.0 }
0x18be   :  { %4088 = vadd.xlane.f32.xlu0 %v4087_v28 }
0x18c0   :  { %v9077_v16 = vpop.eup %9076 }
0x18c1   :  { %v4090_v15 = vsel %vm354_vm2, %v9077_v16, 0.0 }
0x18c2   :  { %4091 = vadd.xlane.f32.xlu1 %v4090_v15 }
0x194b   :  { %v4089_v31 = vpop.xlane.xlu0 %4088 }
0x194c   :  { %9078 = vrcp.f32 %v4089_v31  ;;  %v7597_v31 = vld [vmem:[%s10496_s0 + $0xe8] sm:$0xff] }
0x194f   :  { %v4092_v32 = vpop.xlane.xlu1 %4091 }
0x1950   :  { %9080 = vrcp.f32 %v4092_v32 }
0x1956   :  { %v9079_v33 = vpop.eup %9078 }
0x1957   :  { %v4095_v34 = vmul.f32 %v9079_v33, %v9075_v13  ;;  %v7593_v33 = vld [vmem:[%s10503_s6 + $0x30] sm:$0xff] }
0x1959   :  { %8386 = vmatmul.mubr.msk.f32.vlgmr.msra.gmra.mrb[36].mxu0 %vm354_vm2, %v4095_v34 }
0x195a   :  { %v9081_v37 = vpop.eup %9080  ;;  %8394 = vmatpush3.msra.mxu0 %v7558_v46  ;;  %v7614_v46 = vld [vmem:[%s10501_s9 + $0xf0] sm:$0xff] }
0x195b   :  { %v4096_v38 = vmul.f32 %v9081_v37, %v9077_v16  ;;  %8398 = vmatprep.subr.mxu0 %v7527_v47  ;;  %v7599_v37 = vld [vmem:[%s10496_s0 + $0xf8] sm:$0xff] }
0x195c   :  { %v8882_v41 = vpack.c.bf16 %v7599_v37, %v7598_v36  ;;  %v7626_v37 = vld [vmem:[%s10503_s6 + $0x38] sm:$0xff]  ;;  %s9142_s6 = smov [#allocation2]  }
0x195d   :  { %8391 = vmatmul.mubr.msk.f32.vlgmr.msra.gmra.mrb[50].mxu1 %vm354_vm2, %v4096_v38 }
0x195e   :  { %8857 = vmatpush3.bf16.msra.mxu1 %v8854_v18  ;;  %8411 = vmatprep.mubr.msk.f32.mxu1 %vm100_vm0, %v9743_v55  ;;  %v7596_v18 = vld [vmem:[%s10496_s0 + $0xe0] sm:$0xff] }
0x195f   :  { %8859 = vmatprep.subr.bf16.mxu1 %v8858_v39  ;;  %v8878_v32 = vpack.c.bf16 %v7597_v31, %v7596_v18 }
0x1962   :  { %8861 = vmatpush3.bf16.msra.mxu1 %v8858_v39 }
0x1963   :  { %8871 = vmatprep.subr.bf16.mxu1 %v8870_v42 }
0x1965   :  { %8412 = vmatmul.mubr.msk.f32.vlgmr.msra.gmra.mrb[52].mxu1 %vm100_vm0, %v9745_v56 }
0x1966   :  { %8873 = vmatpush3.bf16.msra.mxu1 %v8870_v42  ;;  %8433 = vmatprep.mubr.msk.f32.mxu1 %vm100_vm0, %v9743_v55 }
0x1967   :  { %8875 = vmatprep.subr.bf16.mxu1 %v8874_v45 }
0x196a   :  { %8877 = vmatpush3.bf16.msra.mxu1 %v8874_v45  ;;  %v8894_v45 = vpack.c.bf16 %v7613_v44, %v7612_v43 }
0x196b   :  { %8441 = vmatprep.subr.mxu1 %v9138_v17 }
0x196d   :  { %8434 = vmatmul.mubr.msk.f32.vlgmr.msra.gmra.mrb[54].mxu1 %vm100_vm0, %v9745_v56 }
0x196e   :  { %8443 = vmatprep.mubr.msk.f32.mxu1 %vm9139_vm1, %v9138_v17 }
0x1a2c   :  { %v4166_v48 = vpop.f32.mrb[36].mxu0 }
0x1a2d   :  { %v8387_v51 = vpop.f32.mrb[37].mxu0  ;;  %8395 = vmatprep.mubr.msk.f32.mxu0 %vm354_vm2, %v4166_v48 }
0x1a2e   :  { %v8886_v51 = vpack.c.bf16 %v7605_v50, %v7604_v49 }
0x1a30   :  { %v4239_v57 = vpop.f32.mrb[50].mxu1 }
0x1a31   :  { %v8392_v58 = vpop.f32.mrb[51].mxu1  ;;  %8396 = vmatmul.mubr.msk.f32.vlgmr.msra.gmra.mrb[38].mxu0 %vm354_vm2, %v4239_v57  ;;  %v7607_v57 = vld [vmem:[%s10495_s7 + $0xf8] sm:$0xff] }
0x1a32   :  { %8399 = vmatpush3.msra.mxu0 %v7527_v47  ;;  %8400 = vmatprep.mubr.msk.f32.mxu0 %vm354_vm2, %v9843_v52  ;;  %v7615_v47 = vld [vmem:[%s10501_s9 + $0xf8] sm:$0xff] }
0x1a33   :  { %8863 = vmatprep.subr.bf16.mxu0 %v8862_v53  ;;  %v8898_v48 = vpack.c.bf16 %v7615_v47, %v7614_v46 }
0x1a38   :  { %v8413_v62 = vpop.f32.mrb[52].mxu1 }
0x1a39   :  { %v4486_v63 = vpop.f32.mrb[53].mxu1  ;;  %8401 = vmatmul.mubr.msk.f32.vlgmr.msra.gmra.mrb[38].mxu0 %vm354_vm2, %v9845_v54  ;;  %v7576_v54 = vld [vmem:[%s10499_s27 + $0x6] ss:$0 sm:$0xff]  ;;  %v4492_v7 = vadd.f32 %v8413_v62, %v7568_v2 }
0x1a3a   :  { %8865 = vmatpush3.bf16.msra.mxu0 %v8862_v53  ;;  %8422 = vmatprep.mubr.msk.f32.mxu0 %vm100_vm0, %v9743_v55  ;;  %v4487_v8 = vadd.f32 %v7568_v2, %v4486_v63  ;;  %v7606_v53 = vld [vmem:[%s10495_s7 + $0xf0] sm:$0xff] }
0x1a3b   :  { %8867 = vmatprep.subr.bf16.mxu0 %v8866_v61 }
0x1a3e   :  { %8869 = vmatpush3.bf16.msra.mxu0 %v8866_v61  ;;  %v8890_v61 = vpack.c.bf16 %v7607_v57, %v7606_v53 }
0x1a3f   :  { %8436 = vmatprep.subr.mxu0 %v9138_v17 }
0x1a40   :  { %v8435_v52 = vpop.f32.mrb[54].mxu1 }
0x1a41   :  { %8423 = vmatmul.mubr.msk.f32.vlgmr.msra.gmra.mrb[40].mxu0 %vm100_vm0, %v9745_v56  ;;  %v4662_v0 = vpop.f32.mrb[55].mxu1  ;;  %v4668_v9 = vadd.f32 %v8435_v52, %v7584_v5 }
0x1a42   :  { %8438 = vmatprep.mubr.msk.f32.mxu0 %vm9139_vm1, %v9138_v17  ;;  %v4663_v10 = vadd.f32 %v7584_v5, %v4662_v0  ;;  %v7617_v0 = vld [vmem:[%s10502_s4 + $0x7] ss:$0 sm:$0xff] }
0x1b14   :  { %v8424_v1 = vpop.f32.mrb[40].mxu0 }
0x1b15   :  { %v4580_v3 = vadd.f32 %v8424_v1, %v7576_v54  ;;  %v4574_v4 = vpop.f32.mrb[41].mxu0 }
0x1b16   :  { %v4575_v6 = vadd.f32 %v7576_v54, %v4574_v4  ;;  %v7609_v4 = vld [vmem:[%s10499_s27 + $0x7] ss:$0 sm:$0xff] }
0x1b17   :  { %8442 = vmatpush3.xpose.msk.msra.mxu1 %vm354_vm2, %v4580_v3 }
0x1b18   :  { %8437 = vmatpush3.xpose.msk.msra.mxu0 %vm354_vm2, %v4575_v6  ;;  %8451 = vmatprep.subr.mxu1 %v9138_v17 }
0x1b19   :  { %8446 = vmatprep.subr.mxu0 %v9138_v17 }
0x1b1a   :  { %8444 = vmatmul.mubr.msk.f32.vlgmr.msra.gmra.mrb[56].mxu1 %vm354_vm2, %v4492_v7  ;;  %v7601_v7 = vld [vmem:[%s10500_s8 + $0x7] ss:$0 sm:$0xff] }
0x1b1b   :  { %8439 = vmatmul.mubr.msk.f32.vlgmr.msra.gmra.mrb[42].mxu0 %vm354_vm2, %v4487_v8  ;;  %8452 = vmatpush3.msra.mxu1 %v4668_v9 }
0x1b1c   :  { %8447 = vmatpush3.msra.mxu0 %v4663_v10  ;;  %8453 = vmatprep.mubr.msk.f32.mxu1 %vm9139_vm1, %v9138_v17 }
0x1b1d   :  { %8448 = vmatprep.mubr.msk.f32.mxu0 %vm9139_vm1, %v9138_v17  ;;  %8879 = vmatprep.subr.bf16.mxu1 %v8878_v32 }
0x1b1e   :  { %8456 = vmatprep.subr.mxu0 %v7593_v33 }
0x1bed   :  { %v4819_v11 = vpop.f32.mrb[56].mxu1 }
0x1bee   :  { %v4824_v12 = vmul.f32 0.35355338, %v4819_v11  ;;  %v4743_v14 = vpop.f32.mrb[42].mxu0  ;;  %v8445_v19 = vpop.f32.mrb[57].mxu1 }
0x1bef   :  { %v4823_v20 = vmul.f32 0.35355338, %v4743_v14  ;;  %v8440_v21 = vpop.f32.mrb[43].mxu0 }
0x1bf0   :  { %v4828_v22 = vsel %vm354_vm2, %v4824_v12, -inf }
0x1bf1   :  { %4829 = vmax.xlane.f32.xlu1 %v4828_v22  ;;  %v4825_v23 = vsel %vm354_vm2, %v4823_v20, -inf }
0x1bf2   :  { %4826 = vmax.xlane.f32.xlu0 %v4825_v23 }
0x1c7e   :  { %v4830_v24 = vpop.xlane.xlu1 %4829 }
0x1c7f   :  { %v4832_v25 = vsub.f32 %v4824_v12, %v4830_v24  ;;  %v4827_v26 = vpop.xlane.xlu0 %4826 }
0x1c80   :  { %v4831_v27 = vsub.f32 %v4823_v20, %v4827_v26 }
0x1c81   :  { %v4835_v13 = vmul.f32 1.442695, %v4832_v25 }
0x1c82   :  { %v4833_v28 = vmul.f32 1.442695, %v4831_v27 }
0x1c83   :  { %9082 = vpow2.f32 %v4835_v13 }
0x1c84   :  { %9084 = vpow2.f32 %v4833_v28 }
0x1c8d   :  { %v9083_v16 = vpop.eup %9082 }
0x1c8e   :  { %v9085_v15 = vpop.eup %9084  ;;  %v4840_v29 = vsel %vm354_vm2, %v9083_v16, 0.0 }
0x1c8f   :  { %4841 = vadd.xlane.f32.xlu1 %v4840_v29  ;;  %v4837_v30 = vsel %vm354_vm2, %v9085_v15, 0.0 }
0x1c90   :  { %4838 = vadd.xlane.f32.xlu0 %v4837_v30 }
0x1d1c   :  { %v4842_v34 = vpop.xlane.xlu1 %4841 }
0x1d1d   :  { %9086 = vrcp.f32 %v4842_v34  ;;  %v4839_v35 = vpop.xlane.xlu0 %4838 }
0x1d1e   :  { %9088 = vrcp.f32 %v4839_v35 }
0x1d27   :  { %v9087_v38 = vpop.eup %9086 }
0x1d28   :  { %v9089_v39 = vpop.eup %9088  ;;  %v4846_v40 = vmul.f32 %v9087_v38, %v9083_v16 }
0x1d29   :  { %v4845_v42 = vmul.f32 %v9089_v39, %v9085_v15 }
0x1d2a   :  { %8454 = vmatmul.mubr.msk.f32.vlgmr.msra.gmra.mrb[58].mxu1 %vm354_vm2, %v4846_v40 }
0x1d2b   :  { %8881 = vmatpush3.bf16.msra.mxu1 %v8878_v32  ;;  %8449 = vmatmul.mubr.msk.f32.vlgmr.msra.gmra.mrb[44].mxu0 %vm354_vm2, %v4845_v42  ;;  %v7630_v42 = vld [vmem:[%s10504_s25 + $0x1] ss:$0 sm:$0xff]  ;;  %s7359_s25 = sshll.u32 %s9142_s6, 4  ;;  %s7360_s25 = int_to_ptr.vmem [resolvable:$true] %s7359_s25 }
0x1d2c   :  { %8469 = vmatprep.mubr.msk.f32.mxu1 %vm100_vm0, %v9743_v55  ;;  %8883 = vmatprep.subr.bf16.mxu1 %v8882_v41  ;;  %s9114_s29 = scalar_lea.vmem %s7360_s25, 32  ;;  %p9119_p1 = scmp.lt.s32.totalorder %s7360_s25, %s7360_s25 }
0x1d2d   :  { %8457 = vmatpush3.msra.mxu0 %v7593_v33  ;;  %p9115_p0 = scmp.ne.s32.totalorder %s7360_s25, %s9114_s29  ;;  %p9120_p2 = scmp.lt.s32.totalorder %s9114_s29, %s9114_s29 }
0x1d2e   :  { %8887 = vmatprep.subr.bf16.mxu0 %v8886_v51 }
0x1d2f   :  { %8885 = vmatpush3.bf16.msra.mxu1 %v8882_v41  ;;  %p9121_p3 = por %p9120_p2, %p9119_p1 }
0x1d30   :  { %8895 = vmatprep.subr.bf16.mxu1 %v8894_v45 }
0x1d31   :  { %p9122_p4 = pnand %p9121_p3, %p9115_p0 }
0x1d32   :  { %8470 = vmatmul.mubr.msk.f32.vlgmr.msra.gmra.mrb[60].mxu1 %vm100_vm0, %v9745_v56 }
0x1d33   :  { %8897 = vmatpush3.bf16.msra.mxu1 %v8894_v45  ;;  %8491 = vmatprep.mubr.msk.f32.mxu1 %vm100_vm0, %v9743_v55 }
0x1d34   :  { %8899 = vmatprep.subr.bf16.mxu1 %v8898_v48 }
0x1d37   :  { %8901 = vmatpush3.bf16.msra.mxu1 %v8898_v48 }
0x1d38   :  { %8504 = vmatprep.subr.mxu1 %v9138_v17 }
0x1d3a   :  { %8492 = vmatmul.mubr.msk.f32.vlgmr.msra.gmra.mrb[62].mxu1 %vm100_vm0, %v9745_v56 }
0x1d3b   :  { %8506 = vmatprep.mubr.msk.f32.mxu1 %vm9139_vm1, %v9138_v17 }
0x1dfd   :  { %v4989_v58 = vpop.f32.mrb[58].mxu1 }
0x1dfe   :  { %v4916_v59 = vpop.f32.mrb[44].mxu0  ;;  %v8455_v60 = vpop.f32.mrb[59].mxu1 }
0x1dff   :  { %v8450_v62 = vpop.f32.mrb[45].mxu0  ;;  %8458 = vmatprep.mubr.msk.f32.mxu0 %vm354_vm2, %v4916_v59 }
0x1e00   :  { %8459 = vmatmul.mubr.msk.f32.vlgmr.msra.gmra.mrb[38].mxu0 %vm354_vm2, %v4989_v58 }
0x1e01   :  { %8889 = vmatpush3.bf16.msra.mxu0 %v8886_v51  ;;  %8480 = vmatprep.mubr.msk.f32.mxu0 %vm100_vm0, %v9743_v55 }
0x1e02   :  { %8891 = vmatprep.subr.bf16.mxu0 %v8890_v61 }
0x1e05   :  { %v8471_v63 = vpop.f32.mrb[60].mxu1  ;;  %8893 = vmatpush3.bf16.msra.mxu0 %v8890_v61 }
0x1e06   :  { %v5157_v52 = vpop.f32.mrb[61].mxu1  ;;  %8494 = vmatprep.subr.mxu0 %v9138_v17  ;;  %v5163_v11 = vadd.f32 %v8471_v63, %v7601_v7 }
0x1e07   :  { %v5158_v9 = vadd.f32 %v7601_v7, %v5157_v52  ;;  %v7636_v52 = vld [vmem:[%s10455_s12 + $0x28] sm:$0xff]  ;;  %v7646_v7 = vld [vmem:[%s10457_s14 + $0x58] sm:$0xff] }
0x1e08   :  { %8481 = vmatmul.mubr.msk.f32.vlgmr.msra.gmra.mrb[46].mxu0 %vm100_vm0, %v9745_v56 }
0x1e09   :  { %8496 = vmatprep.mubr.msk.f32.mxu0 %vm9139_vm1, %v9138_v17 }
0x1e0d   :  { %v8493_v54 = vpop.f32.mrb[62].mxu1 }
0x1e0e   :  { %v5339_v1 = vadd.f32 %v8493_v54, %v7617_v0  ;;  %v5333_v2 = vpop.f32.mrb[63].mxu1  ;;  %v7637_v54 = vld [vmem:[%s10455_s12 + $0x30] sm:$0xff] }
0x1e0f   :  { %v5334_v3 = vadd.f32 %v7617_v0, %v5333_v2 }
0x1e11   :  { %8505 = vmatpush3.msra.mxu1 %v5334_v3  ;;  %v7643_v3 = vld [vmem:[%s10457_s14 + $0x40] sm:$0xff] }
0x1edb   :  { %v8482_v5 = vpop.f32.mrb[46].mxu0 }
0x1edc   :  { %v5245_v6 = vpop.f32.mrb[47].mxu0  ;;  %v5251_v10 = vadd.f32 %v8482_v5, %v7609_v4  ;;  %v7645_v5 = vld [vmem:[%s10457_s14 + $0x50] sm:$0xff] }
0x1edd   :  { %v5246_v8 = vadd.f32 %v7609_v4, %v5245_v6  ;;  %v7644_v4 = vld [vmem:[%s10457_s14 + $0x48] sm:$0xff] }
0x1ede   :  { %v8910_v6 = vpack.c.bf16 %v7644_v4, %v7643_v3  ;;  %v7667_v4 = vld [vmem:[%s10461_s18 + $0x50] sm:$0xff] }
0x1edf   :  { %8495 = vmatpush3.xpose.msk.msra.mxu0 %vm354_vm2, %v5246_v8  ;;  %v8914_v8 = vpack.c.bf16 %v7646_v7, %v7645_v5  ;;  %v7668_v5 = vld [vmem:[%s10461_s18 + $0x58] sm:$0xff] }
0x1ee0   :  { %8499 = vmatprep.subr.mxu0 %v9138_v17 }
0x1ee2   :  { %8497 = vmatmul.mubr.msk.f32.vlgmr.msra.gmra.mrb[48].mxu0 %vm354_vm2, %v5158_v9  ;;  %v7647_v9 = vld [vmem:[%s10457_s14 + $0x60] sm:$0xff] }
0x1ee3   :  { %8500 = vmatpush3.xpose.msk.msra.mxu0 %vm354_vm2, %v5251_v10  ;;  %8501 = vmatprep.mubr.msk.f32.mxu0 %vm9139_vm1, %v9138_v17  ;;  %v7648_v10 = vld [vmem:[%s10457_s14 + $0x68] sm:$0xff] }
0x1ee4   :  { %8509 = vmatprep.subr.mxu0 %v9138_v17 }
0x1ee6   :  { %8502 = vmatmul.mubr.msk.f32.vlgmr.msra.gmra.mrb[50].mxu0 %vm354_vm2, %v5163_v11  ;;  %v8918_v11 = vpack.c.bf16 %v7648_v10, %v7647_v9 }
0x1ee7   :  { %8510 = vmatpush3.msra.mxu0 %v5339_v1  ;;  %8511 = vmatprep.mubr.msk.f32.mxu0 %vm9139_vm1, %v9138_v17  ;;  %v7638_v1 = vld [vmem:[%s10455_s12 + $0x38] sm:$0xff] }
0x1ee8   :  { %8514 = vmatprep.subr.mxu0 %v7626_v37  ;;  %v8906_v2 = vpack.c.bf16 %v7638_v1, %v7637_v54  ;;  %v6053_v1 = vld [vmem:[%s10461_s18 + $0x10] sm:$0xff] }
0x1fb5   :  { %v5414_v12 = vpop.f32.mrb[48].mxu0 }
0x1fb6   :  { %v5494_v14 = vmul.f32 0.35355338, %v5414_v12  ;;  %v8498_v19 = vpop.f32.mrb[49].mxu0 }
0x1fb8   :  { %v5496_v20 = vsel %vm354_vm2, %v5494_v14, -inf }
0x1fb9   :  { %5497 = vmax.xlane.f32.xlu0 %v5496_v20  ;;  %v5490_v21 = vpop.f32.mrb[50].mxu0 }
0x1fba   :  { %v5495_v22 = vmul.f32 0.35355338, %v5490_v21  ;;  %v8503_v23 = vpop.f32.mrb[51].mxu0 }
0x1fbc   :  { %v5499_v24 = vsel %vm354_vm2, %v5495_v22, -inf }
0x1fbd   :  { %5500 = vmax.xlane.f32.xlu1 %v5499_v24  ;;  %v7633_v24 = vld [vmem:[%s10505_s3 + $0x1] ss:$0 sm:$0xff] }
0x2046   :  { %v5498_v25 = vpop.xlane.xlu0 %5497 }
0x2047   :  { %v5502_v26 = vsub.f32 %v5494_v14, %v5498_v25 }
0x2049   :  { %v5504_v27 = vmul.f32 1.442695, %v5502_v26 }
0x204a   :  { %v5501_v13 = vpop.xlane.xlu1 %5500 }
0x204b   :  { %9090 = vpow2.f32 %v5504_v27  ;;  %v5503_v28 = vsub.f32 %v5495_v22, %v5501_v13  ;;  %v7634_v13 = vld [vmem:[%s10454_s11 + $0x1] ss:$0 sm:$0xff] }
0x204d   :  { %v5506_v16 = vmul.f32 1.442695, %v5503_v28 }
0x204f   :  { %9092 = vpow2.f32 %v5506_v16 }
0x2055   :  { %v9091_v15 = vpop.eup %9090 }
0x2056   :  { %v5508_v29 = vsel %vm354_vm2, %v9091_v15, 0.0 }
0x2057   :  { %5509 = vadd.xlane.f32.xlu0 %v5508_v29 }
0x2059   :  { %v9093_v30 = vpop.eup %9092 }
0x205a   :  { %v5511_v18 = vsel %vm354_vm2, %v9093_v30, 0.0 }
0x205b   :  { %5512 = vadd.xlane.f32.xlu1 %v5511_v18  ;;  %v7650_v18 = vld [vmem:[%s10457_s14 + $0x78] sm:$0xff] }
0x20e4   :  { %v5510_v31 = vpop.xlane.xlu0 %5509 }
0x20e5   :  { %9094 = vrcp.f32 %v5510_v31 }
0x20e8   :  { %v5513_v32 = vpop.xlane.xlu1 %5512 }
0x20e9   :  { %9096 = vrcp.f32 %v5513_v32  ;;  %v7640_v32 = vld [vmem:[%s10456_s13 + $0x1] ss:$0 sm:$0xff] }
0x20ef   :  { %v9095_v33 = vpop.eup %9094 }
0x20f0   :  { %v5516_v34 = vmul.f32 %v9095_v33, %v9091_v15 }
0x20f2   :  { %8507 = vmatmul.mubr.msk.f32.vlgmr.msra.gmra.mrb[64].mxu1 %vm354_vm2, %v5516_v34 }
0x20f3   :  { %v9097_v35 = vpop.eup %9096 }
0x20f4   :  { %v5517_v36 = vmul.f32 %v9097_v35, %v9093_v30  ;;  %v7649_v30 = vld [vmem:[%s10457_s14 + $0x70] sm:$0xff] }
0x20f5   :  { %v8922_v31 = vpack.c.bf16 %v7650_v18, %v7649_v30 }
0x20f6   :  { %8512 = vmatmul.mubr.msk.f32.vlgmr.msra.gmra.mrb[52].mxu0 %vm354_vm2, %v5517_v36 }
0x20f7   :  { %8515 = vmatpush3.msra.mxu0 %v7626_v37 }
0x20f8   :  { %8911 = vmatprep.subr.bf16.mxu0 %v8910_v6 }
0x21c5   :  { %v5587_v38 = vpop.f32.mrb[64].mxu1 }
0x21c6   :  { %v8508_v39 = vpop.f32.mrb[65].mxu1  ;;  %8516 = vmatprep.mubr.msk.f32.mxu0 %vm354_vm2, %v5587_v38 }
0x21c7   :  { %v7652_v39 = vld [vmem:[%s10458_s15 + $0x1] ss:$0 sm:$0xff] }
0x21c9   :  { %v5660_v40 = vpop.f32.mrb[52].mxu0 }
0x21ca   :  { %v8513_v41 = vpop.f32.mrb[53].mxu0  ;;  %8517 = vmatmul.mubr.msk.f32.vlgmr.msra.gmra.mrb[38].mxu0 %vm354_vm2, %v5660_v40 }
0x21cb   :  { %8913 = vmatpush3.bf16.msra.mxu0 %v8910_v6  ;;  %v8942_v6 = vpack.c.bf16 %v7668_v5, %v7667_v4 }
0x21cc   :  { %8915 = vmatprep.subr.bf16.mxu0 %v8914_v8 }
0x21cf   :  { %8917 = vmatpush3.bf16.msra.mxu0 %v8914_v8 }
0x21d0   :  { %8919 = vmatprep.subr.bf16.mxu0 %v8918_v11 }
0x21d3   :  { %8921 = vmatpush3.bf16.msra.mxu0 %v8918_v11 }
0x21d4   :  { %8923 = vmatprep.subr.bf16.mxu0 %v8922_v31 }
0x21d7   :  { %8925 = vmatpush3.bf16.msra.mxu0 %v8922_v31 }
0x229d   :  { %v8518_v43 = vpop.f32.mrb[38].mxu0 }
0x229e   :  { %v5758_v44 = vadd.f32 %v8518_v43, %v7630_v42  ;;  %v5738_v45 = vpop.f32.mrb[39].mxu0 }
0x229f   :  { %v5757_v46 = vadd.f32 %v7630_v42, %v5738_v45 }
0x22a0   :  { %v5760_v47 = vadd.f32 %v5758_v44, %v9745_v56 }
0x22a1   :  { %v5759_v48 = vadd.f32 %v5757_v46, %v9743_v55  ;;  %v7635_v55 = vld [vmem:[%s10455_s12 + $0x20] sm:$0xff] }
0x22a2   :  { %v5768_v49 = vsel %vm100_vm0, %v5760_v47, 0.0  ;;  %v8902_v0 = vpack.c.bf16 %v7636_v52, %v7635_v55  ;;  %v7665_v55 = vld [vmem:[%s10461_s18 + $0x40] sm:$0xff]  ;;  %v7666_v52 = vld [vmem:[%s10461_s18 + $0x48] sm:$0xff] }
0x22a3   :  { %5769 = vadd.xlane.f32.xlu1 %v5768_v49  ;;  %v5765_v50 = vsel %vm100_vm0, %v5759_v48, 0.0  ;;  %v8939_v54 = vpack.c.bf16 %v7666_v52, %v7665_v55 }
0x22a4   :  { %5766 = vadd.xlane.f32.xlu0 %v5765_v50  ;;  %8903 = vmatprep.subr.bf16.mxu1 %v8902_v0 }
0x22a5   :  { %8905 = vmatpush3.bf16.msra.mxu1 %v8902_v0  ;;  %v9140_v0 = vmov 0.0|0.0  }
0x22a6   :  { %8907 = vmatprep.subr.bf16.mxu1 %v8906_v2  ;;  %8938 = vmatprep.subr.bf16.mxu0 %v9140_v0 }
0x22a9   :  { %8909 = vmatpush3.bf16.msra.mxu1 %v8906_v2  ;;  %v6054_v2 = vld [vmem:[%s10461_s18 + $0x18] sm:$0xff] }
0x22aa   :  { %8926 = vmatprep.subr.bf16.mxu1 %v9140_v0  ;;  %v8930_v3 = vpack.c.bf16 %v6054_v2, %v6053_v1  ;;  %v7682_v2 = vld [vmem:[%s10461_s18 + $0xb0] sm:$0xff] }
0x2330   :  { %v5770_v51 = vpop.xlane.xlu1 %5769 }
0x2331   :  { %v5772_v53 = vmul.f32 0.03125, %v5770_v51  ;;  %v5767_v57 = vpop.xlane.xlu0 %5766 }
0x2332   :  { %v5771_v58 = vmul.f32 0.03125, %v5767_v57 }
0x2333   :  { %v5774_v59 = vsub.f32 %v5760_v47, %v5772_v53 }
0x2334   :  { %v5773_v60 = vsub.f32 %v5759_v48, %v5771_v58 }
0x2335   :  { %v5776_v61 = vmul.f32 %v5774_v59, %v5774_v59 }
0x2336   :  { %v5775_v62 = vmul.f32 %v5773_v60, %v5773_v60 }
0x2337   :  { %v5780_v63 = vsel %vm100_vm0, %v5776_v61, 0.0 }
0x2338   :  { %5781 = vadd.xlane.f32.xlu1 %v5780_v63  ;;  %v5777_v56 = vsel %vm100_vm0, %v5775_v62, 0.0  ;;  %v6051_v62 = vld [vmem:[%s10461_s18] sm:$0xff]  ;;  %v6052_v63 = vld [vmem:[%s10461_s18 + $0x8] sm:$0xff] }
0x2339   :  { %5778 = vadd.xlane.f32.xlu0 %v5777_v56  ;;  %v8927_v56 = vpack.c.bf16 %v6052_v63, %v6051_v62  ;;  %v7680_v62 = vld [vmem:[%s10461_s18 + $0xa0] sm:$0xff]  ;;  %v7681_v63 = vld [vmem:[%s10461_s18 + $0xa8] sm:$0xff] }
0x233a   :  { %v8957_v1 = vpack.c.bf16 %v7681_v63, %v7680_v62 }
0x23c5   :  { %v5782_v12 = vpop.xlane.xlu1 %5781 }
0x23c6   :  { %v5784_v14 = vmul.f32 0.03125, %v5782_v12  ;;  %v5779_v19 = vpop.xlane.xlu0 %5778 }
0x23c7   :  { %v5783_v20 = vmul.f32 0.03125, %v5779_v19  ;;  %v7657_v19 = vld [vmem:[%s10459_s16 + $0x1] ss:$0 sm:$0xff] }
0x23c8   :  { %v5786_v21 = vadd.f32 1e-05, %v5784_v14 }
0x23c9   :  { %v5785_v22 = vadd.f32 1e-05, %v5783_v20 }
0x23ca   :  { %9098 = vrsqrt.f32 %v5786_v21 }
0x23cb   :  { %9100 = vrsqrt.f32 %v5785_v22  ;;  %v7658_v22 = vld [vmem:[%s10460_s17 + $0x1] ss:$0 sm:$0xff] }
0x23d4   :  { %v9099_v23 = vpop.eup %9098 }
0x23d5   :  { %v9101_v25 = vpop.eup %9100  ;;  %v5790_v26 = vmul.f32 %v9099_v23, %v5774_v59 }
0x23d6   :  { %v5789_v27 = vmul.f32 %v9101_v25, %v5773_v60 }
0x23d7   :  { %v5798_v28 = vmul.f32 %v7633_v24, %v5790_v26  ;;  %v7660_v26 = vld [vmem:[%s10461_s18 + $0x20] sm:$0xff] }
0x23d8   :  { %v5797_v16 = vmul.f32 %v7633_v24, %v5789_v27  ;;  %v7661_v27 = vld [vmem:[%s10461_s18 + $0x28] sm:$0xff] }
0x23d9   :  { %v5806_v29 = vadd.f32 %v7634_v13, %v5798_v28  ;;  %v7675_v28 = vld [vmem:[%s10461_s18 + $0x80] sm:$0xff]  ;;  %v8933_v30 = vpack.c.bf16 %v7661_v27, %v7660_v26  ;;  %v6911_v27 = vld [vmem:[%s10463_s20 + $0x10] sm:$0xff] }
0x23da   :  { %v5805_v15 = vadd.f32 %v7634_v13, %v5797_v16  ;;  %v7676_v16 = vld [vmem:[%s10461_s18 + $0x88] sm:$0xff] }
0x23dc   :  { %8527 = vmatprep.mubr.msk.f32.mxu1 %vm100_vm0, %v5805_v15 }
0x23dd   :  { %8528 = vmatmul.mubr.msk.f32.vlgmr.msra.gmra.mrb[66].mxu1 %vm100_vm0, %v5806_v29 }
0x23de   :  { %8557 = vmatprep.mubr.msk.f32.mxu1 %vm9139_vm1, %v9138_v17  ;;  %8928 = vmatpush3.bf16.msra.mxu1 %v8927_v56 }
0x23df   :  { %8929 = vmatprep.subr.bf16.mxu1 %v9140_v0 }
0x23e2   :  { %8931 = vmatpush3.bf16.msra.mxu1 %v8930_v3  ;;  %v7683_v3 = vld [vmem:[%s10461_s18 + $0xb8] sm:$0xff] }
0x23e3   :  { %8932 = vmatprep.subr.bf16.mxu1 %v9140_v0 }
0x24b0   :  { %v8529_v33 = vpop.f32.mrb[66].mxu1 }
0x24b1   :  { %v5898_v34 = vadd.f32 %v8529_v33, %v7640_v32  ;;  %v5892_v35 = vpop.f32.mrb[67].mxu1  ;;  %v7662_v33 = vld [vmem:[%s10461_s18 + $0x30] sm:$0xff] }
0x24b2   :  { %v5893_v36 = vadd.f32 %v7640_v32, %v5892_v35  ;;  %v8951_v32 = vpack.c.bf16 %v7676_v16, %v7675_v28  ;;  %v6913_v16 = vld [vmem:[%s10463_s20 + $0x20] sm:$0xff] }
0x24b3   :  { %v5902_v38 = vmax.f32 %v5898_v34, 0.0  ;;  %v7663_v34 = vld [vmem:[%s10461_s18 + $0x38] sm:$0xff] }
0x24b4   :  { %v5901_v37 = vmax.f32 %v5893_v36, 0.0  ;;  %v7677_v36 = vld [vmem:[%s10461_s18 + $0x90] sm:$0xff] }
0x24b6   :  { %8546 = vmatprep.mubr.msk.f32.mxu0 %vm2935_vm3, %v5901_v37  ;;  %v7678_v37 = vld [vmem:[%s10461_s18 + $0x98] sm:$0xff] }
0x24b7   :  { %8547 = vmatmul.mubr.msk.f32.vlgmr.msra.gmra.mrb[54].mxu0 %vm2935_vm3, %v5902_v38 }
0x24b8   :  { %8579 = vmatprep.mubr.msk.f32.mxu0 %vm9139_vm1, %v9138_v17  ;;  %8940 = vmatpush3.bf16.msra.mxu0 %v8939_v54 }
0x24b9   :  { %8941 = vmatprep.subr.bf16.mxu0 %v9140_v0 }
0x24bc   :  { %8943 = vmatpush3.bf16.msra.mxu0 %v8942_v6  ;;  %v8960_v6 = vpack.c.bf16 %v7683_v3, %v7682_v2 }
0x24bd   :  { %8950 = vmatprep.subr.bf16.mxu0 %v9140_v0 }
0x258a   :  { %v8548_v40 = vpop.f32.mrb[54].mxu0 }
0x258b   :  { %v5998_v41 = vadd.f32 %v8548_v40, %v7652_v39  ;;  %v5992_v42 = vpop.f32.mrb[55].mxu0  ;;  %v8954_v40 = vpack.c.bf16 %v7678_v37, %v7677_v36 }
0x258c   :  { %v5993_v43 = vadd.f32 %v7652_v39, %v5992_v42  ;;  %v8936_v39 = vpack.c.bf16 %v7663_v34, %v7662_v33  ;;  %v7671_v42 = vld [vmem:[%s10461_s18 + $0x68] sm:$0xff]  ;;  %v6136_v34 = vlaneseq }
0x258d   :  { %v6002_v44 = vadd.f32 %v5998_v41, %v5806_v29  ;;  %v7670_v41 = vld [vmem:[%s10461_s18 + $0x60] sm:$0xff] }
0x258e   :  { %v6001_v45 = vadd.f32 %v5993_v43, %v5805_v15  ;;  %v6137_v36 = vshrl.u32 %v6136_v34, 7 }
0x258f   :  { %v6010_v46 = vsel %vm100_vm0, %v6002_v44, 0.0 }
0x2590   :  { %6011 = vadd.xlane.f32.xlu0 %v6010_v46  ;;  %v6007_v47 = vsel %vm100_vm0, %v6001_v45, 0.0 }
0x2591   :  { %6008 = vadd.xlane.f32.xlu1 %v6007_v47 }
0x261d   :  { %v6012_v48 = vpop.xlane.xlu0 %6011 }
0x261e   :  { %v6014_v49 = vmul.f32 0.03125, %v6012_v48  ;;  %v6009_v50 = vpop.xlane.xlu1 %6008  ;;  %v8945_v48 = vpack.c.bf16 %v7671_v42, %v7670_v41 }
0x261f   :  { %v6013_v51 = vmul.f32 0.03125, %v6009_v50  ;;  %v7672_v50 = vld [vmem:[%s10461_s18 + $0x70] sm:$0xff] }
0x2620   :  { %v6016_v53 = vsub.f32 %v6002_v44, %v6014_v49  ;;  %v7685_v44 = vld [vmem:[%s10461_s18 + $0xc0] sm:$0xff] }
0x2621   :  { %v6015_v57 = vsub.f32 %v6001_v45, %v6013_v51  ;;  %v7686_v45 = vld [vmem:[%s10461_s18 + $0xc8] sm:$0xff]  ;;  %v7673_v51 = vld [vmem:[%s10461_s18 + $0x78] sm:$0xff] }
0x2622   :  { %v6018_v58 = vmul.f32 %v6016_v53, %v6016_v53  ;;  %v8963_v49 = vpack.c.bf16 %v7686_v45, %v7685_v44 }
0x2623   :  { %v6017_v59 = vmul.f32 %v6015_v57, %v6015_v57 }
0x2624   :  { %v6022_v60 = vsel %vm100_vm0, %v6018_v58, 0.0  ;;  %v7688_v58 = vld [vmem:[%s10461_s18 + $0xd8] sm:$0xff] }
0x2625   :  { %6023 = vadd.xlane.f32.xlu0 %v6022_v60  ;;  %v6019_v61 = vsel %vm100_vm0, %v6017_v59, 0.0  ;;  %v8948_v60 = vpack.c.bf16 %v7673_v51, %v7672_v50 }
0x2626   :  { %6020 = vadd.xlane.f32.xlu1 %v6019_v61 }
0x26b2   :  { %v6024_v7 = vpop.xlane.xlu0 %6023 }
0x26b3   :  { %v6026_v8 = vmul.f32 0.03125, %v6024_v7  ;;  %v6021_v9 = vpop.xlane.xlu1 %6020  ;;  %v7690_v7 = vld [vmem:[%s10461_s18 + $0xe0] sm:$0xff] }
0x26b4   :  { %v6025_v10 = vmul.f32 0.03125, %v6021_v9 }
0x26b5   :  { %v6028_v11 = vadd.f32 1e-05, %v6026_v8  ;;  %v7691_v8 = vld [vmem:[%s10461_s18 + $0xe8] sm:$0xff] }
0x26b6   :  { %v6027_v12 = vadd.f32 1e-05, %v6025_v10 }
0x26b7   :  { %9102 = vrsqrt.f32 %v6028_v11  ;;  %v8969_v11 = vpack.c.bf16 %v7691_v8, %v7690_v7 }
0x26b8   :  { %9104 = vrsqrt.f32 %v6027_v12  ;;  %v7692_v12 = vld [vmem:[%s10461_s18 + $0xf0] sm:$0xff] }
0x26c1   :  { %v9103_v14 = vpop.eup %9102 }
0x26c2   :  { %v9105_v20 = vpop.eup %9104  ;;  %v6032_v21 = vmul.f32 %v9103_v14, %v6016_v53  ;;  %v7693_v14 = vld [vmem:[%s10461_s18 + $0xf8] sm:$0xff] }
0x26c3   :  { %v6031_v23 = vmul.f32 %v9105_v20, %v6015_v57  ;;  %v7687_v57 = vld [vmem:[%s10461_s18 + $0xd0] sm:$0xff]  ;;  %v8972_v20 = vpack.c.bf16 %v7693_v14, %v7692_v12 }
0x26c4   :  { %v6040_v24 = vmul.f32 %v7657_v19, %v6032_v21  ;;  %v8966_v61 = vpack.c.bf16 %v7688_v58, %v7687_v57 }
0x26c5   :  { %v6039_v25 = vmul.f32 %v7657_v19, %v6031_v23 }
0x26c6   :  { %v10163_v13 = vadd.f32 %v7658_v22, %v6040_v24  ;;  %v6909_v24 = vld [vmem:[%s10463_s20] sm:$0xff] }
0x26c7   :  { %v10171_v15 = vadd.f32 %v7658_v22, %v6039_v25  ;;  %v6910_v25 = vld [vmem:[%s10463_s20 + $0x8] sm:$0xff] }
0x26c8   :  { %v6057_v29 = vrot.slane %v10163_v13, 7  ;;  %v6271_v18 = vrot.slane %v10163_v13, 1  ;;  %v6485_v47 = vrot.slane %v10163_v13, 3  ;;  %v6378_v55 = vrot.slane %v10163_v13, 2 }
0x26c9   :  { %v6270_v31 = vrot.slane %v10171_v15, 2  ;;  %v6164_v43 = vrot.slane %v10171_v15, 1  ;;  %v6484_v46 = vrot.slane %v10171_v15, 4  ;;  %v6377_v56 = vrot.slane %v10171_v15, 3 }
0x26ca   :  { %v6059_v35 = vsel %vm6058_vm4, %v6057_v29, %v10171_v15  ;;  %v6698_v52 = vrot.slane %v10171_v15, 6  ;;  %v6699_v54 = vrot.slane %v10163_v13, 5  ;;  %v6591_v9 = vrot.slane %v10171_v15, 5 }
0x26cb   :  { %8558 = vmatmul.mubr.msk.f32.vlgmr.msra.gmra.mrb[68].mxu1 %vm100_vm0, %v6059_v35  ;;  %v6272_v38 = vsel %vm6058_vm4, %v6271_v18, %v6270_v31  ;;  %v6165_v53 = vsel %vm6058_vm4, %v10163_v13, %v6164_v43  ;;  %v6486_v59 = vsel %vm6058_vm4, %v6485_v47, %v6484_v46  ;;  %v6379_v4 = vsel %vm6058_vm4, %v6378_v55, %v6377_v56  ;;  %v6916_v18 = vld [vmem:[%s10463_s20 + $0x38] sm:$0xff]  ;;  %v6049_v46 = vld [vmem:[%s10462_s19] sm:$0x1]  ;;  %s10507_s19 = sld [smem:[#allocation17_spill]] }
0x26cc   :  { %8934 = vmatpush3.bf16.msra.mxu1 %v8933_v30  ;;  %8580 = vmatmul.mubr.msk.f32.vlgmr.msra.gmra.mrb[56].mxu0 %vm100_vm0, %v6272_v38  ;;  %v6700_v5 = vsel %vm6058_vm4, %v6699_v54, %v6698_v52  ;;  %v6592_v10 = vrot.slane %v10163_v13, 4  ;;  %v6805_v21 = vrot.slane %v10171_v15, 7  ;;  %v6806_v22 = vrot.slane %v10163_v13, 6  ;;  %v6912_v13 = vld [vmem:[%s10463_s20 + $0x18] sm:$0xff]  ;;  %v6914_v15 = vld [vmem:[%s10463_s20 + $0x28] sm:$0xff]  ;;  %v6915_v30 = vld [vmem:[%s10463_s20 + $0x30] sm:$0xff] }
0x26cd   :  { %8952 = vmatpush3.bf16.msra.mxu0 %v8951_v32  ;;  %8935 = vmatprep.subr.bf16.mxu1 %v9140_v0  ;;  %v8975_v26 = vpack.c.bf16 %v6910_v25, %v6909_v24  ;;  %v8978_v28 = vpack.c.bf16 %v6912_v13, %v6911_v27  ;;  %v8981_v29 = vpack.c.bf16 %v6914_v15, %v6913_v16  ;;  %v9141_v32 = vmov 1966171168   ;;  %s10506_s20 = sld [smem:[#allocation16_spill]] }
0x26ce   :  { %8953 = vmatprep.subr.bf16.mxu0 %v9140_v0  ;;  %8568 = vmatprep.mubr.msk.f32.mxu1 %vm9139_vm1, %v9138_v17  ;;  %v6593_v19 = vsel %vm6058_vm4, %v6592_v10, %v6591_v9  ;;  %v6807_v23 = vsel %vm6058_vm4, %v6806_v22, %v6805_v21  ;;  %v8984_v31 = vpack.c.bf16 %v6916_v18, %v6915_v30  ;;  %v6134_v33 = vunpack.c.l.s4 %v9141_v32 }
0x26cf   :  { %8601 = vmatprep.mubr.msk.f32.mxu0 %vm9139_vm1, %v9138_v17 }
0x26d0   :  { %8937 = vmatpush3.bf16.msra.mxu1 %v8936_v39  ;;  %v6135_v35 = vunpack.c.0.s8 %v6134_v33 }
0x26d1   :  { %8955 = vmatpush3.bf16.msra.mxu0 %v8954_v40  ;;  %8944 = vmatprep.subr.bf16.mxu1 %v9140_v0 }
0x26d2   :  { %8962 = vmatprep.subr.bf16.mxu0 %v9140_v0  ;;  %v10321_v37 = vsub.s32 %v6135_v35, %v6137_v36 }
0x26d3   :  { %8569 = vmatmul.mubr.msk.f32.vlgmr.msra.gmra.mrb[70].mxu1 %vm100_vm0, %v6165_v53 }
0x26d4   :  { %8946 = vmatpush3.bf16.msra.mxu1 %v8945_v48  ;;  %8602 = vmatmul.mubr.msk.f32.vlgmr.msra.gmra.mrb[58].mxu0 %vm100_vm0, %v6486_v59 }
0x26d5   :  { %8964 = vmatpush3.bf16.msra.mxu0 %v8963_v49  ;;  %8947 = vmatprep.subr.bf16.mxu1 %v9140_v0 }
0x26d6   :  { %8965 = vmatprep.subr.bf16.mxu0 %v9140_v0  ;;  %8590 = vmatprep.mubr.msk.f32.mxu1 %vm9139_vm1, %v9138_v17 }
0x26d7   :  { %8623 = vmatprep.mubr.msk.f32.mxu0 %vm9139_vm1, %v9138_v17 }
0x26d8   :  { %8949 = vmatpush3.bf16.msra.mxu1 %v8948_v60 }
0x26d9   :  { %8967 = vmatpush3.bf16.msra.mxu0 %v8966_v61  ;;  %8956 = vmatprep.subr.bf16.mxu1 %v9140_v0 }
0x26da   :  { %8974 = vmatprep.subr.bf16.mxu0 %v9140_v0 }
0x26db   :  { %8591 = vmatmul.mubr.msk.f32.vlgmr.msra.gmra.mrb[72].mxu1 %vm100_vm0, %v6379_v4 }
0x26dc   :  { %8958 = vmatpush3.bf16.msra.mxu1 %v8957_v1  ;;  %8624 = vmatmul.mubr.msk.f32.vlgmr.msra.gmra.mrb[60].mxu0 %vm100_vm0, %v6700_v5 }
0x26dd   :  { %8959 = vmatprep.subr.bf16.mxu1 %v9140_v0  ;;  %8612 = vmatprep.mubr.msk.f32.mxu1 %vm9139_vm1, %v9138_v17 }
0x26de   :  { %8653 = vmatprep.mubr.msk.f32.mxu0 %vm9139_vm1, %v9138_v17  ;;  %8976 = vmatpush3.bf16.msra.mxu0 %v8975_v26 }
0x26df   :  { %8977 = vmatprep.subr.bf16.mxu0 %v9140_v0 }
0x26e0   :  { %8961 = vmatpush3.bf16.msra.mxu1 %v8960_v6 }
0x26e1   :  { %8968 = vmatprep.subr.bf16.mxu1 %v9140_v0 }
0x26e2   :  { %8979 = vmatpush3.bf16.msra.mxu0 %v8978_v28 }
0x26e3   :  { %8613 = vmatmul.mubr.msk.f32.vlgmr.msra.gmra.mrb[74].mxu1 %vm100_vm0, %v6593_v19  ;;  %8980 = vmatprep.subr.bf16.mxu0 %v9140_v0 }
0x26e4   :  { %8970 = vmatpush3.bf16.msra.mxu1 %v8969_v11  ;;  %8634 = vmatprep.mubr.msk.f32.mxu1 %vm9139_vm1, %v9138_v17 }
0x26e5   :  { %8971 = vmatprep.subr.bf16.mxu1 %v9140_v0 }
0x26e6   :  { %8982 = vmatpush3.bf16.msra.mxu0 %v8981_v29 }
0x26e7   :  { %8983 = vmatprep.subr.bf16.mxu0 %v9140_v0 }
0x26e8   :  { %8973 = vmatpush3.bf16.msra.mxu1 %v8972_v20 }
0x26e9   :  { %8986 = vmatprep.subr.bf16.mxu1 %v9140_v0 }
0x26ea   :  { %8985 = vmatpush3.bf16.msra.mxu0 %v8984_v31 }
0x26eb   :  { %8635 = vmatmul.mubr.msk.f32.vlgmr.msra.gmra.mrb[76].mxu1 %vm100_vm0, %v6807_v23  ;;  %8998 = vmatprep.subr.bf16.mxu0 %v9140_v0 }
0x26ec   :  { %8672 = vmatprep.mubr.msk.f32.mxu1 %vm9139_vm1, %v9138_v17 }
0x279e   :  { %v6128_v38 = vpop.f32.mrb[68].mxu1 }
0x279f   :  { %v6139_v39 = vrot.slane %v6128_v38, %v10321_v37  ;;  %v8559_v40 = vpop.f32.mrb[69].mxu1  ;;  %v6341_v41 = vpop.f32.mrb[56].mxu0 }
0x27a0   :  { %v8581_v42 = vpop.f32.mrb[57].mxu0  ;;  %v6352_v45 = vrot.slane %v6341_v41, %v10321_v37 }
0x27a1   :  { %v6140_v43 = vcombine.high %v6139_v39, %v6139_v39  ;;  %v6147_v44 = vrot.slane %v6139_v39, %v10321_v37 }
0x27a2   :  { %v6353_v58 = vcombine.high %v6352_v45, %v6352_v45  ;;  %v6360_v62 = vrot.slane %v6352_v45, %v10321_v37 }
0x27a3   :  { %v6154_v48 = vrot.slane %v6140_v43, %v10321_v37  ;;  %v6157_v57 = vadd.f32 %v6147_v44, %v6049_v46 }
0x27a4   :  { %v6367_v55 = vrot.slane %v6353_v58, %v10321_v37 }
0x27a5   :  { %v6158_v61 = vadd.f32 %v6154_v48, %v6049_v46  ;;  %v7052_v48 = vld [vmem:[%s10465_s22 + $0x8] sm:$0xff] }
0x27a6   :  { %v6234_v47 = vpop.f32.mrb[70].mxu1 }
0x27a7   :  { %v6245_v49 = vrot.slane %v6234_v47, %v10321_v37  ;;  %v8570_v50 = vpop.f32.mrb[71].mxu1  ;;  %v6555_v51 = vpop.f32.mrb[58].mxu0  ;;  %v7051_v47 = vld [vmem:[%s10465_s22] sm:$0xff] }
0x27a8   :  { %v8603_v53 = vpop.f32.mrb[59].mxu0  ;;  %v6566_v54 = vrot.slane %v6555_v51, %v10321_v37  ;;  %v7053_v50 = vld [vmem:[%s10465_s22 + $0x10] sm:$0xff] }
0x27a9   :  { %v6246_v59 = vcombine.high %v6245_v49, %v6245_v49  ;;  %v6253_v60 = vrot.slane %v6245_v49, %v10321_v37  ;;  %v8987_v49 = vpack.c.bf16 %v7052_v48, %v7051_v47  ;;  %v7055_v53 = vld [vmem:[%s10465_s22 + $0x20] sm:$0xff] }
0x27aa   :  { %v6567_v8 = vcombine.high %v6566_v54, %v6566_v54  ;;  %v6574_v11 = vrot.slane %v6566_v54, %v10321_v37 }
0x27ab   :  { %v6260_v63 = vrot.slane %v6246_v59, %v10321_v37  ;;  %v6263_v56 = vadd.f32 %v6253_v60, %v6157_v57  ;;  %8988 = vmatpush3.bf16.msra.mxu1 %v8987_v49  ;;  %v7056_v57 = vld [vmem:[%s10465_s22 + $0x28] sm:$0xff]  ;;  %v7057_v59 = vld [vmem:[%s10465_s22 + $0x30] sm:$0xff]  ;;  %v7058_v60 = vld [vmem:[%s10465_s22 + $0x38] sm:$0xff] }
0x27ac   :  { %v6581_v19 = vrot.slane %v6567_v8, %v10321_v37  ;;  %8989 = vmatprep.subr.bf16.mxu1 %v9140_v0  ;;  %v8993_v58 = vpack.c.bf16 %v7056_v57, %v7055_v53 }
0x27ad   :  { %v6264_v52 = vadd.f32 %v6260_v63, %v6158_v61  ;;  %v6370_v1 = vadd.f32 %v6360_v62, %v6263_v56  ;;  %v8996_v61 = vpack.c.bf16 %v7058_v60, %v7057_v59  ;;  %v9023_v62 = vld [vmem:[%s10464_s21] ss:$0 sps:$4 sm:$0x11]  }
0x27ae   :  { %v6448_v2 = vpop.f32.mrb[72].mxu1  ;;  %v6943_v63 = vrot.slane %v9023_v62, %v10321_v37 }
0x27af   :  { %v6371_v3 = vadd.f32 %v6367_v55, %v6264_v52  ;;  %v6459_v4 = vrot.slane %v6448_v2, %v10321_v37  ;;  %v8592_v5 = vpop.f32.mrb[73].mxu1  ;;  %v6769_v6 = vpop.f32.mrb[60].mxu0 }
0x27b0   :  { %v8625_v7 = vpop.f32.mrb[61].mxu0  ;;  %v6780_v21 = vrot.slane %v6769_v6, %v10321_v37  ;;  %v6950_v56 = vrot.slane %v6943_v63, %v10321_v37 }
0x27b1   :  { %v6460_v9 = vcombine.high %v6459_v4, %v6459_v4  ;;  %v6467_v10 = vrot.slane %v6459_v4, %v10321_v37 }
0x27b2   :  { %v6781_v27 = vcombine.high %v6780_v21, %v6780_v21  ;;  %v6788_v16 = vrot.slane %v6780_v21, %v10321_v37  ;;  %v9024_v21 = vld [vmem:[%s10506_s20] ss:$0 sps:$4 sm:$0x11]  }
0x27b3   :  { %v6474_v12 = vrot.slane %v6460_v9, %v10321_v37  ;;  %v6477_v14 = vadd.f32 %v6467_v10, %v6370_v1  ;;  %v7193_v10 = vld [vmem:[%s10467_s24] sm:$0xff] }
0x27b4   :  { %v6795_v30 = vrot.slane %v6781_v27, %v10321_v37 }
0x27b5   :  { %v6478_v20 = vadd.f32 %v6474_v12, %v6371_v3  ;;  %v6584_v22 = vadd.f32 %v6574_v11, %v6477_v14  ;;  %v7194_v11 = vld [vmem:[%s10467_s24 + $0x8] sm:$0xff]  ;;  %v7195_v14 = vld [vmem:[%s10467_s24 + $0x10] sm:$0xff] }
0x27b6   :  { %v6662_v23 = vpop.f32.mrb[74].mxu1  ;;  %v8999_v12 = vpack.c.bf16 %v7194_v11, %v7193_v10 }
0x27b7   :  { %v6585_v24 = vadd.f32 %v6581_v19, %v6478_v20  ;;  %v6673_v25 = vrot.slane %v6662_v23, %v10321_v37  ;;  %v8614_v26 = vpop.f32.mrb[75].mxu1  ;;  %v7196_v19 = vld [vmem:[%s10467_s24 + $0x18] sm:$0xff] }
0x27b8   :  { %v9002_v20 = vpack.c.bf16 %v7196_v19, %v7195_v14 }
0x27b9   :  { %v6674_v13 = vcombine.high %v6673_v25, %v6673_v25  ;;  %v6681_v28 = vrot.slane %v6673_v25, %v10321_v37 }
0x27bb   :  { %v6688_v15 = vrot.slane %v6674_v13, %v10321_v37  ;;  %v6691_v29 = vadd.f32 %v6681_v28, %v6584_v22  ;;  %v7085_v22 = vrot.slane %v9024_v21, %v10321_v37 }
0x27bd   :  { %v6692_v18 = vadd.f32 %v6688_v15, %v6585_v24  ;;  %v6798_v31 = vadd.f32 %v6788_v16, %v6691_v29  ;;  %v7092_v23 = vrot.slane %v7085_v22, %v10321_v37 }
0x27be   :  { %v6876_v32 = vpop.f32.mrb[76].mxu1 }
0x27bf   :  { %v6799_v33 = vadd.f32 %v6795_v30, %v6692_v18  ;;  %v6887_v34 = vrot.slane %v6876_v32, %v10321_v37  ;;  %v8636_v35 = vpop.f32.mrb[77].mxu1 }
0x27c1   :  { %v6888_v36 = vcombine.high %v6887_v34, %v6887_v34  ;;  %v6895_v38 = vrot.slane %v6887_v34, %v10321_v37 }
0x27c3   :  { %v6902_v39 = vrot.slane %v6888_v36, %v10321_v37  ;;  %v6905_v40 = vadd.f32 %v6895_v38, %v6798_v31  ;;  %v9025_v31 = vld [vmem:[%s10507_s19] ss:$0 sps:$4 sm:$0x11]  }
0x27c4   :  { %v7223_v32 = vrot.slane %v9025_v31, %v10321_v37 }
0x27c5   :  { %v6906_v41 = vadd.f32 %v6902_v39, %v6799_v33  ;;  %v6907_v42 = vmax.f32 %v6905_v40, 0.0 }
0x27c6   :  { %v7230_v33 = vrot.slane %v7223_v32, %v10321_v37 }
0x27c7   :  { %v6908_v43 = vmax.f32 %v6906_v41, 0.0 }
0x27c9   :  { %v6920_v44 = vcombine.low %v6907_v42, %v6908_v43 }
0x27cb   :  { %v6927_v45 = vrot.slane %v6920_v44, %v10321_v37 }
0x27cd   :  { %v6934_v46 = vrot.slane %v6927_v45, %v10321_v37 }
0x27cf   :  { %8654 = vmatmul.mubr.msk.f32.vlgmr.msra.gmra.mrb[62].mxu0 %vm2935_vm3, %v6934_v46 }
0x27d0   :  { %8683 = vmatprep.mubr.msk.f32.mxu0 %vm9139_vm1, %v9138_v17  ;;  %v7054_v17 = vld [vmem:[%s10465_s22 + $0x18] sm:$0xff]  ;;  %9000 = vmatpush3.bf16.msra.mxu0 %v8999_v12 }
0x27d1   :  { %v8990_v51 = vpack.c.bf16 %v7054_v17, %v7053_v50  ;;  %9001 = vmatprep.subr.bf16.mxu0 %v9140_v0 }
0x27d3   :  { %8991 = vmatpush3.bf16.msra.mxu1 %v8990_v51 }
0x27d4   :  { %8992 = vmatprep.subr.bf16.mxu1 %v9140_v0  ;;  %9003 = vmatpush3.bf16.msra.mxu0 %v9002_v20 }
0x27d7   :  { %8994 = vmatpush3.bf16.msra.mxu1 %v8993_v58 }
0x27d8   :  { %8995 = vmatprep.subr.bf16.mxu1 %v9140_v0 }
0x27db   :  { %8997 = vmatpush3.bf16.msra.mxu1 %v8996_v61 }
0x28a2   :  { %v7020_v55 = vpop.f32.mrb[62].mxu0 }
0x28a3   :  { %v7021_v52 = vadd.f32 %v7020_v55, %v6950_v56  ;;  %v8655_v54 = vpop.f32.mrb[63].mxu0 }
0x28a5   :  { %v7031_v1 = vrot.slane %v7021_v52, %v10321_v37 }
0x28a7   :  { %v7032_v2 = vcombine.high %v7031_v1, %v7031_v1  ;;  %v7039_v3 = vrot.slane %v7031_v1, %v10321_v37 }
0x28a9   :  { %v7046_v4 = vrot.slane %v7032_v2, %v10321_v37  ;;  %v7049_v5 = vmax.f32 %v7039_v3, 0.0 }
0x28ab   :  { %v7050_v6 = vmax.f32 %v7046_v4, 0.0 }
0x28ad   :  { %v7062_v7 = vcombine.low %v7049_v5, %v7050_v6 }
0x28af   :  { %v7069_v8 = vrot.slane %v7062_v7, %v10321_v37 }
0x28b1   :  { %v7076_v9 = vrot.slane %v7069_v8, %v10321_v37 }
0x28b3   :  { %8673 = vmatmul.mubr.msk.f32.vlgmr.msra.gmra.mrb[78].mxu1 %vm2935_vm3, %v7076_v9 }
0x2986   :  { %v7162_v24 = vpop.f32.mrb[78].mxu1 }
0x2987   :  { %v7163_v0 = vadd.f32 %v7162_v24, %v7092_v23  ;;  %v8674_v25 = vpop.f32.mrb[79].mxu1 }
0x2989   :  { %v7173_v26 = vrot.slane %v7163_v0, %v10321_v37 }
0x298b   :  { %v7174_v27 = vcombine.high %v7173_v26, %v7173_v26  ;;  %v7181_v13 = vrot.slane %v7173_v26, %v10321_v37 }
0x298d   :  { %v7188_v28 = vrot.slane %v7174_v27, %v10321_v37  ;;  %v7191_v16 = vmax.f32 %v7181_v13, 0.0 }
0x298f   :  { %v7192_v15 = vmax.f32 %v7188_v28, 0.0 }
0x2991   :  { %v7200_v29 = vcombine.low %v7191_v16, %v7192_v15 }
0x2993   :  { %v7207_v30 = vrot.slane %v7200_v29, %v10321_v37 }
0x2995   :  { %v7214_v18 = vrot.slane %v7207_v30, %v10321_v37 }
0x2997   :  { %8684 = vmatmul.mubr.msk.f32.vlgmr.msra.gmra.mrb[64].mxu0 %vm100_vm0, %v7214_v18 }
0x2a6a   :  { %v7300_v34 = vpop.f32.mrb[64].mxu0 }
0x2a6b   :  { %v7301_v35 = vadd.f32 %v7300_v34, %v7230_v33  ;;  %v8685_v36 = vpop.f32.mrb[65].mxu0 }
0x2a6d   :  { %v7311_v38 = vrot.slane %v7301_v35, %v10321_v37 }
0x2a6f   :  { %v7319_v39 = vrot.slane %v7311_v38, %v10321_v37  ;;  %v7312_v40 = vcombine.high %v7311_v38, %v7311_v38 }
0x2a71   :  { %v7330_v41 = vsel %vm7329_vm5, %v7319_v39, -inf  ;;  %v7326_v42 = vrot.slane %v7312_v40, %v10321_v37 }
0x2a72   :  { %7331 = vmax.xlane.f32.xlu0 %v7330_v41 }
0x2a73   :  { %v7333_v43 = vsel %vm7329_vm5, %v7326_v42, -inf }
0x2a74   :  { %7334 = vmax.xlane.f32.xlu1 %v7333_v43 }
0x2aff   :  { %v7332_v44 = vpop.xlane.xlu0 %7331 }
0x2b00   :  { %v7336_v45 = vsub.f32 %v7319_v39, %v7332_v44 }
0x2b01   :  { %v7335_v46 = vpop.xlane.xlu1 %7334 }
0x2b02   :  { %v7338_v47 = vmul.f32 1.442695, %v7336_v45  ;;  %v7337_v48 = vsub.f32 %v7326_v42, %v7335_v46 }
0x2b04   :  { %9106 = vpow2.f32 %v7338_v47  ;;  %v7340_v49 = vmul.f32 1.442695, %v7337_v48 }
0x2b06   :  { %9108 = vpow2.f32 %v7340_v49 }
0x2b0e   :  { %v9107_v50 = vpop.eup %9106 }
0x2b0f   :  { %v7342_v17 = vsel %vm7329_vm5, %v9107_v50, 0.0 }
0x2b10   :  { %v9109_v51 = vpop.eup %9108  ;;  %7343 = vadd.xlane.f32.xlu0 %v7342_v17 }
0x2b11   :  { %v7345_v53 = vsel %vm7329_vm5, %v9109_v51, 0.0 }
0x2b12   :  { %7346 = vadd.xlane.f32.xlu1 %v7345_v53 }
0x2b9d   :  { %v7344_v37 = vpop.xlane.xlu0 %7343 }
0x2b9e   :  { %9110 = vrcp.f32 %v7344_v37 }
0x2b9f   :  { %v7347_v57 = vpop.xlane.xlu1 %7346 }
0x2ba0   :  { %9112 = vrcp.f32 %v7347_v57 }
0x2ba8   :  { %v9111_v58 = vpop.eup %9110 }
0x2ba9   :  { %v7349_v59 = vmul.f32 %v9111_v58, %v9107_v50 }
0x2baa   :  { %v9113_v60 = vpop.eup %9112 }
0x2bab   :  { %v7351_v61 = vmul.f32 %v9113_v60, %v9109_v51  ;;  %7352 = vst.msk [vmem:[#allocation2] sm:$0x1] %vm7329_vm5, %v7349_v59 }
0x2bad   :  { %7353 = vst.msk [vmem:[#allocation2 + $0x1] sm:$0x1] %vm7329_vm5, %v7351_v61 }
0x2bae   :  { %9125 = shalt.err (!%p9122_p4)
}
0x2baf   :  { %s10508_s5 = sld [smem:[#allocation18_spill]] }
0x2bb5   :  { %s9126_s0 = scalar_lea.hbm %s10508_s5, 32 }
0x2bb6   :  { %p9127_p5 = scmp.ne.s32.totalorder %s10508_s5, %s9126_s0  ;;  %p9130_p6 = scmp.lt.u32.totalorder %s9126_s0, %s10508_s5 }
0x2bb8   :  { %p9132_p7 = pnand %p9130_p6, %p9127_p5 }
0x2bba   :  { %9135 = shalt.err (!%p9132_p7)
}
0x2bbb   :  { %s9143_s11 = smov 16   ;;  %s9144_s26 = smov 1  }
0x2bbc   :  { %7365 = dma.vmem_to_hbm [thread:$0]  %s7360_s25, 32, %s10508_s5, [#allocation3], %s9143_s11, %s9143_s11, %s9144_s26  }
0x2bbd   :  { %9136 = dma.done.wait [#allocation3], 32  }
0x2bbe   :  { %9137 = vsyncadd [#allocation3], 4294967264 }
0x2bbf   :  { %7369 = vsyncpa [#allocation3], 1 }

</bundles_post_ra>
